<compile_context>
chip_gen: v7x
topology: tpu7x:2x2x1
jax: 0.10.0
libtpu: 0.0.40
codegen_flags: <defaults>
</compile_context>

<pallas_src>
import jax
import jax.numpy as jnp
from jax.experimental import pallas as pl
from jax.experimental.pallas import tpu as pltpu


def _round_up(x, m):
    return ((x + m - 1) // m) * m


def _num_tensorcores():
    """TensorCores per chip: 2 on v7x (megacore), 1 on v5e/v6e. Best effort."""
    try:
        kind = (getattr(jax.devices()[0], "device_kind", "") or "").lower()
        return 2 if "v7" in kind else 1
    except Exception:
        return 1


# ---------------------------------------------------------------------------
# Kernel
# ---------------------------------------------------------------------------
def dpn_kernel(x_ref, w1_ref, b1_ref, w2_ref, b2_ref, o_ref):
    act = o_ref.shape[-1]                       # real (unpadded) action width
    x = x_ref[...]                              # (TB, obs) f32
    # Layer 1: Linear + ReLU  (MXU matmul, f32 accumulate; hidden padded to Hp)
    h = jnp.dot(x, w1_ref[...], preferred_element_type=jnp.float32) + b1_ref[...]
    h = jnp.maximum(h, 0.0)                     # (TB, Hp)
    # Layer 2: Linear.  Padded action lanes carry bias -1e30 so they never win
    # the max and their exp() underflows to exactly 0 below.
    logits = jnp.dot(h, w2_ref[...], preferred_element_type=jnp.float32) + b2_ref[...]
    # Numerically stable log-softmax over the padded, lane-dense action dim.
    m = jnp.max(logits, axis=-1, keepdims=True)
    shifted = logits - m
    lse = jnp.log(jnp.sum(jnp.exp(shifted), axis=-1, keepdims=True))
    # Store only the real action lanes: compact (TB, act) output.
    o_ref[...] = (shifted - lse)[:, :act].astype(o_ref.dtype)


# ---------------------------------------------------------------------------
# One-time parameter preparation (hoisted out of the per-call path)
# ---------------------------------------------------------------------------
def prepare_params(w1, b1, w2, b2):
    """Pad weights/biases to lane-dense shapes ONCE; reuse across forward calls.

    w1:(obs,h1)  b1:(h1,) or (1,h1)  w2:(h1,act)  b2:(act,) or (1,act)
    (weights already transposed vs. PyTorch so the kernel computes x @ W + b).
    """
    obs, h1 = w1.shape
    act = w2.shape[1]
    Hp = _round_up(max(h1, 128), 128)
    Ap = _round_up(max(act, 128), 128)
    w1p = jnp.pad(w1.astype(jnp.float32), ((0, 0), (0, Hp - h1)))
    b1p = jnp.pad(jnp.reshape(b1, (1, h1)).astype(jnp.float32),
                  ((0, 0), (0, Hp - h1)))
    w2p = jnp.pad(w2.astype(jnp.float32), ((0, Hp - h1), (0, Ap - act)))
    # Padded action lanes get a huge negative (finite in f32) bias so they drop
    # out of the log-softmax.  (If dtypes are ever lowered, switch to masking.)
    b2p = jnp.pad(jnp.reshape(b2, (1, act)).astype(jnp.float32),
                  ((0, 0), (0, Ap - act)), constant_values=-1e30)
    return {"w1": w1p, "b1": b1p, "w2": w2p, "b2": b2p,
            "obs": obs, "act": act, "Hp": Hp, "Ap": Ap}


# ---------------------------------------------------------------------------
# Forward
# ---------------------------------------------------------------------------
def dpn_forward(x, params, *, num_cores=None, vmem_budget_bytes=24 << 20):
    """x:(B,obs) f32, params from prepare_params() -> (B,act) log-probs."""
    B, obs = x.shape
    assert obs == params["obs"], (obs, params["obs"])
    act, Hp, Ap = params["act"], params["Hp"], params["Ap"]
    w1p, b1p, w2p, b2p = params["w1"], params["b1"], params["w2"], params["b2"]

    if num_cores is None:
        num_cores = _num_tensorcores()

    # Grid sized to the core count: 1 step on v5e/v6e, 2 parallel steps on v7x.
    Bp = _round_up(B, 8 * num_cores)
    TB = Bp // num_cores

    # VMEM budget per step (weights single-buffered, x/out double-buffered).
    # Only kicks in when B / obs / h1 scale up; irrelevant at toy sizes.
    weight_bytes = (obs * Hp + Hp * Ap + Hp + Ap) * 4
    while TB > 8 and weight_bytes + 2 * TB * (obs + Ap + act) * 4 > vmem_budget_bytes:
        TB = _round_up((TB + 1) // 2, 8)
    Bp = _round_up(B, TB)
    if Bp != B:
        x = jnp.pad(x, ((0, Bp - B), (0, 0)))
    grid = (Bp // TB,)

    cost = pl.CostEstimate(
        flops=2 * Bp * obs * Hp + 2 * Bp * Hp * Ap,
        transcendentals=Bp * (Ap + 1),          # exp per (padded) lane + log
        bytes_accessed=4 * (Bp * obs + obs * Hp + Hp * Ap + Hp + Ap + Bp * act),
    )

    def run(single_buffer_weights):
        def weight_spec(shape):
            kwargs = dict(memory_space=pltpu.MemorySpace.VMEM)
            if single_buffer_weights:
                # Weights never change across grid steps: one buffer is enough.
                kwargs["pipeline_mode"] = pl.Buffered(1)
            return pl.BlockSpec(shape, lambda i: (0, 0), **kwargs)

        return pl.pallas_call(
            dpn_kernel,
            out_shape=jax.ShapeDtypeStruct((Bp, act), jnp.float32),
            grid=grid,
            in_specs=[
                pl.BlockSpec((TB, obs), lambda i: (i, 0),
                             memory_space=pltpu.MemorySpace.VMEM),
                weight_spec((obs, Hp)),
                weight_spec((1, Hp)),
                weight_spec((Hp, Ap)),
                weight_spec((1, Ap)),
            ],
            out_specs=pl.BlockSpec((TB, act), lambda i: (i, 0),
                                   memory_space=pltpu.MemorySpace.VMEM),
            compiler_params=pltpu.CompilerParams(
                dimension_semantics=("parallel",),
            ),
            cost_estimate=cost,
        )(x, w1p, b1p, w2p, b2p)

    try:
        out = run(True)
    except Exception:
        # pipeline_mode=Buffered(1) unsupported on this build -> default buffering.
        out = run(False)

    return out[:B] if Bp != B else out


def init_params(key, obs_size, action_size):
    """Deterministic init mimicking nn.Linear's uniform(-1/sqrt(in), 1/sqrt(in))."""
    h1 = int(obs_size * 2)
    k1, k2, k3, k4 = jax.random.split(key, 4)
    lim1 = 1.0 / jnp.sqrt(obs_size)
    lim2 = 1.0 / jnp.sqrt(h1)
    w1 = jax.random.uniform(k1, (obs_size, h1), jnp.float32, -lim1, lim1)
    b1 = jax.random.uniform(k2, (1, h1), jnp.float32, -lim1, lim1)
    w2 = jax.random.uniform(k3, (h1, action_size), jnp.float32, -lim2, lim2)
    b2 = jax.random.uniform(k4, (1, action_size), jnp.float32, -lim2, lim2)
    return w1, b1, w2, b2


if __name__ == "__main__":
    key = jax.random.PRNGKey(0)
    batch, obs_size, action_size = 512, 32, 8

    kx, kp = jax.random.split(key)
    x = jax.random.normal(kx, (batch, obs_size), jnp.float32)
    w1, b1, w2, b2 = init_params(kp, obs_size, action_size)

    params = prepare_params(w1, b1, w2, b2)      # one-time padding, reused
    out = dpn_forward(x, params)
    jax.block_until_ready(out)

    # Reference check in plain JAX (same math as the PyTorch module).
    h_ref = jnp.maximum(x @ w1 + b1, 0.0)
    logits_ref = h_ref @ w2 + b2
    ref = jax.nn.log_softmax(logits_ref, axis=-1)
    assert out.shape == ref.shape, f"shape mismatch {out.shape} vs {ref.shape}"
    assert jnp.allclose(out, ref, atol=1e-5, rtol=1e-5), "mismatch vs reference"

    print("KERNEL_OK")
</pallas_src>

<mosaic_0001>
module attributes {stable_mosaic.version = 11 : i64} {
  func.func @dpn_kernel(%arg0: i32, %arg1: memref<512x32xf32, #tpu.memory_space<vmem>>, %arg2: memref<32x128xf32, #tpu.memory_space<vmem>>, %arg3: memref<1x128xf32, #tpu.memory_space<vmem>>, %arg4: memref<128x128xf32, #tpu.memory_space<vmem>>, %arg5: memref<1x128xf32, #tpu.memory_space<vmem>>, %arg6: memref<512x8xf32, #tpu.memory_space<vmem>>) attributes {dimension_semantics = [#tpu.dimension_semantics<parallel>], iteration_bounds = array<i64: 1>, scalar_prefetch = 0 : i64, scratch_operands = 0 : i64, tpu.core_type = #tpu.core_type<tc>, window_params = [{transform_indices = @transform_0, window_bounds = array<i64: 512, 32>}, {pipeline_mode = #tpu.pipeline_mode<synchronous>, transform_indices = @transform_1, window_bounds = array<i64: 32, 128>}, {pipeline_mode = #tpu.pipeline_mode<synchronous>, transform_indices = @transform_2, window_bounds = array<i64: 1, 128>}, {pipeline_mode = #tpu.pipeline_mode<synchronous>, transform_indices = @transform_3, window_bounds = array<i64: 128, 128>}, {pipeline_mode = #tpu.pipeline_mode<synchronous>, transform_indices = @transform_4, window_bounds = array<i64: 1, 128>}, {transform_indices = @transform_5, window_bounds = array<i64: 512, 8>}]} {
    %c0 = arith.constant 0 : index
    %c0_0 = arith.constant 0 : index
    %0 = vector.load %arg1[%c0, %c0_0] : memref<512x32xf32, #tpu.memory_space<vmem>>, vector<512x32xf32>
    %c0_1 = arith.constant 0 : index
    %c0_2 = arith.constant 0 : index
    %1 = vector.load %arg2[%c0_1, %c0_2] : memref<32x128xf32, #tpu.memory_space<vmem>>, vector<32x128xf32>
    %cst = arith.constant dense<0.000000e+00> : vector<512x128xf32>
    %2 = tpu.matmul %0, %1, %cst {dimension_numbers = #tpu.dot_dimension_numbers<[1], [0], [0], [1], [0, 0, 1, 1], [], []>} : vector<512x32xf32>, vector<32x128xf32>, vector<512x128xf32> -> vector<512x128xf32>
    %c0_3 = arith.constant 0 : index
    %c0_4 = arith.constant 0 : index
    %3 = vector.load %arg3[%c0_3, %c0_4] : memref<1x128xf32, #tpu.memory_space<vmem>>, vector<1x128xf32>
    %4 = vector.broadcast %3 : vector<1x128xf32> to vector<512x128xf32>
    %5 = arith.addf %2, %4 : vector<512x128xf32>
    %cst_5 = arith.constant 0.000000e+00 : f32
    %6 = vector.broadcast %cst_5 : f32 to vector<512x128xf32>
    %7 = arith.maximumf %5, %6 : vector<512x128xf32>
    %c0_6 = arith.constant 0 : index
    %c0_7 = arith.constant 0 : index
    %8 = vector.load %arg4[%c0_6, %c0_7] : memref<128x128xf32, #tpu.memory_space<vmem>>, vector<128x128xf32>
    %cst_8 = arith.constant dense<0.000000e+00> : vector<512x128xf32>
    %9 = tpu.matmul %7, %8, %cst_8 {dimension_numbers = #tpu.dot_dimension_numbers<[1], [0], [0], [1], [0, 0, 1, 1], [], []>} : vector<512x128xf32>, vector<128x128xf32>, vector<512x128xf32> -> vector<512x128xf32>
    %c0_9 = arith.constant 0 : index
    %c0_10 = arith.constant 0 : index
    %10 = vector.load %arg5[%c0_9, %c0_10] : memref<1x128xf32, #tpu.memory_space<vmem>>, vector<1x128xf32>
    %11 = vector.broadcast %10 : vector<1x128xf32> to vector<512x128xf32>
    %12 = arith.addf %9, %11 : vector<512x128xf32>
    %cst_11 = arith.constant dense<0xFF800000> : vector<512xf32>
    %13 = vector.multi_reduction <maximumf>, %12, %cst_11 [1] : vector<512x128xf32> to vector<512xf32>
    %14 = vector.shape_cast %13 : vector<512xf32> to vector<512x1xf32>
    %15 = vector.broadcast %14 : vector<512x1xf32> to vector<512x128xf32>
    %16 = arith.subf %12, %15 : vector<512x128xf32>
    %17 = math.exp %16 : vector<512x128xf32>
    %cst_12 = arith.constant dense<0.000000e+00> : vector<512xf32>
    %18 = vector.multi_reduction <add>, %17, %cst_12 [1] : vector<512x128xf32> to vector<512xf32>
    %19 = vector.shape_cast %18 : vector<512xf32> to vector<512x1xf32>
    %20 = math.log %19 : vector<512x1xf32>
    %21 = vector.broadcast %20 : vector<512x1xf32> to vector<512x128xf32>
    %22 = arith.subf %16, %21 : vector<512x128xf32>
    %23 = vector.extract_strided_slice %22 {offsets = [0, 0], sizes = [512, 8], strides = [1, 1]} : vector<512x128xf32> to vector<512x8xf32>
    %c0_13 = arith.constant 0 : index
    %c0_14 = arith.constant 0 : index
    %24 = vector.load %arg6[%c0_13, %c0_14] : memref<512x8xf32, #tpu.memory_space<vmem>>, vector<512x8xf32>
    tpu.vector_store %arg6[%c0_13, %c0_14], %23 {strides = array<i32>} : memref<512x8xf32, #tpu.memory_space<vmem>>, vector<512x8xf32>,
    return
  }
  func.func @transform_0(%arg0: i32) -> (i32, i32) {
    %c0_i32 = arith.constant 0 : i32
    %c0_i32_0 = arith.constant 0 : i32
    return %arg0, %c0_i32 : i32, i32
  }
  func.func @transform_1(%arg0: i32) -> (i32, i32) {
    %c0_i32 = arith.constant 0 : i32
    %c0_i32_0 = arith.constant 0 : i32
    %c0_i32_1 = arith.constant 0 : i32
    return %c0_i32, %c0_i32_0 : i32, i32
  }
  func.func @transform_2(%arg0: i32) -> (i32, i32) {
    %c0_i32 = arith.constant 0 : i32
    %c0_i32_0 = arith.constant 0 : i32
    %c0_i32_1 = arith.constant 0 : i32
    return %c0_i32, %c0_i32_0 : i32, i32
  }
  func.func @transform_3(%arg0: i32) -> (i32, i32) {
    %c0_i32 = arith.constant 0 : i32
    %c0_i32_0 = arith.constant 0 : i32
    %c0_i32_1 = arith.constant 0 : i32
    return %c0_i32, %c0_i32_0 : i32, i32
  }
  func.func @transform_4(%arg0: i32) -> (i32, i32) {
    %c0_i32 = arith.constant 0 : i32
    %c0_i32_0 = arith.constant 0 : i32
    %c0_i32_1 = arith.constant 0 : i32
    return %c0_i32, %c0_i32_0 : i32, i32
  }
  func.func @transform_5(%arg0: i32) -> (i32, i32) {
    %c0_i32 = arith.constant 0 : i32
    %c0_i32_0 = arith.constant 0 : i32
    return %arg0, %c0_i32 : i32, i32
  }
}

module attributes {stable_mosaic.version = 11 : i64} {
  func.func @dpn_kernel(%arg0: i32, %arg1: memref<512x32xf32, #tpu.memory_space<vmem>>, %arg2: memref<32x128xf32, #tpu.memory_space<vmem>>, %arg3: memref<1x128xf32, #tpu.memory_space<vmem>>, %arg4: memref<128x128xf32, #tpu.memory_space<vmem>>, %arg5: memref<1x128xf32, #tpu.memory_space<vmem>>, %arg6: memref<512x8xf32, #tpu.memory_space<vmem>>) attributes {dimension_semantics = [#tpu.dimension_semantics<parallel>], iteration_bounds = array<i64: 1>, scalar_prefetch = 0 : i64, scratch_operands = 0 : i64, tpu.core_type = #tpu.core_type<tc>, window_params = [{transform_indices = @transform_0, window_bounds = array<i64: 512, 32>}, {pipeline_mode = #tpu.pipeline_mode<synchronous>, transform_indices = @transform_1, window_bounds = array<i64: 32, 128>}, {pipeline_mode = #tpu.pipeline_mode<synchronous>, transform_indices = @transform_2, window_bounds = array<i64: 1, 128>}, {pipeline_mode = #tpu.pipeline_mode<synchronous>, transform_indices = @transform_3, window_bounds = array<i64: 128, 128>}, {pipeline_mode = #tpu.pipeline_mode<synchronous>, transform_indices = @transform_4, window_bounds = array<i64: 1, 128>}, {transform_indices = @transform_5, window_bounds = array<i64: 512, 8>}]} {
    %c0 = arith.constant 0 : index
    %c0_0 = arith.constant 0 : index
    %0 = vector.load %arg1[%c0, %c0_0] : memref<512x32xf32, #tpu.memory_space<vmem>>, vector<512x32xf32>
    %c0_1 = arith.constant 0 : index
    %c0_2 = arith.constant 0 : index
    %1 = vector.load %arg2[%c0_1, %c0_2] : memref<32x128xf32, #tpu.memory_space<vmem>>, vector<32x128xf32>
    %cst = arith.constant dense<0.000000e+00> : vector<512x128xf32>
    %2 = tpu.matmul %0, %1, %cst {dimension_numbers = #tpu.dot_dimension_numbers<[1], [0], [0], [1], [0, 0, 1, 1], [], []>} : vector<512x32xf32>, vector<32x128xf32>, vector<512x128xf32> -> vector<512x128xf32>
    %c0_3 = arith.constant 0 : index
    %c0_4 = arith.constant 0 : index
    %3 = vector.load %arg3[%c0_3, %c0_4] : memref<1x128xf32, #tpu.memory_space<vmem>>, vector<1x128xf32>
    %4 = vector.broadcast %3 : vector<1x128xf32> to vector<512x128xf32>
    %5 = arith.addf %2, %4 : vector<512x128xf32>
    %cst_5 = arith.constant 0.000000e+00 : f32
    %6 = vector.broadcast %cst_5 : f32 to vector<512x128xf32>
    %7 = arith.maximumf %5, %6 : vector<512x128xf32>
    %c0_6 = arith.constant 0 : index
    %c0_7 = arith.constant 0 : index
    %8 = vector.load %arg4[%c0_6, %c0_7] : memref<128x128xf32, #tpu.memory_space<vmem>>, vector<128x128xf32>
    %cst_8 = arith.constant dense<0.000000e+00> : vector<512x128xf32>
    %9 = tpu.matmul %7, %8, %cst_8 {dimension_numbers = #tpu.dot_dimension_numbers<[1], [0], [0], [1], [0, 0, 1, 1], [], []>} : vector<512x128xf32>, vector<128x128xf32>, vector<512x128xf32> -> vector<512x128xf32>
    %c0_9 = arith.constant 0 : index
    %c0_10 = arith.constant 0 : index
    %10 = vector.load %arg5[%c0_9, %c0_10] : memref<1x128xf32, #tpu.memory_space<vmem>>, vector<1x128xf32>
    %11 = vector.broadcast %10 : vector<1x128xf32> to vector<512x128xf32>
    %12 = arith.addf %9, %11 : vector<512x128xf32>
    %cst_11 = arith.constant dense<0xFF800000> : vector<512xf32>
    %13 = vector.multi_reduction <maximumf>, %12, %cst_11 [1] : vector<512x128xf32> to vector<512xf32>
    %14 = vector.shape_cast %13 : vector<512xf32> to vector<512x1xf32>
    %15 = vector.broadcast %14 : vector<512x1xf32> to vector<512x128xf32>
    %16 = arith.subf %12, %15 : vector<512x128xf32>
    %17 = math.exp %16 : vector<512x128xf32>
    %cst_12 = arith.constant dense<0.000000e+00> : vector<512xf32>
    %18 = vector.multi_reduction <add>, %17, %cst_12 [1] : vector<512x128xf32> to vector<512xf32>
    %19 = vector.shape_cast %18 : vector<512xf32> to vector<512x1xf32>
    %20 = math.log %19 : vector<512x1xf32>
    %21 = vector.broadcast %20 : vector<512x1xf32> to vector<512x128xf32>
    %22 = arith.subf %16, %21 : vector<512x128xf32>
    %23 = vector.extract_strided_slice %22 {offsets = [0, 0], sizes = [512, 8], strides = [1, 1]} : vector<512x128xf32> to vector<512x8xf32>
    %c0_13 = arith.constant 0 : index
    %c0_14 = arith.constant 0 : index
    %24 = vector.load %arg6[%c0_13, %c0_14] : memref<512x8xf32, #tpu.memory_space<vmem>>, vector<512x8xf32>
    tpu.vector_store %arg6[%c0_13, %c0_14], %23 {strides = array<i32>} : memref<512x8xf32, #tpu.memory_space<vmem>>, vector<512x8xf32>,
    return
  }
  func.func @transform_0(%arg0: i32) -> (i32, i32) {
    %c0_i32 = arith.constant 0 : i32
    %c0_i32_0 = arith.constant 0 : i32
    return %arg0, %c0_i32 : i32, i32
  }
  func.func @transform_1(%arg0: i32) -> (i32, i32) {
    %c0_i32 = arith.constant 0 : i32
    %c0_i32_0 = arith.constant 0 : i32
    %c0_i32_1 = arith.constant 0 : i32
    return %c0_i32, %c0_i32_0 : i32, i32
  }
  func.func @transform_2(%arg0: i32) -> (i32, i32) {
    %c0_i32 = arith.constant 0 : i32
    %c0_i32_0 = arith.constant 0 : i32
    %c0_i32_1 = arith.constant 0 : i32
    return %c0_i32, %c0_i32_0 : i32, i32
  }
  func.func @transform_3(%arg0: i32) -> (i32, i32) {
    %c0_i32 = arith.constant 0 : i32
    %c0_i32_0 = arith.constant 0 : i32
    %c0_i32_1 = arith.constant 0 : i32
    return %c0_i32, %c0_i32_0 : i32, i32
  }
  func.func @transform_4(%arg0: i32) -> (i32, i32) {
    %c0_i32 = arith.constant 0 : i32
    %c0_i32_0 = arith.constant 0 : i32
    %c0_i32_1 = arith.constant 0 : i32
    return %c0_i32, %c0_i32_0 : i32, i32
  }
  func.func @transform_5(%arg0: i32) -> (i32, i32) {
    %c0_i32 = arith.constant 0 : i32
    %c0_i32_0 = arith.constant 0 : i32
    return %arg0, %c0_i32 : i32, i32
  }
}

</mosaic_0001>

<bundles_post_ra>
// kernel: tpu_custom_call.1
= control target key start
LH: loop header
LB: loop body
LE: loop exit
PB: predicated region body
PF: predicated region fallthrough
CT: control target
= control target key end

     0   :  { %vm95_vm0 = vcmask 261120   ;;  %vm1785_vm1 = vcmask 64512   ;;  %s3864_s1 = inlined_call_operand.vmem [shape: f32[32,128], index: 1, kind: input, shape index: {}]   ;;  %s3865_s0 = inlined_call_operand.vmem [shape: f32[512,32], index: 0, kind: input, shape index: {}]   ;;  %s3866_s3 = inlined_call_operand.vmem [shape: f32[128,128], index: 3, kind: input, shape index: {}]   ;;  %s3867_s2 = inlined_call_operand.vmem [shape: f32[1,128], index: 2, kind: input, shape index: {}]   ;;  %s3868_s4 = inlined_call_operand.vmem [shape: f32[1,128], index: 4, kind: input, shape index: {}]   ;;  %s3869_s5 = inlined_call_operand.vmem [shape: f32[512,8], index: 5, kind: output, shape index: {}]  }
   0x1   :  { %v84_v0 = vld [vmem:[%s3864_s1] sm:$0xff]  ;;  %v85_v1 = vld [vmem:[%s3864_s1 + $0x8] sm:$0xff]  ;;  %v86_v2 = vld [vmem:[%s3864_s1 + $0x10] sm:$0xff] }
   0x2   :  { %v2300_v3 = vpack.c.bf16 %v85_v1, %v84_v0  ;;  %v87_v4 = vld [vmem:[%s3864_s1 + $0x18] sm:$0xff]  ;;  %v20_v5 = vld [vmem:[%s3865_s0] sm:$0xff]  ;;  %v21_v7 = vld [vmem:[%s3865_s0 + $0x8] sm:$0xff] }
   0x3   :  { %v2304_v6 = vpack.c.bf16 %v87_v4, %v86_v2  ;;  %2076 = vmatprep.mubr.msk.f32.mxu0 %vm95_vm0, %v20_v5  ;;  %v22_v8 = vld [vmem:[%s3865_s0 + $0x10] sm:$0xff]  ;;  %v23_v9 = vld [vmem:[%s3865_s0 + $0x18] sm:$0xff]  ;;  %v24_v10 = vld [vmem:[%s3865_s0 + $0x20] sm:$0xff] }
   0x4   :  { %2301 = vmatprep.subr.bf16.mxu0 %v2300_v3  ;;  %v25_v11 = vld [vmem:[%s3865_s0 + $0x28] sm:$0xff]  ;;  %v737_v12 = vld [vmem:[%s3866_s3] sm:$0xff]  ;;  %v26_v13 = vld [vmem:[%s3865_s0 + $0x30] sm:$0xff] }
   0x5   :  { %2303 = vmatpush3.bf16.msra.mxu0 %v2300_v3  ;;  %v738_v14 = vld [vmem:[%s3866_s3 + $0x8] sm:$0xff]  ;;  %v27_v16 = vld [vmem:[%s3865_s0 + $0x38] sm:$0xff]  ;;  %v739_v17 = vld [vmem:[%s3866_s3 + $0x10] sm:$0xff] }
   0x6   :  { %2305 = vmatprep.subr.bf16.mxu0 %v2304_v6  ;;  %v2308_v15 = vpack.c.bf16 %v738_v14, %v737_v12  ;;  %v740_v18 = vld [vmem:[%s3866_s3 + $0x18] sm:$0xff]  ;;  %v28_v19 = vld [vmem:[%s3865_s0 + $0x40] sm:$0xff]  ;;  %v742_v22 = vld [vmem:[%s3866_s3 + $0x28] sm:$0xff] }
   0x7   :  { %v2312_v20 = vpack.c.bf16 %v740_v18, %v739_v17  ;;  %v741_v21 = vld [vmem:[%s3866_s3 + $0x20] sm:$0xff]  ;;  %v29_v23 = vld [vmem:[%s3865_s0 + $0x48] sm:$0xff]  ;;  %v743_v25 = vld [vmem:[%s3866_s3 + $0x30] sm:$0xff] }
   0x8   :  { %2340 = vmatprep.subr.bf16.mxu1 %v2308_v15  ;;  %v2316_v24 = vpack.c.bf16 %v742_v22, %v741_v21  ;;  %v30_v26 = vld [vmem:[%s3865_s0 + $0x50] sm:$0xff]  ;;  %v744_v27 = vld [vmem:[%s3866_s3 + $0x38] sm:$0xff]  ;;  %v745_v29 = vld [vmem:[%s3866_s3 + $0x40] sm:$0xff] }
   0x9   :  { %2307 = vmatpush3.bf16.msra.mxu0 %v2304_v6  ;;  %2348 = vmatpush3.bf16.msra.mxu1 %v2308_v15  ;;  %v2320_v28 = vpack.c.bf16 %v744_v27, %v743_v25  ;;  %v746_v30 = vld [vmem:[%s3866_s3 + $0x48] sm:$0xff]  ;;  %v31_v31 = vld [vmem:[%s3865_s0 + $0x58] sm:$0xff]  ;;  %v32_v32 = vld [vmem:[%s3865_s0 + $0x60] sm:$0xff] }
   0xa   :  { %2309 = vmatprep.subr.bf16.mxu0 %v2308_v15  ;;  %2341 = vmatprep.subr.bf16.mxu1 %v2312_v20  ;;  %v2324_v33 = vpack.c.bf16 %v746_v30, %v745_v29  ;;  %v747_v34 = vld [vmem:[%s3866_s3 + $0x50] sm:$0xff]  ;;  %v748_v35 = vld [vmem:[%s3866_s3 + $0x58] sm:$0xff]  ;;  %v33_v36 = vld [vmem:[%s3865_s0 + $0x68] sm:$0xff] }
   0xb   :  { %v34_v37 = vld [vmem:[%s3865_s0 + $0x70] sm:$0xff]  ;;  %v2328_v38 = vpack.c.bf16 %v748_v35, %v747_v34  ;;  %v749_v39 = vld [vmem:[%s3866_s3 + $0x60] sm:$0xff]  ;;  %v750_v40 = vld [vmem:[%s3866_s3 + $0x68] sm:$0xff] }
   0xc   :  { %2077 = vmatmul.mubr.msk.f32.vlgmr.msra.gmra.mrb[0].mxu0 %vm95_vm0, %v21_v7  ;;  %v35_v41 = vld [vmem:[%s3865_s0 + $0x78] sm:$0xff]  ;;  %v36_v42 = vld [vmem:[%s3865_s0 + $0x80] sm:$0xff]  ;;  %v2332_v43 = vpack.c.bf16 %v750_v40, %v749_v39  ;;  %v751_v44 = vld [vmem:[%s3866_s3 + $0x70] sm:$0xff] }
   0xd   :  { %2079 = vmatprep.mubr.msk.f32.mxu0 %vm95_vm0, %v22_v8  ;;  %2311 = vmatpush3.bf16.msra.mxu0 %v2308_v15  ;;  %v752_v45 = vld [vmem:[%s3866_s3 + $0x78] sm:$0xff]  ;;  %v37_v46 = vld [vmem:[%s3865_s0 + $0x88] sm:$0xff]  ;;  %v38_v47 = vld [vmem:[%s3865_s0 + $0x90] sm:$0xff] }
   0xe   :  { %2313 = vmatprep.subr.bf16.mxu0 %v2312_v20  ;;  %2349 = vmatpush3.bf16.msra.mxu1 %v2312_v20  ;;  %v2336_v48 = vpack.c.bf16 %v752_v45, %v751_v44  ;;  %v39_v49 = vld [vmem:[%s3865_s0 + $0x98] sm:$0xff]  ;;  %v40_v50 = vld [vmem:[%s3865_s0 + $0xa0] sm:$0xff]  ;;  %v41_v51 = vld [vmem:[%s3865_s0 + $0xa8] sm:$0xff] }
   0xf   :  { %2342 = vmatprep.subr.bf16.mxu1 %v2316_v24  ;;  %v42_v52 = vld [vmem:[%s3865_s0 + $0xb0] sm:$0xff]  ;;  %v43_v53 = vld [vmem:[%s3865_s0 + $0xb8] sm:$0xff]  ;;  %v44_v54 = vld [vmem:[%s3865_s0 + $0xc0] sm:$0xff] }
  0x10   :  { %2080 = vmatmul.mubr.msk.f32.gmra.mrb[2].mxu0 %vm95_vm0, %v23_v9  ;;  %v45_v55 = vld [vmem:[%s3865_s0 + $0xc8] sm:$0xff]  ;;  %v46_v56 = vld [vmem:[%s3865_s0 + $0xd0] sm:$0xff]  ;;  %v47_v57 = vld [vmem:[%s3865_s0 + $0xd8] sm:$0xff] }
  0x11   :  { %2082 = vmatprep.mubr.msk.f32.mxu0 %vm95_vm0, %v24_v10  ;;  %2315 = vmatpush3.bf16.msra.mxu0 %v2312_v20  ;;  %v48_v58 = vld [vmem:[%s3865_s0 + $0xe0] sm:$0xff]  ;;  %v49_v59 = vld [vmem:[%s3865_s0 + $0xe8] sm:$0xff]  ;;  %v50_v60 = vld [vmem:[%s3865_s0 + $0xf0] sm:$0xff] }
  0x12   :  { %2317 = vmatprep.subr.bf16.mxu0 %v2316_v24  ;;  %2350 = vmatpush3.bf16.msra.mxu1 %v2316_v24  ;;  %v51_v61 = vld [vmem:[%s3865_s0 + $0xf8] sm:$0xff]  ;;  %v52_v62 = vld [vmem:[%s3865_s0 + $0x100] sm:$0xff]  ;;  %v53_v63 = vld [vmem:[%s3865_s0 + $0x108] sm:$0xff] }
  0x13   :  { %2343 = vmatprep.subr.bf16.mxu1 %v2320_v28  ;;  %v54_v0 = vld [vmem:[%s3865_s0 + $0x110] sm:$0xff]  ;;  %v55_v1 = vld [vmem:[%s3865_s0 + $0x118] sm:$0xff]  ;;  %v56_v2 = vld [vmem:[%s3865_s0 + $0x120] sm:$0xff] }
  0x14   :  { %2083 = vmatmul.mubr.msk.f32.gmra.mrb[4].mxu0 %vm95_vm0, %v25_v11  ;;  %v57_v3 = vld [vmem:[%s3865_s0 + $0x128] sm:$0xff]  ;;  %v58_v4 = vld [vmem:[%s3865_s0 + $0x130] sm:$0xff]  ;;  %v59_v5 = vld [vmem:[%s3865_s0 + $0x138] sm:$0xff] }
  0x15   :  { %2085 = vmatprep.mubr.msk.f32.mxu0 %vm95_vm0, %v26_v13  ;;  %2319 = vmatpush3.bf16.msra.mxu0 %v2316_v24  ;;  %v60_v6 = vld [vmem:[%s3865_s0 + $0x140] sm:$0xff]  ;;  %v61_v7 = vld [vmem:[%s3865_s0 + $0x148] sm:$0xff]  ;;  %v62_v8 = vld [vmem:[%s3865_s0 + $0x150] sm:$0xff] }
  0x16   :  { %2321 = vmatprep.subr.bf16.mxu0 %v2320_v28  ;;  %2351 = vmatpush3.bf16.msra.mxu1 %v2320_v28  ;;  %v63_v9 = vld [vmem:[%s3865_s0 + $0x158] sm:$0xff]  ;;  %v64_v10 = vld [vmem:[%s3865_s0 + $0x160] sm:$0xff]  ;;  %v65_v11 = vld [vmem:[%s3865_s0 + $0x168] sm:$0xff] }
  0x17   :  { %2344 = vmatprep.subr.bf16.mxu1 %v2324_v33  ;;  %v66_v12 = vld [vmem:[%s3865_s0 + $0x170] sm:$0xff]  ;;  %v67_v13 = vld [vmem:[%s3865_s0 + $0x178] sm:$0xff]  ;;  %v68_v14 = vld [vmem:[%s3865_s0 + $0x180] sm:$0xff] }
  0x18   :  { %2086 = vmatmul.mubr.msk.f32.gmra.mrb[6].mxu0 %vm95_vm0, %v27_v16  ;;  %v69_v15 = vld [vmem:[%s3865_s0 + $0x188] sm:$0xff]  ;;  %v70_v16 = vld [vmem:[%s3865_s0 + $0x190] sm:$0xff]  ;;  %v71_v17 = vld [vmem:[%s3865_s0 + $0x198] sm:$0xff] }
  0x19   :  { %2088 = vmatprep.mubr.msk.f32.mxu0 %vm95_vm0, %v28_v19  ;;  %2323 = vmatpush3.bf16.msra.mxu0 %v2320_v28  ;;  %v72_v18 = vld [vmem:[%s3865_s0 + $0x1a0] sm:$0xff]  ;;  %v73_v19 = vld [vmem:[%s3865_s0 + $0x1a8] sm:$0xff]  ;;  %v74_v20 = vld [vmem:[%s3865_s0 + $0x1b0] sm:$0xff] }
  0x1a   :  { %2325 = vmatprep.subr.bf16.mxu0 %v2324_v33  ;;  %2352 = vmatpush3.bf16.msra.mxu1 %v2324_v33  ;;  %v75_v21 = vld [vmem:[%s3865_s0 + $0x1b8] sm:$0xff]  ;;  %v76_v22 = vld [vmem:[%s3865_s0 + $0x1c0] sm:$0xff]  ;;  %v78_v24 = vld [vmem:[%s3865_s0 + $0x1d0] sm:$0xff] }
  0x1b   :  { %2345 = vmatprep.subr.bf16.mxu1 %v2328_v38  ;;  %v79_v25 = vld [vmem:[%s3865_s0 + $0x1d8] sm:$0xff]  ;;  %v81_v27 = vld [vmem:[%s3865_s0 + $0x1e8] sm:$0xff]  ;;  %v82_v28 = vld [vmem:[%s3865_s0 + $0x1f0] sm:$0xff] }
  0x1c   :  { %2089 = vmatmul.mubr.msk.f32.gmra.mrb[8].mxu0 %vm95_vm0, %v29_v23  ;;  %v77_v23 = vld [vmem:[%s3865_s0 + $0x1c8] sm:$0xff]  ;;  %v83_v29 = vld [vmem:[%s3865_s0 + $0x1f8] sm:$0xff]  ;;  %v2961_v30 = vld [vmem:[%s3867_s2] ss:$0 sm:$0xff] }
  0x1d   :  { %2091 = vmatprep.mubr.msk.f32.mxu0 %vm95_vm0, %v30_v26  ;;  %2327 = vmatpush3.bf16.msra.mxu0 %v2324_v33  ;;  %v80_v26 = vld [vmem:[%s3865_s0 + $0x1e0] sm:$0xff] }
  0x1e   :  { %2329 = vmatprep.subr.bf16.mxu0 %v2328_v38  ;;  %2353 = vmatpush3.bf16.msra.mxu1 %v2328_v38 }
  0x1f   :  { %2346 = vmatprep.subr.bf16.mxu1 %v2332_v43 }
  0x20   :  { %2092 = vmatmul.mubr.msk.f32.gmra.mrb[10].mxu0 %vm95_vm0, %v31_v31 }
  0x21   :  { %2094 = vmatprep.mubr.msk.f32.mxu0 %vm95_vm0, %v32_v32  ;;  %2331 = vmatpush3.bf16.msra.mxu0 %v2328_v38 }
  0x22   :  { %2333 = vmatprep.subr.bf16.mxu0 %v2332_v43  ;;  %2354 = vmatpush3.bf16.msra.mxu1 %v2332_v43 }
  0x23   :  { %2347 = vmatprep.subr.bf16.mxu1 %v2336_v48 }
  0x24   :  { %2095 = vmatmul.mubr.msk.f32.gmra.mrb[12].mxu0 %vm95_vm0, %v33_v36 }
  0x25   :  { %2097 = vmatprep.mubr.msk.f32.mxu0 %vm95_vm0, %v34_v37  ;;  %2335 = vmatpush3.bf16.msra.mxu0 %v2332_v43 }
  0x26   :  { %2337 = vmatprep.subr.bf16.mxu0 %v2336_v48  ;;  %2355 = vmatpush3.bf16.msra.mxu1 %v2336_v48 }
  0x28   :  { %2098 = vmatmul.mubr.msk.f32.gmra.mrb[14].mxu0 %vm95_vm0, %v35_v41 }
  0x29   :  { %2100 = vmatprep.mubr.msk.f32.mxu0 %vm95_vm0, %v36_v42  ;;  %2339 = vmatpush3.bf16.msra.mxu0 %v2336_v48 }
  0x2c   :  { %2101 = vmatmul.mubr.msk.f32.gmra.mrb[16].mxu0 %vm95_vm0, %v37_v46 }
  0x2d   :  { %2103 = vmatprep.mubr.msk.f32.mxu0 %vm95_vm0, %v38_v47 }
  0x30   :  { %2104 = vmatmul.mubr.msk.f32.gmra.mrb[18].mxu0 %vm95_vm0, %v39_v49 }
  0x31   :  { %2106 = vmatprep.mubr.msk.f32.mxu0 %vm95_vm0, %v40_v50 }
  0x34   :  { %2107 = vmatmul.mubr.msk.f32.gmra.mrb[20].mxu0 %vm95_vm0, %v41_v51 }
  0x35   :  { %2109 = vmatprep.mubr.msk.f32.mxu0 %vm95_vm0, %v42_v52 }
  0x38   :  { %2110 = vmatmul.mubr.msk.f32.gmra.mrb[22].mxu0 %vm95_vm0, %v43_v53 }
  0x39   :  { %2112 = vmatprep.mubr.msk.f32.mxu0 %vm95_vm0, %v44_v54 }
  0x3c   :  { %2113 = vmatmul.mubr.msk.f32.gmra.mrb[24].mxu0 %vm95_vm0, %v45_v55 }
  0x3d   :  { %2115 = vmatprep.mubr.msk.f32.mxu0 %vm95_vm0, %v46_v56 }
  0x40   :  { %2116 = vmatmul.mubr.msk.f32.gmra.mrb[26].mxu0 %vm95_vm0, %v47_v57 }
  0x41   :  { %2118 = vmatprep.mubr.msk.f32.mxu0 %vm95_vm0, %v48_v58 }
  0x44   :  { %2119 = vmatmul.mubr.msk.f32.gmra.mrb[28].mxu0 %vm95_vm0, %v49_v59 }
  0x45   :  { %2121 = vmatprep.mubr.msk.f32.mxu0 %vm95_vm0, %v50_v60 }
  0x48   :  { %2122 = vmatmul.mubr.msk.f32.gmra.mrb[30].mxu0 %vm95_vm0, %v51_v61 }
  0x49   :  { %2124 = vmatprep.mubr.msk.f32.mxu0 %vm95_vm0, %v52_v62 }
  0x4c   :  { %2125 = vmatmul.mubr.msk.f32.gmra.mrb[32].mxu0 %vm95_vm0, %v53_v63 }
  0x4d   :  { %2127 = vmatprep.mubr.msk.f32.mxu0 %vm95_vm0, %v54_v0 }
  0x50   :  { %2128 = vmatmul.mubr.msk.f32.gmra.mrb[34].mxu0 %vm95_vm0, %v55_v1 }
  0x51   :  { %2130 = vmatprep.mubr.msk.f32.mxu0 %vm95_vm0, %v56_v2 }
  0x54   :  { %2131 = vmatmul.mubr.msk.f32.gmra.mrb[36].mxu0 %vm95_vm0, %v57_v3 }
  0x55   :  { %2133 = vmatprep.mubr.msk.f32.mxu0 %vm95_vm0, %v58_v4 }
  0x58   :  { %2134 = vmatmul.mubr.msk.f32.gmra.mrb[38].mxu0 %vm95_vm0, %v59_v5 }
  0x59   :  { %2136 = vmatprep.mubr.msk.f32.mxu0 %vm95_vm0, %v60_v6 }
  0x5c   :  { %2137 = vmatmul.mubr.msk.f32.gmra.mrb[40].mxu0 %vm95_vm0, %v61_v7 }
  0x5d   :  { %2139 = vmatprep.mubr.msk.f32.mxu0 %vm95_vm0, %v62_v8 }
  0x60   :  { %2140 = vmatmul.mubr.msk.f32.gmra.mrb[42].mxu0 %vm95_vm0, %v63_v9 }
  0x61   :  { %2142 = vmatprep.mubr.msk.f32.mxu0 %vm95_vm0, %v64_v10 }
  0x64   :  { %2143 = vmatmul.mubr.msk.f32.gmra.mrb[44].mxu0 %vm95_vm0, %v65_v11 }
  0x65   :  { %2145 = vmatprep.mubr.msk.f32.mxu0 %vm95_vm0, %v66_v12 }
  0x68   :  { %2146 = vmatmul.mubr.msk.f32.gmra.mrb[46].mxu0 %vm95_vm0, %v67_v13 }
  0x69   :  { %2148 = vmatprep.mubr.msk.f32.mxu0 %vm95_vm0, %v68_v14 }
  0x6c   :  { %2149 = vmatmul.mubr.msk.f32.gmra.mrb[48].mxu0 %vm95_vm0, %v69_v15 }
  0x6d   :  { %2151 = vmatprep.mubr.msk.f32.mxu0 %vm95_vm0, %v70_v16 }
  0x70   :  { %2152 = vmatmul.mubr.msk.f32.gmra.mrb[50].mxu0 %vm95_vm0, %v71_v17 }
  0x71   :  { %2154 = vmatprep.mubr.msk.f32.mxu0 %vm95_vm0, %v72_v18 }
  0x74   :  { %2155 = vmatmul.mubr.msk.f32.gmra.mrb[52].mxu0 %vm95_vm0, %v73_v19 }
  0x75   :  { %2157 = vmatprep.mubr.msk.f32.mxu0 %vm95_vm0, %v74_v20 }
  0x78   :  { %2158 = vmatmul.mubr.msk.f32.gmra.mrb[54].mxu0 %vm95_vm0, %v75_v21 }
  0x79   :  { %2160 = vmatprep.mubr.msk.f32.mxu0 %vm95_vm0, %v76_v22 }
  0x7c   :  { %2161 = vmatmul.mubr.msk.f32.gmra.mrb[56].mxu0 %vm95_vm0, %v77_v23 }
  0x7d   :  { %2163 = vmatprep.mubr.msk.f32.mxu0 %vm95_vm0, %v78_v24 }
  0x80   :  { %2164 = vmatmul.mubr.msk.f32.gmra.mrb[58].mxu0 %vm95_vm0, %v79_v25 }
  0x81   :  { %2166 = vmatprep.mubr.msk.f32.mxu0 %vm95_vm0, %v80_v26 }
  0x84   :  { %2167 = vmatmul.mubr.msk.f32.gmra.mrb[60].mxu0 %vm95_vm0, %v81_v27 }
  0x85   :  { %2169 = vmatprep.mubr.msk.f32.mxu0 %vm95_vm0, %v82_v28 }
  0x88   :  { %2170 = vmatmul.mubr.msk.f32.gmra.mrb[62].mxu0 %vm95_vm0, %v83_v29 }
  0xdf   :  { %v2078_v31 = vpop.f32.mrb[0].mxu0 }
  0xe0   :  { %v360_v32 = vadd.f32 %v2078_v31, %v2961_v30  ;;  %v354_v33 = vpop.f32.mrb[1].mxu0 }
  0xe1   :  { %v355_v34 = vadd.f32 %v2961_v30, %v354_v33 }
  0xe2   :  { %v674_v37 = vmax.f32 %v360_v32, 0.0 }
  0xe3   :  { %v673_v35 = vmax.f32 %v355_v34, 0.0  ;;  %v2081_v36 = vpop.f32.mrb[2].mxu0 }
  0xe4   :  { %v370_v38 = vadd.f32 %v2081_v36, %v2961_v30  ;;  %v364_v39 = vpop.f32.mrb[3].mxu0 }
  0xe5   :  { %v365_v40 = vadd.f32 %v2961_v30, %v364_v39  ;;  %2204 = vmatprep.mubr.f32.mxu0 %v673_v35 }
  0xe6   :  { %2205 = vmatmul.mubr.f32.vlgmr.msra.gmra.mrb[64].mxu0 %v674_v37  ;;  %v676_v43 = vmax.f32 %v370_v38, 0.0 }
  0xe7   :  { %v675_v41 = vmax.f32 %v365_v40, 0.0  ;;  %v2084_v42 = vpop.f32.mrb[4].mxu0 }
  0xe8   :  { %v380_v44 = vadd.f32 %v2084_v42, %v2961_v30  ;;  %v374_v45 = vpop.f32.mrb[5].mxu0 }
  0xe9   :  { %v375_v46 = vadd.f32 %v2961_v30, %v374_v45  ;;  %2207 = vmatprep.mubr.f32.mxu0 %v675_v41 }
  0xea   :  { %v678_v47 = vmax.f32 %v380_v44, 0.0  ;;  %2208 = vmatmul.mubr.f32.gmra.mrb[66].mxu0 %v676_v43 }
  0xeb   :  { %v677_v48 = vmax.f32 %v375_v46, 0.0  ;;  %v2087_v49 = vpop.f32.mrb[6].mxu0 }
  0xec   :  { %v390_v50 = vadd.f32 %v2087_v49, %v2961_v30  ;;  %v384_v51 = vpop.f32.mrb[7].mxu0 }
  0xed   :  { %2210 = vmatprep.mubr.f32.mxu0 %v677_v48  ;;  %v385_v52 = vadd.f32 %v2961_v30, %v384_v51 }
  0xee   :  { %v680_v53 = vmax.f32 %v390_v50, 0.0  ;;  %2211 = vmatmul.mubr.f32.gmra.mrb[68].mxu0 %v678_v47 }
  0xef   :  { %v2090_v54 = vpop.f32.mrb[8].mxu0  ;;  %v679_v55 = vmax.f32 %v385_v52, 0.0 }
  0xf0   :  { %v400_v56 = vadd.f32 %v2090_v54, %v2961_v30  ;;  %v394_v57 = vpop.f32.mrb[9].mxu0 }
  0xf1   :  { %v395_v58 = vadd.f32 %v2961_v30, %v394_v57  ;;  %2213 = vmatprep.mubr.f32.mxu1 %v679_v55 }
  0xf2   :  { %v682_v59 = vmax.f32 %v400_v56, 0.0  ;;  %2214 = vmatmul.mubr.f32.vlgmr.msra.gmra.mrb[0].mxu1 %v680_v53 }
  0xf3   :  { %v681_v60 = vmax.f32 %v395_v58, 0.0  ;;  %v2093_v61 = vpop.f32.mrb[10].mxu0 }
  0xf4   :  { %v410_v62 = vadd.f32 %v2093_v61, %v2961_v30  ;;  %v404_v63 = vpop.f32.mrb[11].mxu0 }
  0xf5   :  { %v405_v0 = vadd.f32 %v2961_v30, %v404_v63  ;;  %2216 = vmatprep.mubr.f32.mxu1 %v681_v60 }
  0xf6   :  { %v684_v1 = vmax.f32 %v410_v62, 0.0  ;;  %2217 = vmatmul.mubr.f32.gmra.mrb[2].mxu1 %v682_v59 }
  0xf7   :  { %v683_v2 = vmax.f32 %v405_v0, 0.0  ;;  %v2096_v3 = vpop.f32.mrb[12].mxu0 }
  0xf8   :  { %v420_v4 = vadd.f32 %v2096_v3, %v2961_v30  ;;  %v414_v5 = vpop.f32.mrb[13].mxu0 }
  0xf9   :  { %v415_v6 = vadd.f32 %v2961_v30, %v414_v5  ;;  %2219 = vmatprep.mubr.f32.mxu1 %v683_v2 }
  0xfa   :  { %v686_v7 = vmax.f32 %v420_v4, 0.0  ;;  %2220 = vmatmul.mubr.f32.gmra.mrb[4].mxu1 %v684_v1 }
  0xfb   :  { %v685_v8 = vmax.f32 %v415_v6, 0.0  ;;  %v2099_v9 = vpop.f32.mrb[14].mxu0 }
  0xfc   :  { %v430_v10 = vadd.f32 %v2099_v9, %v2961_v30  ;;  %v424_v11 = vpop.f32.mrb[15].mxu0 }
  0xfd   :  { %v425_v12 = vadd.f32 %v2961_v30, %v424_v11  ;;  %2222 = vmatprep.mubr.f32.mxu1 %v685_v8 }
  0xfe   :  { %v688_v13 = vmax.f32 %v430_v10, 0.0  ;;  %2223 = vmatmul.mubr.f32.gmra.mrb[6].mxu1 %v686_v7 }
  0xff   :  { %v687_v14 = vmax.f32 %v425_v12, 0.0  ;;  %v2102_v15 = vpop.f32.mrb[16].mxu0 }
 0x100   :  { %v440_v16 = vadd.f32 %v2102_v15, %v2961_v30  ;;  %v434_v17 = vpop.f32.mrb[17].mxu0 }
 0x101   :  { %v435_v18 = vadd.f32 %v2961_v30, %v434_v17  ;;  %2225 = vmatprep.mubr.f32.mxu1 %v687_v14 }
 0x102   :  { %v690_v19 = vmax.f32 %v440_v16, 0.0  ;;  %2226 = vmatmul.mubr.f32.gmra.mrb[8].mxu1 %v688_v13 }
 0x103   :  { %v689_v20 = vmax.f32 %v435_v18, 0.0  ;;  %v2105_v21 = vpop.f32.mrb[18].mxu0 }
 0x104   :  { %v450_v22 = vadd.f32 %v2105_v21, %v2961_v30  ;;  %v444_v23 = vpop.f32.mrb[19].mxu0 }
 0x105   :  { %v445_v24 = vadd.f32 %v2961_v30, %v444_v23  ;;  %2228 = vmatprep.mubr.f32.mxu1 %v689_v20 }
 0x106   :  { %v692_v25 = vmax.f32 %v450_v22, 0.0  ;;  %2229 = vmatmul.mubr.f32.gmra.mrb[10].mxu1 %v690_v19 }
 0x107   :  { %v691_v26 = vmax.f32 %v445_v24, 0.0  ;;  %v2108_v27 = vpop.f32.mrb[20].mxu0 }
 0x108   :  { %v460_v28 = vadd.f32 %v2108_v27, %v2961_v30  ;;  %v454_v29 = vpop.f32.mrb[21].mxu0 }
 0x109   :  { %v455_v31 = vadd.f32 %v2961_v30, %v454_v29  ;;  %2231 = vmatprep.mubr.f32.mxu1 %v691_v26 }
 0x10a   :  { %v694_v32 = vmax.f32 %v460_v28, 0.0  ;;  %2232 = vmatmul.mubr.f32.gmra.mrb[12].mxu1 %v692_v25 }
 0x10b   :  { %v693_v33 = vmax.f32 %v455_v31, 0.0  ;;  %v2111_v34 = vpop.f32.mrb[22].mxu0 }
 0x10c   :  { %v470_v35 = vadd.f32 %v2111_v34, %v2961_v30  ;;  %v464_v36 = vpop.f32.mrb[23].mxu0 }
 0x10d   :  { %v465_v37 = vadd.f32 %v2961_v30, %v464_v36  ;;  %2234 = vmatprep.mubr.f32.mxu1 %v693_v33 }
 0x10e   :  { %v696_v38 = vmax.f32 %v470_v35, 0.0  ;;  %2235 = vmatmul.mubr.f32.gmra.mrb[14].mxu1 %v694_v32 }
 0x10f   :  { %v695_v39 = vmax.f32 %v465_v37, 0.0  ;;  %v2114_v40 = vpop.f32.mrb[24].mxu0 }
 0x110   :  { %v480_v41 = vadd.f32 %v2114_v40, %v2961_v30  ;;  %v474_v42 = vpop.f32.mrb[25].mxu0 }
 0x111   :  { %v475_v43 = vadd.f32 %v2961_v30, %v474_v42  ;;  %2237 = vmatprep.mubr.f32.mxu1 %v695_v39 }
 0x112   :  { %v698_v44 = vmax.f32 %v480_v41, 0.0  ;;  %2238 = vmatmul.mubr.f32.gmra.mrb[16].mxu1 %v696_v38 }
 0x113   :  { %v697_v45 = vmax.f32 %v475_v43, 0.0  ;;  %v2117_v46 = vpop.f32.mrb[26].mxu0 }
 0x114   :  { %v490_v47 = vadd.f32 %v2117_v46, %v2961_v30  ;;  %v484_v48 = vpop.f32.mrb[27].mxu0 }
 0x115   :  { %v485_v49 = vadd.f32 %v2961_v30, %v484_v48  ;;  %2240 = vmatprep.mubr.f32.mxu1 %v697_v45 }
 0x116   :  { %v700_v50 = vmax.f32 %v490_v47, 0.0  ;;  %2241 = vmatmul.mubr.f32.gmra.mrb[18].mxu1 %v698_v44 }
 0x117   :  { %v699_v51 = vmax.f32 %v485_v49, 0.0  ;;  %v2120_v52 = vpop.f32.mrb[28].mxu0 }
 0x118   :  { %v500_v53 = vadd.f32 %v2120_v52, %v2961_v30  ;;  %v494_v54 = vpop.f32.mrb[29].mxu0 }
 0x119   :  { %v495_v55 = vadd.f32 %v2961_v30, %v494_v54  ;;  %2243 = vmatprep.mubr.f32.mxu1 %v699_v51 }
 0x11a   :  { %v702_v56 = vmax.f32 %v500_v53, 0.0  ;;  %2244 = vmatmul.mubr.f32.gmra.mrb[20].mxu1 %v700_v50 }
 0x11b   :  { %v701_v57 = vmax.f32 %v495_v55, 0.0  ;;  %v2123_v58 = vpop.f32.mrb[30].mxu0 }
 0x11c   :  { %v510_v59 = vadd.f32 %v2123_v58, %v2961_v30  ;;  %v504_v60 = vpop.f32.mrb[31].mxu0 }
 0x11d   :  { %v505_v61 = vadd.f32 %v2961_v30, %v504_v60  ;;  %2246 = vmatprep.mubr.f32.mxu1 %v701_v57 }
 0x11e   :  { %v704_v62 = vmax.f32 %v510_v59, 0.0  ;;  %2247 = vmatmul.mubr.f32.gmra.mrb[22].mxu1 %v702_v56 }
 0x11f   :  { %v703_v63 = vmax.f32 %v505_v61, 0.0  ;;  %v2126_v0 = vpop.f32.mrb[32].mxu0 }
 0x120   :  { %v520_v1 = vadd.f32 %v2126_v0, %v2961_v30  ;;  %v514_v2 = vpop.f32.mrb[33].mxu0 }
 0x121   :  { %v515_v3 = vadd.f32 %v2961_v30, %v514_v2  ;;  %2249 = vmatprep.mubr.f32.mxu1 %v703_v63 }
 0x122   :  { %v706_v4 = vmax.f32 %v520_v1, 0.0  ;;  %2250 = vmatmul.mubr.f32.gmra.mrb[24].mxu1 %v704_v62 }
 0x123   :  { %v705_v5 = vmax.f32 %v515_v3, 0.0  ;;  %v2129_v6 = vpop.f32.mrb[34].mxu0 }
 0x124   :  { %v530_v7 = vadd.f32 %v2129_v6, %v2961_v30  ;;  %v524_v8 = vpop.f32.mrb[35].mxu0 }
 0x125   :  { %v525_v9 = vadd.f32 %v2961_v30, %v524_v8  ;;  %2252 = vmatprep.mubr.f32.mxu1 %v705_v5 }
 0x126   :  { %v708_v10 = vmax.f32 %v530_v7, 0.0  ;;  %2253 = vmatmul.mubr.f32.gmra.mrb[26].mxu1 %v706_v4 }
 0x127   :  { %v707_v11 = vmax.f32 %v525_v9, 0.0  ;;  %v2132_v12 = vpop.f32.mrb[36].mxu0 }
 0x128   :  { %v540_v13 = vadd.f32 %v2132_v12, %v2961_v30  ;;  %v534_v14 = vpop.f32.mrb[37].mxu0 }
 0x129   :  { %v535_v15 = vadd.f32 %v2961_v30, %v534_v14  ;;  %2255 = vmatprep.mubr.f32.mxu1 %v707_v11 }
 0x12a   :  { %v710_v16 = vmax.f32 %v540_v13, 0.0  ;;  %2256 = vmatmul.mubr.f32.gmra.mrb[28].mxu1 %v708_v10 }
 0x12b   :  { %v709_v17 = vmax.f32 %v535_v15, 0.0  ;;  %v2135_v18 = vpop.f32.mrb[38].mxu0 }
 0x12c   :  { %v550_v19 = vadd.f32 %v2135_v18, %v2961_v30  ;;  %v544_v20 = vpop.f32.mrb[39].mxu0 }
 0x12d   :  { %v545_v21 = vadd.f32 %v2961_v30, %v544_v20  ;;  %2258 = vmatprep.mubr.f32.mxu1 %v709_v17 }
 0x12e   :  { %v712_v22 = vmax.f32 %v550_v19, 0.0  ;;  %2259 = vmatmul.mubr.f32.gmra.mrb[30].mxu1 %v710_v16 }
 0x12f   :  { %v711_v23 = vmax.f32 %v545_v21, 0.0  ;;  %v2138_v24 = vpop.f32.mrb[40].mxu0 }
 0x130   :  { %v560_v25 = vadd.f32 %v2138_v24, %v2961_v30  ;;  %v554_v26 = vpop.f32.mrb[41].mxu0 }
 0x131   :  { %v555_v27 = vadd.f32 %v2961_v30, %v554_v26  ;;  %2261 = vmatprep.mubr.f32.mxu1 %v711_v23 }
 0x132   :  { %v714_v28 = vmax.f32 %v560_v25, 0.0  ;;  %2262 = vmatmul.mubr.f32.gmra.mrb[32].mxu1 %v712_v22 }
 0x133   :  { %v713_v29 = vmax.f32 %v555_v27, 0.0  ;;  %v2141_v31 = vpop.f32.mrb[42].mxu0 }
 0x134   :  { %v570_v32 = vadd.f32 %v2141_v31, %v2961_v30  ;;  %v564_v33 = vpop.f32.mrb[43].mxu0 }
 0x135   :  { %v565_v34 = vadd.f32 %v2961_v30, %v564_v33  ;;  %2264 = vmatprep.mubr.f32.mxu1 %v713_v29 }
 0x136   :  { %v716_v35 = vmax.f32 %v570_v32, 0.0  ;;  %2265 = vmatmul.mubr.f32.gmra.mrb[34].mxu1 %v714_v28 }
 0x137   :  { %v715_v36 = vmax.f32 %v565_v34, 0.0  ;;  %v2144_v37 = vpop.f32.mrb[44].mxu0  ;;  %v3030_v34 = vld [vmem:[%s3868_s4] ss:$0 sm:$0xff] }
 0x138   :  { %v580_v38 = vadd.f32 %v2144_v37, %v2961_v30  ;;  %v574_v39 = vpop.f32.mrb[45].mxu0 }
 0x139   :  { %v575_v40 = vadd.f32 %v2961_v30, %v574_v39  ;;  %2267 = vmatprep.mubr.f32.mxu1 %v715_v36 }
 0x13a   :  { %v718_v41 = vmax.f32 %v580_v38, 0.0  ;;  %2268 = vmatmul.mubr.f32.gmra.mrb[36].mxu1 %v716_v35 }
 0x13b   :  { %v717_v42 = vmax.f32 %v575_v40, 0.0  ;;  %v2147_v43 = vpop.f32.mrb[46].mxu0 }
 0x13c   :  { %v590_v44 = vadd.f32 %v2147_v43, %v2961_v30  ;;  %v584_v45 = vpop.f32.mrb[47].mxu0 }
 0x13d   :  { %v585_v46 = vadd.f32 %v2961_v30, %v584_v45  ;;  %2270 = vmatprep.mubr.f32.mxu1 %v717_v42 }
 0x13e   :  { %v720_v47 = vmax.f32 %v590_v44, 0.0  ;;  %2271 = vmatmul.mubr.f32.gmra.mrb[38].mxu1 %v718_v41 }
 0x13f   :  { %v719_v48 = vmax.f32 %v585_v46, 0.0  ;;  %v2150_v49 = vpop.f32.mrb[48].mxu0 }
 0x140   :  { %v600_v50 = vadd.f32 %v2150_v49, %v2961_v30  ;;  %v594_v51 = vpop.f32.mrb[49].mxu0 }
 0x141   :  { %v595_v52 = vadd.f32 %v2961_v30, %v594_v51  ;;  %2273 = vmatprep.mubr.f32.mxu1 %v719_v48 }
 0x142   :  { %v722_v53 = vmax.f32 %v600_v50, 0.0  ;;  %2274 = vmatmul.mubr.f32.gmra.mrb[40].mxu1 %v720_v47 }
 0x143   :  { %v721_v54 = vmax.f32 %v595_v52, 0.0  ;;  %v2153_v55 = vpop.f32.mrb[50].mxu0 }
 0x144   :  { %v610_v56 = vadd.f32 %v2153_v55, %v2961_v30  ;;  %v604_v57 = vpop.f32.mrb[51].mxu0 }
 0x145   :  { %v605_v58 = vadd.f32 %v2961_v30, %v604_v57  ;;  %2276 = vmatprep.mubr.f32.mxu1 %v721_v54 }
 0x146   :  { %v724_v59 = vmax.f32 %v610_v56, 0.0  ;;  %2277 = vmatmul.mubr.f32.gmra.mrb[42].mxu1 %v722_v53 }
 0x147   :  { %v723_v60 = vmax.f32 %v605_v58, 0.0  ;;  %v2156_v61 = vpop.f32.mrb[52].mxu0 }
 0x148   :  { %v620_v62 = vadd.f32 %v2156_v61, %v2961_v30  ;;  %v614_v63 = vpop.f32.mrb[53].mxu0 }
 0x149   :  { %v615_v0 = vadd.f32 %v2961_v30, %v614_v63  ;;  %2279 = vmatprep.mubr.f32.mxu1 %v723_v60 }
 0x14a   :  { %v726_v1 = vmax.f32 %v620_v62, 0.0  ;;  %2280 = vmatmul.mubr.f32.gmra.mrb[44].mxu1 %v724_v59 }
 0x14b   :  { %v725_v2 = vmax.f32 %v615_v0, 0.0  ;;  %v2159_v3 = vpop.f32.mrb[54].mxu0 }
 0x14c   :  { %v630_v4 = vadd.f32 %v2159_v3, %v2961_v30  ;;  %v624_v5 = vpop.f32.mrb[55].mxu0 }
 0x14d   :  { %v625_v6 = vadd.f32 %v2961_v30, %v624_v5  ;;  %2282 = vmatprep.mubr.f32.mxu1 %v725_v2 }
 0x14e   :  { %v728_v7 = vmax.f32 %v630_v4, 0.0  ;;  %2283 = vmatmul.mubr.f32.gmra.mrb[46].mxu1 %v726_v1 }
 0x14f   :  { %v727_v8 = vmax.f32 %v625_v6, 0.0  ;;  %v2162_v9 = vpop.f32.mrb[56].mxu0 }
 0x150   :  { %v640_v10 = vadd.f32 %v2162_v9, %v2961_v30  ;;  %v634_v11 = vpop.f32.mrb[57].mxu0 }
 0x151   :  { %v635_v12 = vadd.f32 %v2961_v30, %v634_v11  ;;  %2285 = vmatprep.mubr.f32.mxu1 %v727_v8 }
 0x152   :  { %v730_v13 = vmax.f32 %v640_v10, 0.0  ;;  %2286 = vmatmul.mubr.f32.gmra.mrb[48].mxu1 %v728_v7 }
 0x153   :  { %v729_v14 = vmax.f32 %v635_v12, 0.0  ;;  %v2165_v15 = vpop.f32.mrb[58].mxu0 }
 0x154   :  { %v650_v16 = vadd.f32 %v2165_v15, %v2961_v30  ;;  %v644_v17 = vpop.f32.mrb[59].mxu0 }
 0x155   :  { %v645_v18 = vadd.f32 %v2961_v30, %v644_v17  ;;  %2288 = vmatprep.mubr.f32.mxu1 %v729_v14 }
 0x156   :  { %v732_v19 = vmax.f32 %v650_v16, 0.0  ;;  %2289 = vmatmul.mubr.f32.gmra.mrb[50].mxu1 %v730_v13 }
 0x157   :  { %v731_v20 = vmax.f32 %v645_v18, 0.0  ;;  %v2168_v21 = vpop.f32.mrb[60].mxu0 }
 0x158   :  { %v660_v22 = vadd.f32 %v2168_v21, %v2961_v30  ;;  %v654_v23 = vpop.f32.mrb[61].mxu0 }
 0x159   :  { %v655_v24 = vadd.f32 %v2961_v30, %v654_v23  ;;  %2291 = vmatprep.mubr.f32.mxu1 %v731_v20 }
 0x15a   :  { %v734_v25 = vmax.f32 %v660_v22, 0.0  ;;  %2292 = vmatmul.mubr.f32.gmra.mrb[52].mxu1 %v732_v19 }
 0x15b   :  { %v733_v26 = vmax.f32 %v655_v24, 0.0  ;;  %v2171_v27 = vpop.f32.mrb[62].mxu0 }
 0x15c   :  { %v670_v28 = vadd.f32 %v2171_v27, %v2961_v30  ;;  %v664_v29 = vpop.f32.mrb[63].mxu0 }
 0x15d   :  { %v665_v31 = vadd.f32 %v2961_v30, %v664_v29  ;;  %2294 = vmatprep.mubr.f32.mxu1 %v733_v26 }
 0x15e   :  { %v736_v32 = vmax.f32 %v670_v28, 0.0  ;;  %2295 = vmatmul.mubr.f32.gmra.mrb[54].mxu1 %v734_v25 }
 0x15f   :  { %v735_v33 = vmax.f32 %v665_v31, 0.0 }
 0x161   :  { %2297 = vmatprep.mubr.f32.mxu1 %v735_v33 }
 0x162   :  { %2298 = vmatmul.mubr.f32.gmra.mrb[56].mxu1 %v736_v32 }
 0x1b9   :  { %v2206_v35 = vpop.f32.mrb[64].mxu0 }
 0x1ba   :  { %v3033_v36 = vadd.f32 %v2206_v35, %v3030_v34  ;;  %v826_v37 = vpop.f32.mrb[65].mxu0 }
 0x1bb   :  { %v3037_v30 = vadd.f32 %v3030_v34, %v826_v37 }
 0x1bc   :  { %1147 = vmax.xlane.f32.xlu0 %v3033_v36 }
 0x1bd   :  { %v2209_v38 = vpop.f32.mrb[66].mxu0 }
 0x1be   :  { %v3040_v39 = vadd.f32 %v2209_v38, %v3030_v34  ;;  %v836_v40 = vpop.f32.mrb[67].mxu0 }
 0x1bf   :  { %v3045_v42 = vadd.f32 %v3030_v34, %v836_v40 }
 0x1c0   :  { %1151 = vmax.xlane.f32.xlu1 %v3040_v39  ;;  %1145 = vmax.xlane.f32.xlu0 %v3037_v30 }
 0x1c1   :  { %v2212_v41 = vpop.f32.mrb[68].mxu0 }
 0x1c2   :  { %v846_v43 = vpop.f32.mrb[69].mxu0  ;;  %v3053_v46 = vadd.f32 %v2212_v41, %v3030_v34 }
 0x1c3   :  { %v3048_v44 = vadd.f32 %v3030_v34, %v846_v43 }
 0x1c4   :  { %1149 = vmax.xlane.f32.xlu1 %v3045_v42 }
 0x1c5   :  { %v2215_v45 = vpop.f32.mrb[0].mxu1  ;;  %1153 = vmax.xlane.f32.xlu0 %v3048_v44 }
 0x1c6   :  { %v856_v47 = vpop.f32.mrb[1].mxu1  ;;  %v3061_v50 = vadd.f32 %v2215_v45, %v3030_v34 }
 0x1c7   :  { %v3056_v48 = vadd.f32 %v3030_v34, %v856_v47 }
 0x1c8   :  { %1155 = vmax.xlane.f32.xlu1 %v3053_v46 }
 0x1c9   :  { %v2218_v49 = vpop.f32.mrb[2].mxu1  ;;  %1157 = vmax.xlane.f32.xlu0 %v3056_v48 }
 0x1ca   :  { %v866_v51 = vpop.f32.mrb[3].mxu1  ;;  %v3069_v54 = vadd.f32 %v2218_v49, %v3030_v34 }
 0x1cb   :  { %v3064_v52 = vadd.f32 %v3030_v34, %v866_v51 }
 0x1cc   :  { %1159 = vmax.xlane.f32.xlu1 %v3061_v50 }
 0x1cd   :  { %v2221_v53 = vpop.f32.mrb[4].mxu1  ;;  %1161 = vmax.xlane.f32.xlu0 %v3064_v52 }
 0x1ce   :  { %v876_v55 = vpop.f32.mrb[5].mxu1  ;;  %v3077_v58 = vadd.f32 %v2221_v53, %v3030_v34 }
 0x1cf   :  { %v3072_v56 = vadd.f32 %v3030_v34, %v876_v55 }
 0x1d0   :  { %1163 = vmax.xlane.f32.xlu1 %v3069_v54 }
 0x1d1   :  { %v2224_v57 = vpop.f32.mrb[6].mxu1  ;;  %1165 = vmax.xlane.f32.xlu0 %v3072_v56 }
 0x1d2   :  { %v886_v59 = vpop.f32.mrb[7].mxu1  ;;  %v3085_v62 = vadd.f32 %v2224_v57, %v3030_v34 }
 0x1d3   :  { %v3080_v60 = vadd.f32 %v3030_v34, %v886_v59 }
 0x1d4   :  { %1167 = vmax.xlane.f32.xlu1 %v3077_v58 }
 0x1d5   :  { %v2227_v61 = vpop.f32.mrb[8].mxu1  ;;  %1169 = vmax.xlane.f32.xlu0 %v3080_v60 }
 0x1d6   :  { %v896_v63 = vpop.f32.mrb[9].mxu1  ;;  %v3093_v2 = vadd.f32 %v2227_v61, %v3030_v34 }
 0x1d7   :  { %v3088_v0 = vadd.f32 %v3030_v34, %v896_v63 }
 0x1d8   :  { %1171 = vmax.xlane.f32.xlu1 %v3085_v62 }
 0x1d9   :  { %v2230_v1 = vpop.f32.mrb[10].mxu1  ;;  %1173 = vmax.xlane.f32.xlu0 %v3088_v0 }
 0x1da   :  { %v906_v3 = vpop.f32.mrb[11].mxu1  ;;  %v3101_v6 = vadd.f32 %v2230_v1, %v3030_v34 }
 0x1db   :  { %v3096_v4 = vadd.f32 %v3030_v34, %v906_v3 }
 0x1dc   :  { %1175 = vmax.xlane.f32.xlu1 %v3093_v2 }
 0x1dd   :  { %v2233_v5 = vpop.f32.mrb[12].mxu1  ;;  %1177 = vmax.xlane.f32.xlu0 %v3096_v4 }
 0x1de   :  { %v916_v7 = vpop.f32.mrb[13].mxu1  ;;  %v3109_v10 = vadd.f32 %v2233_v5, %v3030_v34 }
 0x1df   :  { %v3104_v8 = vadd.f32 %v3030_v34, %v916_v7 }
 0x1e0   :  { %1179 = vmax.xlane.f32.xlu1 %v3101_v6 }
 0x1e1   :  { %v2236_v9 = vpop.f32.mrb[14].mxu1  ;;  %1181 = vmax.xlane.f32.xlu0 %v3104_v8 }
 0x1e2   :  { %v926_v11 = vpop.f32.mrb[15].mxu1  ;;  %v3117_v14 = vadd.f32 %v2236_v9, %v3030_v34 }
 0x1e3   :  { %v3112_v12 = vadd.f32 %v3030_v34, %v926_v11 }
 0x1e4   :  { %1183 = vmax.xlane.f32.xlu1 %v3109_v10 }
 0x1e5   :  { %v2239_v13 = vpop.f32.mrb[16].mxu1  ;;  %1185 = vmax.xlane.f32.xlu0 %v3112_v12 }
 0x1e6   :  { %v936_v15 = vpop.f32.mrb[17].mxu1  ;;  %v3125_v18 = vadd.f32 %v2239_v13, %v3030_v34 }
 0x1e7   :  { %v3120_v16 = vadd.f32 %v3030_v34, %v936_v15 }
 0x1e8   :  { %1187 = vmax.xlane.f32.xlu1 %v3117_v14 }
 0x1e9   :  { %v2242_v17 = vpop.f32.mrb[18].mxu1  ;;  %1189 = vmax.xlane.f32.xlu0 %v3120_v16 }
 0x1ea   :  { %v946_v19 = vpop.f32.mrb[19].mxu1  ;;  %v3133_v22 = vadd.f32 %v2242_v17, %v3030_v34 }
 0x1eb   :  { %v3128_v20 = vadd.f32 %v3030_v34, %v946_v19 }
 0x1ec   :  { %1191 = vmax.xlane.f32.xlu1 %v3125_v18 }
 0x1ed   :  { %v2245_v21 = vpop.f32.mrb[20].mxu1  ;;  %1193 = vmax.xlane.f32.xlu0 %v3128_v20 }
 0x1ee   :  { %v956_v23 = vpop.f32.mrb[21].mxu1  ;;  %v3141_v26 = vadd.f32 %v2245_v21, %v3030_v34 }
 0x1ef   :  { %v3136_v24 = vadd.f32 %v3030_v34, %v956_v23 }
 0x1f0   :  { %1195 = vmax.xlane.f32.xlu1 %v3133_v22 }
 0x1f1   :  { %v2248_v25 = vpop.f32.mrb[22].mxu1  ;;  %1197 = vmax.xlane.f32.xlu0 %v3136_v24 }
 0x1f2   :  { %v966_v27 = vpop.f32.mrb[23].mxu1  ;;  %v3149_v31 = vadd.f32 %v2248_v25, %v3030_v34 }
 0x1f3   :  { %v3144_v28 = vadd.f32 %v3030_v34, %v966_v27 }
 0x1f4   :  { %1199 = vmax.xlane.f32.xlu1 %v3141_v26 }
 0x1f5   :  { %v2251_v29 = vpop.f32.mrb[24].mxu1  ;;  %1201 = vmax.xlane.f32.xlu0 %v3144_v28 }
 0x1f6   :  { %v976_v32 = vpop.f32.mrb[25].mxu1  ;;  %v3157_v37 = vadd.f32 %v2251_v29, %v3030_v34 }
 0x1f7   :  { %v3152_v33 = vadd.f32 %v3030_v34, %v976_v32 }
 0x1f8   :  { %1203 = vmax.xlane.f32.xlu1 %v3149_v31 }
 0x1f9   :  { %v2254_v35 = vpop.f32.mrb[26].mxu1  ;;  %1205 = vmax.xlane.f32.xlu0 %v3152_v33 }
 0x1fa   :  { %v986_v38 = vpop.f32.mrb[27].mxu1  ;;  %v3165_v43 = vadd.f32 %v2254_v35, %v3030_v34 }
 0x1fb   :  { %v3160_v40 = vadd.f32 %v3030_v34, %v986_v38 }
 0x1fc   :  { %1207 = vmax.xlane.f32.xlu1 %v3157_v37 }
 0x1fd   :  { %v2257_v41 = vpop.f32.mrb[28].mxu1  ;;  %1209 = vmax.xlane.f32.xlu0 %v3160_v40 }
 0x1fe   :  { %v996_v45 = vpop.f32.mrb[29].mxu1  ;;  %v3173_v51 = vadd.f32 %v2257_v41, %v3030_v34 }
 0x1ff   :  { %v3168_v47 = vadd.f32 %v3030_v34, %v996_v45 }
 0x200   :  { %1211 = vmax.xlane.f32.xlu1 %v3165_v43 }
 0x201   :  { %v2260_v49 = vpop.f32.mrb[30].mxu1  ;;  %1213 = vmax.xlane.f32.xlu0 %v3168_v47 }
 0x202   :  { %v1006_v53 = vpop.f32.mrb[31].mxu1  ;;  %v3181_v59 = vadd.f32 %v2260_v49, %v3030_v34 }
 0x203   :  { %v3176_v55 = vadd.f32 %v3030_v34, %v1006_v53 }
 0x204   :  { %1215 = vmax.xlane.f32.xlu1 %v3173_v51 }
 0x205   :  { %v2263_v57 = vpop.f32.mrb[32].mxu1  ;;  %1217 = vmax.xlane.f32.xlu0 %v3176_v55 }
 0x206   :  { %v1016_v61 = vpop.f32.mrb[33].mxu1  ;;  %v3189_v3 = vadd.f32 %v2263_v57, %v3030_v34 }
 0x207   :  { %v3184_v63 = vadd.f32 %v3030_v34, %v1016_v61 }
 0x208   :  { %1219 = vmax.xlane.f32.xlu1 %v3181_v59 }
 0x209   :  { %v2266_v1 = vpop.f32.mrb[34].mxu1  ;;  %1221 = vmax.xlane.f32.xlu0 %v3184_v63 }
 0x20a   :  { %v1026_v5 = vpop.f32.mrb[35].mxu1  ;;  %v3197_v11 = vadd.f32 %v2266_v1, %v3030_v34 }
 0x20b   :  { %v3192_v7 = vadd.f32 %v3030_v34, %v1026_v5 }
 0x20c   :  { %1223 = vmax.xlane.f32.xlu1 %v3189_v3 }
 0x20d   :  { %v2269_v9 = vpop.f32.mrb[36].mxu1  ;;  %1225 = vmax.xlane.f32.xlu0 %v3192_v7 }
 0x20e   :  { %v1036_v13 = vpop.f32.mrb[37].mxu1  ;;  %v3205_v19 = vadd.f32 %v2269_v9, %v3030_v34 }
 0x20f   :  { %v3200_v15 = vadd.f32 %v3030_v34, %v1036_v13 }
 0x210   :  { %1227 = vmax.xlane.f32.xlu1 %v3197_v11 }
 0x211   :  { %v2272_v17 = vpop.f32.mrb[38].mxu1  ;;  %1229 = vmax.xlane.f32.xlu0 %v3200_v15 }
 0x212   :  { %v1046_v21 = vpop.f32.mrb[39].mxu1  ;;  %v3213_v27 = vadd.f32 %v2272_v17, %v3030_v34 }
 0x213   :  { %v3208_v23 = vadd.f32 %v3030_v34, %v1046_v21 }
 0x214   :  { %1231 = vmax.xlane.f32.xlu1 %v3205_v19 }
 0x215   :  { %v2275_v25 = vpop.f32.mrb[40].mxu1  ;;  %1233 = vmax.xlane.f32.xlu0 %v3208_v23 }
 0x216   :  { %v1056_v29 = vpop.f32.mrb[41].mxu1  ;;  %v3221_v38 = vadd.f32 %v2275_v25, %v3030_v34 }
 0x217   :  { %v3216_v32 = vadd.f32 %v3030_v34, %v1056_v29 }
 0x218   :  { %1235 = vmax.xlane.f32.xlu1 %v3213_v27 }
 0x219   :  { %v2278_v35 = vpop.f32.mrb[42].mxu1  ;;  %1237 = vmax.xlane.f32.xlu0 %v3216_v32 }
 0x21a   :  { %v1066_v41 = vpop.f32.mrb[43].mxu1  ;;  %v3229_v53 = vadd.f32 %v2278_v35, %v3030_v34 }
 0x21b   :  { %v3224_v45 = vadd.f32 %v3030_v34, %v1066_v41 }
 0x21c   :  { %1239 = vmax.xlane.f32.xlu1 %v3221_v38 }
 0x21d   :  { %v2281_v49 = vpop.f32.mrb[44].mxu1  ;;  %1241 = vmax.xlane.f32.xlu0 %v3224_v45 }
 0x21e   :  { %v1076_v57 = vpop.f32.mrb[45].mxu1  ;;  %v3237_v5 = vadd.f32 %v2281_v49, %v3030_v34 }
 0x21f   :  { %v3232_v61 = vadd.f32 %v3030_v34, %v1076_v57 }
 0x220   :  { %1243 = vmax.xlane.f32.xlu1 %v3229_v53 }
 0x221   :  { %v2284_v1 = vpop.f32.mrb[46].mxu1  ;;  %1245 = vmax.xlane.f32.xlu0 %v3232_v61 }
 0x222   :  { %v1086_v9 = vpop.f32.mrb[47].mxu1  ;;  %v3245_v21 = vadd.f32 %v2284_v1, %v3030_v34 }
 0x223   :  { %v3240_v13 = vadd.f32 %v3030_v34, %v1086_v9 }
 0x224   :  { %1247 = vmax.xlane.f32.xlu1 %v3237_v5  ;;  %3893 = vst [vmem:[#allocation2_spill] sm:$0xff] %v3245_v21 }
 0x225   :  { %v2287_v17 = vpop.f32.mrb[48].mxu1  ;;  %1249 = vmax.xlane.f32.xlu0 %v3240_v13 }
 0x226   :  { %v1096_v25 = vpop.f32.mrb[49].mxu1  ;;  %v3253_v41 = vadd.f32 %v2287_v17, %v3030_v34 }
 0x227   :  { %v3248_v29 = vadd.f32 %v3030_v34, %v1096_v25 }
 0x228   :  { %1251 = vmax.xlane.f32.xlu1 %v3245_v21  ;;  %3895 = vst [vmem:[#allocation4_spill] sm:$0xff] %v3253_v41 }
 0x229   :  { %3894 = vst [vmem:[#allocation3_spill] sm:$0xff] %v3248_v29  ;;  %v2290_v35 = vpop.f32.mrb[50].mxu1  ;;  %1253 = vmax.xlane.f32.xlu0 %v3248_v29 }
 0x22a   :  { %v1106_v49 = vpop.f32.mrb[51].mxu1  ;;  %v3261_v9 = vadd.f32 %v2290_v35, %v3030_v34 }
 0x22b   :  { %v3256_v57 = vadd.f32 %v3030_v34, %v1106_v49 }
 0x22c   :  { %1255 = vmax.xlane.f32.xlu1 %v3253_v41  ;;  %3897 = vst [vmem:[#allocation6_spill] sm:$0xff] %v3261_v9 }
 0x22d   :  { %3896 = vst [vmem:[#allocation5_spill] sm:$0xff] %v3256_v57  ;;  %v2293_v1 = vpop.f32.mrb[52].mxu1  ;;  %1257 = vmax.xlane.f32.xlu0 %v3256_v57 }
 0x22e   :  { %v1116_v25 = vpop.f32.mrb[53].mxu1  ;;  %v3269_v49 = vadd.f32 %v2293_v1, %v3030_v34 }
 0x22f   :  { %v3264_v21 = vadd.f32 %v3030_v34, %v1116_v25 }
 0x230   :  { %1259 = vmax.xlane.f32.xlu1 %v3261_v9  ;;  %3899 = vst [vmem:[#allocation8_spill] sm:$0xff] %v3269_v49 }
 0x231   :  { %3898 = vst [vmem:[#allocation7_spill] sm:$0xff] %v3264_v21  ;;  %v2296_v17 = vpop.f32.mrb[54].mxu1  ;;  %1261 = vmax.xlane.f32.xlu0 %v3264_v21 }
 0x232   :  { %v1126_v29 = vpop.f32.mrb[55].mxu1  ;;  %v3277_v25 = vadd.f32 %v2296_v17, %v3030_v34 }
 0x233   :  { %v3272_v41 = vadd.f32 %v3030_v34, %v1126_v29 }
 0x234   :  { %1263 = vmax.xlane.f32.xlu1 %v3269_v49  ;;  %3901 = vst [vmem:[#allocation10_spill] sm:$0xff] %v3277_v25 }
 0x235   :  { %3900 = vst [vmem:[#allocation9_spill] sm:$0xff] %v3272_v41  ;;  %v2299_v35 = vpop.f32.mrb[56].mxu1  ;;  %1265 = vmax.xlane.f32.xlu0 %v3272_v41 }
 0x236   :  { %v1136_v57 = vpop.f32.mrb[57].mxu1  ;;  %v3285_v1 = vadd.f32 %v2299_v35, %v3030_v34 }
 0x237   :  { %v3280_v9 = vadd.f32 %v3030_v34, %v1136_v57 }
 0x238   :  { %1267 = vmax.xlane.f32.xlu1 %v3277_v25  ;;  %3902 = vst [vmem:[#allocation11_spill] sm:$0xff] %v3285_v1 }
 0x239   :  { %1269 = vmax.xlane.f32.xlu0 %v3280_v9 }
 0x23c   :  { %1271 = vmax.xlane.f32.xlu1 %v3285_v1 }
 0x249   :  { %v1148_v29 = vpop.xlane.xlu0 %1147 }
 0x24a   :  { %v3289_v49 = vsub.f32 %v3033_v36, %v1148_v29 }
 0x24c   :  { %3903 = vst [vmem:[#allocation12_spill] sm:$0xff] %v3289_v49  ;;  %v1339_v17 = vmul.f32 1.442695, %v3289_v49 }
 0x24d   :  { %v1152_v41 = vpop.xlane.xlu1 %1151  ;;  %v1146_v21 = vpop.xlane.xlu0 %1145 }
 0x24e   :  { %2356 = vpow2.f32 %v1339_v17  ;;  %v3293_v57 = vsub.f32 %v3040_v39, %v1152_v41  ;;  %v3296_v25 = vsub.f32 %v3037_v30, %v1146_v21 }
 0x250   :  { %v1343_v34 = vmul.f32 1.442695, %v3293_v57  ;;  %v1337_v35 = vmul.f32 1.442695, %v3296_v25 }
 0x251   :  { %v1150_v1 = vpop.xlane.xlu1 %1149 }
 0x252   :  { %2358 = vpow2.f32 %v1343_v34  ;;  %v3301_v36 = vsub.f32 %v3045_v42, %v1150_v1  ;;  %v1154_v29 = vpop.xlane.xlu0 %1153 }
 0x253   :  { %2360 = vpow2.f32 %v1337_v35  ;;  %v3304_v49 = vsub.f32 %v3048_v44, %v1154_v29 }
 0x254   :  { %v1341_v39 = vmul.f32 1.442695, %v3301_v36 }
 0x255   :  { %3904 = vst [vmem:[#allocation13_spill] sm:$0xff] %v3304_v49  ;;  %v1156_v41 = vpop.xlane.xlu1 %1155  ;;  %v1345_v17 = vmul.f32 1.442695, %v3304_v49 }
 0x256   :  { %2362 = vpow2.f32 %v1341_v39  ;;  %v3308_v30 = vsub.f32 %v3053_v46, %v1156_v41  ;;  %v1158_v21 = vpop.xlane.xlu0 %1157 }
 0x257   :  { %v3312_v34 = vsub.f32 %v3056_v48, %v1158_v21 }
 0x258   :  { %v2357_v42 = vpop.eup %2356  ;;  %v1347_v1 = vmul.f32 1.442695, %v3308_v30 }
 0x259   :  { %1467 = vadd.xlane.f32.xlu1 %v2357_v42  ;;  %v1160_v35 = vpop.xlane.xlu1 %1159  ;;  %v1349_v46 = vmul.f32 1.442695, %v3312_v34 }
 0x25a   :  { %2364 = vpow2.f32 %v1347_v1  ;;  %v3316_v44 = vsub.f32 %v3061_v50, %v1160_v35  ;;  %v1162_v29 = vpop.xlane.xlu0 %1161 }
 0x25b   :  { %2366 = vpow2.f32 %v1345_v17  ;;  %v3320_v39 = vsub.f32 %v3064_v52, %v1162_v29 }
 0x25c   :  { %v2359_v41 = vpop.eup %2358  ;;  %v1351_v48 = vmul.f32 1.442695, %v3316_v44 }
 0x25d   :  { %v2361_v21 = vpop.eup %2360  ;;  %1471 = vadd.xlane.f32.xlu1 %v2359_v41  ;;  %v1164_v49 = vpop.xlane.xlu1 %1163  ;;  %v1353_v17 = vmul.f32 1.442695, %v3320_v39 }
 0x25e   :  { %2368 = vpow2.f32 %v1351_v48  ;;  %v3324_v42 = vsub.f32 %v3069_v54, %v1164_v49  ;;  %1465 = vadd.xlane.f32.xlu0 %v2361_v21  ;;  %v1166_v50 = vpop.xlane.xlu0 %1165 }
 0x25f   :  { %2370 = vpow2.f32 %v1349_v46  ;;  %v3328_v1 = vsub.f32 %v3072_v56, %v1166_v50 }
 0x260   :  { %v2363_v52 = vpop.eup %2362  ;;  %v1355_v35 = vmul.f32 1.442695, %v3324_v42 }
 0x261   :  { %3905 = vst [vmem:[#allocation14_spill] sm:$0xff] %v3328_v1  ;;  %v1168_v29 = vpop.xlane.xlu1 %1167  ;;  %v1357_v54 = vmul.f32 1.442695, %v3328_v1 }
 0x262   :  { %2372 = vpow2.f32 %v1355_v35  ;;  %v3332_v41 = vsub.f32 %v3077_v58, %v1168_v29  ;;  %1469 = vadd.xlane.f32.xlu0 %v2363_v52  ;;  %v1170_v48 = vpop.xlane.xlu0 %1169 }
 0x263   :  { %2374 = vpow2.f32 %v1353_v17  ;;  %v3336_v49 = vsub.f32 %v3080_v60, %v1170_v48 }
 0x264   :  { %v2365_v46 = vpop.eup %2364  ;;  %v1359_v56 = vmul.f32 1.442695, %v3332_v41 }
 0x265   :  { %v2367_v21 = vpop.eup %2366  ;;  %1475 = vadd.xlane.f32.xlu1 %v2365_v46  ;;  %v1172_v50 = vpop.xlane.xlu1 %1171  ;;  %v1361_v17 = vmul.f32 1.442695, %v3336_v49 }
 0x266   :  { %2376 = vpow2.f32 %v1359_v56  ;;  %v3340_v35 = vsub.f32 %v3085_v62, %v1172_v50  ;;  %1473 = vadd.xlane.f32.xlu0 %v2367_v21  ;;  %v1174_v58 = vpop.xlane.xlu0 %1173 }
 0x267   :  { %2378 = vpow2.f32 %v1357_v54  ;;  %v3344_v52 = vsub.f32 %v3088_v0, %v1174_v58 }
 0x268   :  { %v2369_v60 = vpop.eup %2368  ;;  %v1363_v29 = vmul.f32 1.442695, %v3340_v35 }
 0x269   :  { %v2371_v48 = vpop.eup %2370  ;;  %1479 = vadd.xlane.f32.xlu1 %v2369_v60  ;;  %v1176_v1 = vpop.xlane.xlu1 %1175  ;;  %v1365_v54 = vmul.f32 1.442695, %v3344_v52 }
 0x26a   :  { %2380 = vpow2.f32 %v1363_v29  ;;  %v3348_v46 = vsub.f32 %v3093_v2, %v1176_v1  ;;  %1477 = vadd.xlane.f32.xlu0 %v2371_v48  ;;  %v1178_v62 = vpop.xlane.xlu0 %1177 }
 0x26b   :  { %2382 = vpow2.f32 %v1361_v17  ;;  %v3352_v56 = vsub.f32 %v3096_v4, %v1178_v62 }
 0x26c   :  { %v2373_v0 = vpop.eup %2372  ;;  %v1367_v21 = vmul.f32 1.442695, %v3348_v46 }
 0x26d   :  { %v2375_v50 = vpop.eup %2374  ;;  %1483 = vadd.xlane.f32.xlu1 %v2373_v0  ;;  %v1180_v58 = vpop.xlane.xlu1 %1179  ;;  %v1369_v1 = vmul.f32 1.442695, %v3352_v56 }
 0x26e   :  { %2384 = vpow2.f32 %v1367_v21  ;;  %v3356_v60 = vsub.f32 %v3101_v6, %v1180_v58  ;;  %1481 = vadd.xlane.f32.xlu0 %v2375_v50  ;;  %v1182_v2 = vpop.xlane.xlu0 %1181 }
 0x26f   :  { %2386 = vpow2.f32 %v1365_v54  ;;  %v3360_v17 = vsub.f32 %v3104_v8, %v1182_v2 }
 0x270   :  { %v2377_v4 = vpop.eup %2376  ;;  %v1371_v29 = vmul.f32 1.442695, %v3356_v60 }
 0x271   :  { %v2379_v48 = vpop.eup %2378  ;;  %1487 = vadd.xlane.f32.xlu1 %v2377_v4  ;;  %v1184_v62 = vpop.xlane.xlu1 %1183  ;;  %v1373_v54 = vmul.f32 1.442695, %v3360_v17 }
 0x272   :  { %2388 = vpow2.f32 %v1371_v29  ;;  %v3364_v0 = vsub.f32 %v3109_v10, %v1184_v62  ;;  %1485 = vadd.xlane.f32.xlu0 %v2379_v48  ;;  %v1186_v6 = vpop.xlane.xlu0 %1185 }
 0x273   :  { %2390 = vpow2.f32 %v1369_v1  ;;  %v3368_v21 = vsub.f32 %v3112_v12, %v1186_v6 }
 0x274   :  { %v2381_v8 = vpop.eup %2380  ;;  %v1375_v50 = vmul.f32 1.442695, %v3364_v0 }
 0x275   :  { %v2383_v58 = vpop.eup %2382  ;;  %1491 = vadd.xlane.f32.xlu1 %v2381_v8  ;;  %v1188_v2 = vpop.xlane.xlu1 %1187  ;;  %v1377_v1 = vmul.f32 1.442695, %v3368_v21 }
 0x276   :  { %2392 = vpow2.f32 %v1375_v50  ;;  %v3372_v4 = vsub.f32 %v3117_v14, %v1188_v2  ;;  %1489 = vadd.xlane.f32.xlu0 %v2383_v58  ;;  %v1190_v10 = vpop.xlane.xlu0 %1189 }
 0x277   :  { %2394 = vpow2.f32 %v1373_v54  ;;  %v3376_v29 = vsub.f32 %v3120_v16, %v1190_v10 }
 0x278   :  { %v2385_v12 = vpop.eup %2384  ;;  %v1379_v48 = vmul.f32 1.442695, %v3372_v4 }
 0x279   :  { %v2387_v62 = vpop.eup %2386  ;;  %1495 = vadd.xlane.f32.xlu1 %v2385_v12  ;;  %v1192_v6 = vpop.xlane.xlu1 %1191  ;;  %v1381_v54 = vmul.f32 1.442695, %v3376_v29 }
 0x27a   :  { %2396 = vpow2.f32 %v1379_v48  ;;  %v3380_v8 = vsub.f32 %v3125_v18, %v1192_v6  ;;  %1493 = vadd.xlane.f32.xlu0 %v2387_v62  ;;  %v1194_v14 = vpop.xlane.xlu0 %1193 }
 0x27b   :  { %2398 = vpow2.f32 %v1377_v1  ;;  %v3384_v50 = vsub.f32 %v3128_v20, %v1194_v14 }
 0x27c   :  { %v2389_v16 = vpop.eup %2388  ;;  %v1383_v58 = vmul.f32 1.442695, %v3380_v8 }
 0x27d   :  { %v2391_v2 = vpop.eup %2390  ;;  %1499 = vadd.xlane.f32.xlu1 %v2389_v16  ;;  %v1196_v10 = vpop.xlane.xlu1 %1195  ;;  %v1385_v1 = vmul.f32 1.442695, %v3384_v50 }
 0x27e   :  { %2400 = vpow2.f32 %v1383_v58  ;;  %v3388_v12 = vsub.f32 %v3133_v22, %v1196_v10  ;;  %1497 = vadd.xlane.f32.xlu0 %v2391_v2  ;;  %v1198_v18 = vpop.xlane.xlu0 %1197 }
 0x27f   :  { %2402 = vpow2.f32 %v1381_v54  ;;  %v3392_v48 = vsub.f32 %v3136_v24, %v1198_v18 }
 0x280   :  { %v2393_v20 = vpop.eup %2392  ;;  %v1387_v62 = vmul.f32 1.442695, %v3388_v12 }
 0x281   :  { %v2395_v6 = vpop.eup %2394  ;;  %1503 = vadd.xlane.f32.xlu1 %v2393_v20  ;;  %v1200_v14 = vpop.xlane.xlu1 %1199  ;;  %v1389_v54 = vmul.f32 1.442695, %v3392_v48 }
 0x282   :  { %2404 = vpow2.f32 %v1387_v62  ;;  %v3396_v16 = vsub.f32 %v3141_v26, %v1200_v14  ;;  %1501 = vadd.xlane.f32.xlu0 %v2395_v6  ;;  %v1202_v22 = vpop.xlane.xlu0 %1201 }
 0x283   :  { %2406 = vpow2.f32 %v1385_v1  ;;  %v3400_v58 = vsub.f32 %v3144_v28, %v1202_v22 }
 0x284   :  { %v2397_v24 = vpop.eup %2396  ;;  %v1391_v2 = vmul.f32 1.442695, %v3396_v16 }
 0x285   :  { %v2399_v10 = vpop.eup %2398  ;;  %1507 = vadd.xlane.f32.xlu1 %v2397_v24  ;;  %v1204_v18 = vpop.xlane.xlu1 %1203  ;;  %v1393_v1 = vmul.f32 1.442695, %v3400_v58 }
 0x286   :  { %2408 = vpow2.f32 %v1391_v2  ;;  %v3404_v20 = vsub.f32 %v3149_v31, %v1204_v18  ;;  %1505 = vadd.xlane.f32.xlu0 %v2399_v10  ;;  %v1206_v26 = vpop.xlane.xlu0 %1205 }
 0x287   :  { %2410 = vpow2.f32 %v1389_v54  ;;  %v3408_v62 = vsub.f32 %v3152_v33, %v1206_v26 }
 0x288   :  { %v2401_v28 = vpop.eup %2400  ;;  %v1395_v6 = vmul.f32 1.442695, %v3404_v20 }
 0x289   :  { %v2403_v14 = vpop.eup %2402  ;;  %1511 = vadd.xlane.f32.xlu1 %v2401_v28  ;;  %v1208_v22 = vpop.xlane.xlu1 %1207  ;;  %v1397_v54 = vmul.f32 1.442695, %v3408_v62 }
 0x28a   :  { %2412 = vpow2.f32 %v1395_v6  ;;  %v3412_v24 = vsub.f32 %v3157_v37, %v1208_v22  ;;  %1509 = vadd.xlane.f32.xlu0 %v2403_v14  ;;  %v1210_v31 = vpop.xlane.xlu0 %1209 }
 0x28b   :  { %2414 = vpow2.f32 %v1393_v1  ;;  %v3416_v2 = vsub.f32 %v3160_v40, %v1210_v31 }
 0x28c   :  { %v2405_v33 = vpop.eup %2404  ;;  %v1399_v10 = vmul.f32 1.442695, %v3412_v24 }
 0x28d   :  { %v2407_v18 = vpop.eup %2406  ;;  %1515 = vadd.xlane.f32.xlu1 %v2405_v33  ;;  %v1212_v26 = vpop.xlane.xlu1 %1211  ;;  %v1401_v1 = vmul.f32 1.442695, %v3416_v2 }
 0x28e   :  { %2416 = vpow2.f32 %v1399_v10  ;;  %v3420_v28 = vsub.f32 %v3165_v43, %v1212_v26  ;;  %1513 = vadd.xlane.f32.xlu0 %v2407_v18  ;;  %v1214_v37 = vpop.xlane.xlu0 %1213 }
 0x28f   :  { %2418 = vpow2.f32 %v1397_v54  ;;  %v3424_v6 = vsub.f32 %v3168_v47, %v1214_v37 }
 0x290   :  { %v2409_v40 = vpop.eup %2408  ;;  %v1403_v14 = vmul.f32 1.442695, %v3420_v28 }
 0x291   :  { %v2411_v22 = vpop.eup %2410  ;;  %1519 = vadd.xlane.f32.xlu1 %v2409_v40  ;;  %v1216_v31 = vpop.xlane.xlu1 %1215  ;;  %v1405_v54 = vmul.f32 1.442695, %v3424_v6 }
 0x292   :  { %2420 = vpow2.f32 %v1403_v14  ;;  %v3428_v33 = vsub.f32 %v3173_v51, %v1216_v31  ;;  %1517 = vadd.xlane.f32.xlu0 %v2411_v22  ;;  %v1218_v43 = vpop.xlane.xlu0 %1217 }
 0x293   :  { %2422 = vpow2.f32 %v1401_v1  ;;  %v3432_v10 = vsub.f32 %v3176_v55, %v1218_v43 }
 0x294   :  { %v2413_v47 = vpop.eup %2412  ;;  %v1407_v18 = vmul.f32 1.442695, %v3428_v33 }
 0x295   :  { %v2415_v26 = vpop.eup %2414  ;;  %1523 = vadd.xlane.f32.xlu1 %v2413_v47  ;;  %v1220_v37 = vpop.xlane.xlu1 %1219  ;;  %v1409_v1 = vmul.f32 1.442695, %v3432_v10 }
 0x296   :  { %2424 = vpow2.f32 %v1407_v18  ;;  %v3436_v40 = vsub.f32 %v3181_v59, %v1220_v37  ;;  %1521 = vadd.xlane.f32.xlu0 %v2415_v26  ;;  %v1222_v51 = vpop.xlane.xlu0 %1221 }
 0x297   :  { %2426 = vpow2.f32 %v1405_v54  ;;  %v3440_v14 = vsub.f32 %v3184_v63, %v1222_v51 }
 0x298   :  { %v2417_v55 = vpop.eup %2416  ;;  %v1411_v22 = vmul.f32 1.442695, %v3436_v40 }
 0x299   :  { %v2419_v31 = vpop.eup %2418  ;;  %1527 = vadd.xlane.f32.xlu1 %v2417_v55  ;;  %v1224_v43 = vpop.xlane.xlu1 %1223  ;;  %v1413_v54 = vmul.f32 1.442695, %v3440_v14 }
 0x29a   :  { %2428 = vpow2.f32 %v1411_v22  ;;  %v3444_v47 = vsub.f32 %v3189_v3, %v1224_v43  ;;  %1525 = vadd.xlane.f32.xlu0 %v2419_v31  ;;  %v1226_v59 = vpop.xlane.xlu0 %1225 }
 0x29b   :  { %2430 = vpow2.f32 %v1409_v1  ;;  %v3448_v18 = vsub.f32 %v3192_v7, %v1226_v59 }
 0x29c   :  { %v2421_v63 = vpop.eup %2420  ;;  %v1415_v26 = vmul.f32 1.442695, %v3444_v47 }
 0x29d   :  { %v2423_v37 = vpop.eup %2422  ;;  %1531 = vadd.xlane.f32.xlu1 %v2421_v63  ;;  %v1228_v51 = vpop.xlane.xlu1 %1227  ;;  %v1417_v1 = vmul.f32 1.442695, %v3448_v18 }
 0x29e   :  { %2432 = vpow2.f32 %v1415_v26  ;;  %v3452_v55 = vsub.f32 %v3197_v11, %v1228_v51  ;;  %1529 = vadd.xlane.f32.xlu0 %v2423_v37  ;;  %v1230_v3 = vpop.xlane.xlu0 %1229 }
 0x29f   :  { %2434 = vpow2.f32 %v1413_v54  ;;  %v3456_v22 = vsub.f32 %v3200_v15, %v1230_v3 }
 0x2a0   :  { %v2425_v7 = vpop.eup %2424  ;;  %v1419_v31 = vmul.f32 1.442695, %v3452_v55 }
 0x2a1   :  { %v2427_v43 = vpop.eup %2426  ;;  %1535 = vadd.xlane.f32.xlu1 %v2425_v7  ;;  %v1232_v59 = vpop.xlane.xlu1 %1231  ;;  %v1421_v54 = vmul.f32 1.442695, %v3456_v22 }
 0x2a2   :  { %2436 = vpow2.f32 %v1419_v31  ;;  %v3460_v63 = vsub.f32 %v3205_v19, %v1232_v59  ;;  %1533 = vadd.xlane.f32.xlu0 %v2427_v43  ;;  %v1234_v11 = vpop.xlane.xlu0 %1233 }
 0x2a3   :  { %2438 = vpow2.f32 %v1417_v1  ;;  %v3464_v26 = vsub.f32 %v3208_v23, %v1234_v11 }
 0x2a4   :  { %v2429_v15 = vpop.eup %2428  ;;  %v1423_v37 = vmul.f32 1.442695, %v3460_v63 }
 0x2a5   :  { %v2431_v51 = vpop.eup %2430  ;;  %1539 = vadd.xlane.f32.xlu1 %v2429_v15  ;;  %v1236_v3 = vpop.xlane.xlu1 %1235  ;;  %v1425_v1 = vmul.f32 1.442695, %v3464_v26 }
 0x2a6   :  { %2440 = vpow2.f32 %v1423_v37  ;;  %v3468_v7 = vsub.f32 %v3213_v27, %v1236_v3  ;;  %1537 = vadd.xlane.f32.xlu0 %v2431_v51  ;;  %v1238_v19 = vpop.xlane.xlu0 %1237 }
 0x2a7   :  { %2442 = vpow2.f32 %v1421_v54  ;;  %v3472_v31 = vsub.f32 %v3216_v32, %v1238_v19 }
 0x2a8   :  { %v2433_v23 = vpop.eup %2432  ;;  %v1427_v43 = vmul.f32 1.442695, %v3468_v7 }
 0x2a9   :  { %v2435_v59 = vpop.eup %2434  ;;  %1543 = vadd.xlane.f32.xlu1 %v2433_v23  ;;  %v1240_v11 = vpop.xlane.xlu1 %1239  ;;  %v1429_v54 = vmul.f32 1.442695, %v3472_v31 }
 0x2aa   :  { %2444 = vpow2.f32 %v1427_v43  ;;  %v3476_v15 = vsub.f32 %v3221_v38, %v1240_v11  ;;  %1541 = vadd.xlane.f32.xlu0 %v2435_v59  ;;  %v1242_v27 = vpop.xlane.xlu0 %1241 }
 0x2ab   :  { %2446 = vpow2.f32 %v1425_v1  ;;  %v3480_v37 = vsub.f32 %v3224_v45, %v1242_v27 }
 0x2ac   :  { %v2437_v32 = vpop.eup %2436  ;;  %v1431_v51 = vmul.f32 1.442695, %v3476_v15 }
 0x2ad   :  { %v2439_v3 = vpop.eup %2438  ;;  %1547 = vadd.xlane.f32.xlu1 %v2437_v32  ;;  %v1244_v19 = vpop.xlane.xlu1 %1243  ;;  %v1433_v1 = vmul.f32 1.442695, %v3480_v37 }
 0x2ae   :  { %2448 = vpow2.f32 %v1431_v51  ;;  %v3484_v23 = vsub.f32 %v3229_v53, %v1244_v19  ;;  %1545 = vadd.xlane.f32.xlu0 %v2439_v3  ;;  %v1246_v38 = vpop.xlane.xlu0 %1245 }
 0x2af   :  { %2450 = vpow2.f32 %v1429_v54  ;;  %v3488_v43 = vsub.f32 %v3232_v61, %v1246_v38 }
 0x2b0   :  { %v2441_v45 = vpop.eup %2440  ;;  %v1435_v59 = vmul.f32 1.442695, %v3484_v23 }
 0x2b1   :  { %3906 = vst [vmem:[#allocation15_spill] sm:$0xff] %v3488_v43  ;;  %v2443_v11 = vpop.eup %2442  ;;  %1551 = vadd.xlane.f32.xlu1 %v2441_v45  ;;  %v1248_v27 = vpop.xlane.xlu1 %1247  ;;  %v1437_v54 = vmul.f32 1.442695, %v3488_v43  ;;  %v3909_v45 = vld [vmem:[#allocation2_spill] sm:$0xff] }
 0x2b2   :  { %2452 = vpow2.f32 %v1435_v59  ;;  %v3492_v32 = vsub.f32 %v3237_v5, %v1248_v27  ;;  %1549 = vadd.xlane.f32.xlu0 %v2443_v11  ;;  %v1250_v53 = vpop.xlane.xlu0 %1249  ;;  %v3911_v11 = vld [vmem:[#allocation3_spill] sm:$0xff] }
 0x2b3   :  { %2454 = vpow2.f32 %v1433_v1  ;;  %v3496_v51 = vsub.f32 %v3240_v13, %v1250_v53 }
 0x2b4   :  { %3907 = vst [vmem:[#allocation16_spill] sm:$0xff] %v3492_v32  ;;  %v2445_v61 = vpop.eup %2444  ;;  %v1439_v3 = vmul.f32 1.442695, %v3492_v32 }
 0x2b5   :  { %3908 = vst [vmem:[#allocation17_spill] sm:$0xff] %v3496_v51  ;;  %v2447_v19 = vpop.eup %2446  ;;  %1555 = vadd.xlane.f32.xlu1 %v2445_v61  ;;  %v1252_v38 = vpop.xlane.xlu1 %1251  ;;  %v1441_v1 = vmul.f32 1.442695, %v3496_v51  ;;  %v3913_v61 = vld [vmem:[#allocation4_spill] sm:$0xff] }
 0x2b6   :  { %2456 = vpow2.f32 %v1439_v3  ;;  %v3500_v59 = vsub.f32 %v3909_v45, %v1252_v38  ;;  %1553 = vadd.xlane.f32.xlu0 %v2447_v19  ;;  %v1254_v5 = vpop.xlane.xlu0 %1253  ;;  %v3915_v19 = vld [vmem:[#allocation5_spill] sm:$0xff] }
 0x2b7   :  { %2458 = vpow2.f32 %v1437_v54  ;;  %v3504_v27 = vsub.f32 %v3911_v11, %v1254_v5 }
 0x2b8   :  { %3910 = vst [vmem:[#allocation2_spill] sm:$0xff] %v3500_v59  ;;  %v2449_v13 = vpop.eup %2448  ;;  %v1443_v53 = vmul.f32 1.442695, %v3500_v59 }
 0x2b9   :  { %3912 = vst [vmem:[#allocation3_spill] sm:$0xff] %v3504_v27  ;;  %v2451_v43 = vpop.eup %2450  ;;  %1559 = vadd.xlane.f32.xlu1 %v2449_v13  ;;  %v1256_v32 = vpop.xlane.xlu1 %1255  ;;  %v1445_v54 = vmul.f32 1.442695, %v3504_v27  ;;  %v3917_v13 = vld [vmem:[#allocation6_spill] sm:$0xff] }
 0x2ba   :  { %2460 = vpow2.f32 %v1443_v53  ;;  %v3508_v3 = vsub.f32 %v3913_v61, %v1256_v32  ;;  %1557 = vadd.xlane.f32.xlu0 %v2451_v43  ;;  %v1258_v38 = vpop.xlane.xlu0 %1257 }
 0x2bb   :  { %2462 = vpow2.f32 %v1441_v1  ;;  %v3512_v45 = vsub.f32 %v3915_v19, %v1258_v38  ;;  %v3919_v1 = vld [vmem:[#allocation7_spill] sm:$0xff] }
 0x2bc   :  { %3914 = vst [vmem:[#allocation4_spill] sm:$0xff] %v3508_v3  ;;  %v2453_v5 = vpop.eup %2452  ;;  %v1447_v11 = vmul.f32 1.442695, %v3508_v3 }
 0x2bd   :  { %3916 = vst [vmem:[#allocation5_spill] sm:$0xff] %v3512_v45  ;;  %v2455_v51 = vpop.eup %2454  ;;  %1563 = vadd.xlane.f32.xlu1 %v2453_v5  ;;  %v1260_v59 = vpop.xlane.xlu1 %1259  ;;  %v1449_v43 = vmul.f32 1.442695, %v3512_v45  ;;  %v3921_v5 = vld [vmem:[#allocation8_spill] sm:$0xff] }
 0x2be   :  { %2464 = vpow2.f32 %v1447_v11  ;;  %v3516_v53 = vsub.f32 %v3917_v13, %v1260_v59  ;;  %1561 = vadd.xlane.f32.xlu0 %v2455_v51  ;;  %v1262_v32 = vpop.xlane.xlu0 %1261 }
 0x2bf   :  { %2466 = vpow2.f32 %v1445_v54  ;;  %v3520_v61 = vsub.f32 %v3919_v1, %v1262_v32  ;;  %v3922_v54 = vld [vmem:[#allocation9_spill] sm:$0xff] }
 0x2c0   :  { %3918 = vst [vmem:[#allocation6_spill] sm:$0xff] %v3516_v53  ;;  %v2457_v38 = vpop.eup %2456  ;;  %v1451_v19 = vmul.f32 1.442695, %v3516_v53 }
 0x2c1   :  { %3920 = vst [vmem:[#allocation7_spill] sm:$0xff] %v3520_v61  ;;  %v2459_v27 = vpop.eup %2458  ;;  %1567 = vadd.xlane.f32.xlu1 %v2457_v38  ;;  %v1264_v3 = vpop.xlane.xlu1 %1263  ;;  %v1453_v51 = vmul.f32 1.442695, %v3520_v61  ;;  %v3923_v38 = vld [vmem:[#allocation10_spill] sm:$0xff] }
 0x2c2   :  { %2468 = vpow2.f32 %v1451_v19  ;;  %v3524_v11 = vsub.f32 %v3921_v5, %v1264_v3  ;;  %1565 = vadd.xlane.f32.xlu0 %v2459_v27  ;;  %v1266_v59 = vpop.xlane.xlu0 %1265 }
 0x2c3   :  { %2470 = vpow2.f32 %v1449_v43  ;;  %v3528_v13 = vsub.f32 %v3922_v54, %v1266_v59 }
 0x2c4   :  { %v2461_v32 = vpop.eup %2460  ;;  %v1455_v1 = vmul.f32 1.442695, %v3524_v11 }
 0x2c5   :  { %v2463_v45 = vpop.eup %2462  ;;  %1571 = vadd.xlane.f32.xlu1 %v2461_v32  ;;  %v1268_v53 = vpop.xlane.xlu1 %1267  ;;  %v1457_v27 = vmul.f32 1.442695, %v3528_v13  ;;  %v3925_v32 = vld [vmem:[#allocation11_spill] sm:$0xff] }
 0x2c6   :  { %2472 = vpow2.f32 %v1455_v1  ;;  %v3532_v19 = vsub.f32 %v3923_v38, %v1268_v53  ;;  %1569 = vadd.xlane.f32.xlu0 %v2463_v45  ;;  %v1270_v3 = vpop.xlane.xlu0 %1269 }
 0x2c7   :  { %2474 = vpow2.f32 %v1453_v51  ;;  %v3536_v43 = vsub.f32 %v3280_v9, %v1270_v3 }
 0x2c8   :  { %v2465_v5 = vpop.eup %2464  ;;  %v1459_v59 = vmul.f32 1.442695, %v3532_v19 }
 0x2c9   :  { %3924 = vst [vmem:[#allocation8_spill] sm:$0xff] %v3536_v43  ;;  %v2467_v54 = vpop.eup %2466  ;;  %1575 = vadd.xlane.f32.xlu1 %v2465_v5  ;;  %v1272_v61 = vpop.xlane.xlu1 %1271  ;;  %v1461_v45 = vmul.f32 1.442695, %v3536_v43 }
 0x2ca   :  { %2476 = vpow2.f32 %v1459_v59  ;;  %v3540_v1 = vsub.f32 %v3925_v32, %v1272_v61  ;;  %1573 = vadd.xlane.f32.xlu0 %v2467_v54 }
 0x2cb   :  { %2478 = vpow2.f32 %v1457_v27 }
 0x2cc   :  { %v2469_v53 = vpop.eup %2468  ;;  %v1463_v51 = vmul.f32 1.442695, %v3540_v1 }
 0x2cd   :  { %v2471_v38 = vpop.eup %2470  ;;  %1579 = vadd.xlane.f32.xlu1 %v2469_v53 }
 0x2ce   :  { %2480 = vpow2.f32 %v1463_v51  ;;  %1577 = vadd.xlane.f32.xlu0 %v2471_v38 }
 0x2cf   :  { %2482 = vpow2.f32 %v1461_v45 }
 0x2d0   :  { %v2473_v9 = vpop.eup %2472 }
 0x2d1   :  { %v2475_v3 = vpop.eup %2474  ;;  %1583 = vadd.xlane.f32.xlu1 %v2473_v9 }
 0x2d2   :  { %1581 = vadd.xlane.f32.xlu0 %v2475_v3 }
 0x2d4   :  { %v2477_v5 = vpop.eup %2476 }
 0x2d5   :  { %v2479_v59 = vpop.eup %2478  ;;  %1587 = vadd.xlane.f32.xlu1 %v2477_v5  ;;  %v3926_v5 = vld [vmem:[#allocation12_spill] sm:$0xff] }
 0x2d6   :  { %1585 = vadd.xlane.f32.xlu0 %v2479_v59 }
 0x2d8   :  { %v2481_v61 = vpop.eup %2480 }
 0x2d9   :  { %v2483_v27 = vpop.eup %2482  ;;  %1591 = vadd.xlane.f32.xlu1 %v2481_v61 }
 0x2da   :  { %1589 = vadd.xlane.f32.xlu0 %v2483_v27 }
 0x2e6   :  { %v1468_v54 = vpop.xlane.xlu1 %1467 }
 0x2e7   :  { %2484 = vlog2.f32 %v1468_v54 }
 0x2ea   :  { %v1472_v32 = vpop.xlane.xlu1 %1471 }
 0x2eb   :  { %2486 = vlog2.f32 %v1472_v32  ;;  %v1466_v53 = vpop.xlane.xlu0 %1465 }
 0x2ec   :  { %2488 = vlog2.f32 %v1466_v53 }
 0x2ef   :  { %v1470_v51 = vpop.xlane.xlu0 %1469 }
 0x2f0   :  { %2490 = vlog2.f32 %v1470_v51 }
 0x2f1   :  { %v2485_v45 = vpop.eup %2484 }
 0x2f2   :  { %v1596_v38 = vmul.f32 0.6931472, %v2485_v45  ;;  %v1476_v9 = vpop.xlane.xlu1 %1475 }
 0x2f3   :  { %2492 = vlog2.f32 %v1476_v9  ;;  %v1474_v3 = vpop.xlane.xlu0 %1473 }
 0x2f4   :  { %v1722_v59 = vsub.f32 %v3926_v5, %v1596_v38  ;;  %2494 = vlog2.f32 %v1474_v3 }
 0x2f5   :  { %v2487_v43 = vpop.eup %2486 }
 0x2f6   :  { %v2489_v61 = vpop.eup %2488  ;;  %1787 = vst.msk [vmem:[%s3869_s5 + $0x8] sm:$0xff] %vm1785_vm1, %v1722_v59  ;;  %v1600_v27 = vmul.f32 0.6931472, %v2487_v43  ;;  %v1480_v54 = vpop.xlane.xlu1 %1479 }
 0x2f7   :  { %v1594_v32 = vmul.f32 0.6931472, %v2489_v61  ;;  %2496 = vlog2.f32 %v1480_v54  ;;  %v1478_v53 = vpop.xlane.xlu0 %1477 }
 0x2f8   :  { %v1724_v51 = vsub.f32 %v3293_v57, %v1600_v27  ;;  %2498 = vlog2.f32 %v1478_v53 }
 0x2f9   :  { %v1721_v45 = vsub.f32 %v3296_v25, %v1594_v32 }
 0x2fa   :  { %v2491_v9 = vpop.eup %2490  ;;  %1789 = vst.msk [vmem:[%s3869_s5 + $0x18] sm:$0xff] %vm1785_vm1, %v1724_v51  ;;  %v1484_v38 = vpop.xlane.xlu1 %1483  ;;  %v3927_v51 = vld [vmem:[#allocation13_spill] sm:$0xff] }
 0x2fb   :  { %1786 = vst.msk [vmem:[%s3869_s5] sm:$0xff] %vm1785_vm1, %v1721_v45  ;;  %v1598_v43 = vmul.f32 0.6931472, %v2491_v9  ;;  %2500 = vlog2.f32 %v1484_v38  ;;  %v1482_v3 = vpop.xlane.xlu0 %1481 }
 0x2fc   :  { %2502 = vlog2.f32 %v1482_v3 }
 0x2fd   :  { %v2493_v57 = vpop.eup %2492  ;;  %v1723_v5 = vsub.f32 %v3301_v36, %v1598_v43 }
 0x2fe   :  { %v2495_v25 = vpop.eup %2494  ;;  %v1604_v59 = vmul.f32 0.6931472, %v2493_v57  ;;  %v1488_v61 = vpop.xlane.xlu1 %1487 }
 0x2ff   :  { %1788 = vst.msk [vmem:[%s3869_s5 + $0x10] sm:$0xff] %vm1785_vm1, %v1723_v5  ;;  %v1602_v27 = vmul.f32 0.6931472, %v2495_v25  ;;  %2504 = vlog2.f32 %v1488_v61  ;;  %v1486_v54 = vpop.xlane.xlu0 %1485 }
 0x300   :  { %v1726_v32 = vsub.f32 %v3308_v30, %v1604_v59  ;;  %2506 = vlog2.f32 %v1486_v54 }
 0x301   :  { %v2497_v53 = vpop.eup %2496  ;;  %v1725_v45 = vsub.f32 %v3927_v51, %v1602_v27 }
 0x302   :  { %v2499_v9 = vpop.eup %2498  ;;  %1791 = vst.msk [vmem:[%s3869_s5 + $0x28] sm:$0xff] %vm1785_vm1, %v1726_v32  ;;  %v1608_v36 = vmul.f32 0.6931472, %v2497_v53  ;;  %v1492_v38 = vpop.xlane.xlu1 %1491 }
 0x303   :  { %1790 = vst.msk [vmem:[%s3869_s5 + $0x20] sm:$0xff] %vm1785_vm1, %v1725_v45  ;;  %v1606_v43 = vmul.f32 0.6931472, %v2499_v9  ;;  %2508 = vlog2.f32 %v1492_v38  ;;  %v1490_v30 = vpop.xlane.xlu0 %1489  ;;  %v3928_v38 = vld [vmem:[#allocation14_spill] sm:$0xff] }
 0x304   :  { %v1728_v3 = vsub.f32 %v3316_v44, %v1608_v36  ;;  %2510 = vlog2.f32 %v1490_v30 }
 0x305   :  { %v2501_v57 = vpop.eup %2500  ;;  %v1727_v5 = vsub.f32 %v3312_v34, %v1606_v43 }
 0x306   :  { %v2503_v25 = vpop.eup %2502  ;;  %1793 = vst.msk [vmem:[%s3869_s5 + $0x38] sm:$0xff] %vm1785_vm1, %v1728_v3  ;;  %v1612_v59 = vmul.f32 0.6931472, %v2501_v57  ;;  %v1496_v61 = vpop.xlane.xlu1 %1495 }
 0x307   :  { %1792 = vst.msk [vmem:[%s3869_s5 + $0x30] sm:$0xff] %vm1785_vm1, %v1727_v5  ;;  %v1610_v27 = vmul.f32 0.6931472, %v2503_v25  ;;  %2512 = vlog2.f32 %v1496_v61  ;;  %v1494_v44 = vpop.xlane.xlu0 %1493 }
 0x308   :  { %v1730_v54 = vsub.f32 %v3324_v42, %v1612_v59  ;;  %2514 = vlog2.f32 %v1494_v44 }
 0x309   :  { %v2505_v34 = vpop.eup %2504  ;;  %v1729_v32 = vsub.f32 %v3320_v39, %v1610_v27 }
 0x30a   :  { %v2507_v53 = vpop.eup %2506  ;;  %1795 = vst.msk [vmem:[%s3869_s5 + $0x48] sm:$0xff] %vm1785_vm1, %v1730_v54  ;;  %v1616_v51 = vmul.f32 0.6931472, %v2505_v34  ;;  %v1500_v45 = vpop.xlane.xlu1 %1499 }
 0x30b   :  { %1794 = vst.msk [vmem:[%s3869_s5 + $0x40] sm:$0xff] %vm1785_vm1, %v1729_v32  ;;  %v1614_v9 = vmul.f32 0.6931472, %v2507_v53  ;;  %2516 = vlog2.f32 %v1500_v45  ;;  %v1498_v42 = vpop.xlane.xlu0 %1497 }
 0x30c   :  { %v1732_v36 = vsub.f32 %v3332_v41, %v1616_v51  ;;  %2518 = vlog2.f32 %v1498_v42 }
 0x30d   :  { %v2509_v39 = vpop.eup %2508  ;;  %v1731_v43 = vsub.f32 %v3928_v38, %v1614_v9 }
 0x30e   :  { %v2511_v30 = vpop.eup %2510  ;;  %1797 = vst.msk [vmem:[%s3869_s5 + $0x58] sm:$0xff] %vm1785_vm1, %v1732_v36  ;;  %v1620_v3 = vmul.f32 0.6931472, %v2509_v39  ;;  %v1504_v57 = vpop.xlane.xlu1 %1503 }
 0x30f   :  { %1796 = vst.msk [vmem:[%s3869_s5 + $0x50] sm:$0xff] %vm1785_vm1, %v1731_v43  ;;  %v1618_v5 = vmul.f32 0.6931472, %v2511_v30  ;;  %2520 = vlog2.f32 %v1504_v57  ;;  %v1502_v41 = vpop.xlane.xlu0 %1501 }
 0x310   :  { %v1734_v25 = vsub.f32 %v3340_v35, %v1620_v3  ;;  %2522 = vlog2.f32 %v1502_v41 }
 0x311   :  { %v2513_v59 = vpop.eup %2512  ;;  %v1733_v61 = vsub.f32 %v3336_v49, %v1618_v5 }
 0x312   :  { %v2515_v27 = vpop.eup %2514  ;;  %1799 = vst.msk [vmem:[%s3869_s5 + $0x68] sm:$0xff] %vm1785_vm1, %v1734_v25  ;;  %v1624_v44 = vmul.f32 0.6931472, %v2513_v59  ;;  %v1508_v54 = vpop.xlane.xlu1 %1507 }
 0x313   :  { %1798 = vst.msk [vmem:[%s3869_s5 + $0x60] sm:$0xff] %vm1785_vm1, %v1733_v61  ;;  %v1622_v34 = vmul.f32 0.6931472, %v2515_v27  ;;  %2524 = vlog2.f32 %v1508_v54  ;;  %v1506_v35 = vpop.xlane.xlu0 %1505 }
 0x314   :  { %v1736_v32 = vsub.f32 %v3348_v46, %v1624_v44  ;;  %2526 = vlog2.f32 %v1506_v35 }
 0x315   :  { %v2517_v49 = vpop.eup %2516  ;;  %v1735_v53 = vsub.f32 %v3344_v52, %v1622_v34 }
 0x316   :  { %v2519_v51 = vpop.eup %2518  ;;  %1801 = vst.msk [vmem:[%s3869_s5 + $0x78] sm:$0xff] %vm1785_vm1, %v1736_v32  ;;  %v1628_v45 = vmul.f32 0.6931472, %v2517_v49  ;;  %v1512_v9 = vpop.xlane.xlu1 %1511 }
 0x317   :  { %1800 = vst.msk [vmem:[%s3869_s5 + $0x70] sm:$0xff] %vm1785_vm1, %v1735_v53  ;;  %v1626_v42 = vmul.f32 0.6931472, %v2519_v51  ;;  %2528 = vlog2.f32 %v1512_v9  ;;  %v1510_v46 = vpop.xlane.xlu0 %1509 }
 0x318   :  { %v1738_v36 = vsub.f32 %v3356_v60, %v1628_v45  ;;  %2530 = vlog2.f32 %v1510_v46 }
 0x319   :  { %v2521_v52 = vpop.eup %2520  ;;  %v1737_v39 = vsub.f32 %v3352_v56, %v1626_v42 }
 0x31a   :  { %v2523_v38 = vpop.eup %2522  ;;  %1803 = vst.msk [vmem:[%s3869_s5 + $0x88] sm:$0xff] %vm1785_vm1, %v1738_v36  ;;  %v1632_v43 = vmul.f32 0.6931472, %v2521_v52  ;;  %v1516_v30 = vpop.xlane.xlu1 %1515 }
 0x31b   :  { %1802 = vst.msk [vmem:[%s3869_s5 + $0x80] sm:$0xff] %vm1785_vm1, %v1737_v39  ;;  %v1630_v3 = vmul.f32 0.6931472, %v2523_v38  ;;  %2532 = vlog2.f32 %v1516_v30  ;;  %v1514_v60 = vpop.xlane.xlu0 %1513 }
 0x31c   :  { %v1740_v57 = vsub.f32 %v3364_v0, %v1632_v43  ;;  %2534 = vlog2.f32 %v1514_v60 }
 0x31d   :  { %v2525_v56 = vpop.eup %2524  ;;  %v1739_v5 = vsub.f32 %v3360_v17, %v1630_v3 }
 0x31e   :  { %v2527_v41 = vpop.eup %2526  ;;  %1805 = vst.msk [vmem:[%s3869_s5 + $0x98] sm:$0xff] %vm1785_vm1, %v1740_v57  ;;  %v1636_v25 = vmul.f32 0.6931472, %v2525_v56  ;;  %v1520_v59 = vpop.xlane.xlu1 %1519 }
 0x31f   :  { %1804 = vst.msk [vmem:[%s3869_s5 + $0x90] sm:$0xff] %vm1785_vm1, %v1739_v5  ;;  %v1634_v61 = vmul.f32 0.6931472, %v2527_v41  ;;  %2536 = vlog2.f32 %v1520_v59  ;;  %v1518_v0 = vpop.xlane.xlu0 %1517 }
 0x320   :  { %v1742_v27 = vsub.f32 %v3372_v4, %v1636_v25  ;;  %2538 = vlog2.f32 %v1518_v0 }
 0x321   :  { %v2529_v17 = vpop.eup %2528  ;;  %v1741_v44 = vsub.f32 %v3368_v21, %v1634_v61 }
 0x322   :  { %v2531_v54 = vpop.eup %2530  ;;  %1807 = vst.msk [vmem:[%s3869_s5 + $0xa8] sm:$0xff] %vm1785_vm1, %v1742_v27  ;;  %v1640_v34 = vmul.f32 0.6931472, %v2529_v17  ;;  %v1524_v35 = vpop.xlane.xlu1 %1523 }
 0x323   :  { %1806 = vst.msk [vmem:[%s3869_s5 + $0xa0] sm:$0xff] %vm1785_vm1, %v1741_v44  ;;  %v1638_v32 = vmul.f32 0.6931472, %v2531_v54  ;;  %2540 = vlog2.f32 %v1524_v35  ;;  %v1522_v4 = vpop.xlane.xlu0 %1521 }
 0x324   :  { %v1744_v49 = vsub.f32 %v3380_v8, %v1640_v34  ;;  %2542 = vlog2.f32 %v1522_v4 }
 0x325   :  { %v2533_v21 = vpop.eup %2532  ;;  %v1743_v53 = vsub.f32 %v3376_v29, %v1638_v32 }
 0x326   :  { %v2535_v51 = vpop.eup %2534  ;;  %1809 = vst.msk [vmem:[%s3869_s5 + $0xb8] sm:$0xff] %vm1785_vm1, %v1744_v49  ;;  %v1644_v45 = vmul.f32 0.6931472, %v2533_v21  ;;  %v1528_v9 = vpop.xlane.xlu1 %1527 }
 0x327   :  { %1808 = vst.msk [vmem:[%s3869_s5 + $0xb0] sm:$0xff] %vm1785_vm1, %v1743_v53  ;;  %v1642_v42 = vmul.f32 0.6931472, %v2535_v51  ;;  %2544 = vlog2.f32 %v1528_v9  ;;  %v1526_v8 = vpop.xlane.xlu0 %1525 }
 0x328   :  { %v1746_v46 = vsub.f32 %v3388_v12, %v1644_v45  ;;  %2546 = vlog2.f32 %v1526_v8 }
 0x329   :  { %v2537_v29 = vpop.eup %2536  ;;  %v1745_v36 = vsub.f32 %v3384_v50, %v1642_v42 }
 0x32a   :  { %v2539_v52 = vpop.eup %2538  ;;  %1811 = vst.msk [vmem:[%s3869_s5 + $0xc8] sm:$0xff] %vm1785_vm1, %v1746_v46  ;;  %v1648_v39 = vmul.f32 0.6931472, %v2537_v29  ;;  %v1532_v38 = vpop.xlane.xlu1 %1531 }
 0x32b   :  { %1810 = vst.msk [vmem:[%s3869_s5 + $0xc0] sm:$0xff] %vm1785_vm1, %v1745_v36  ;;  %v1646_v43 = vmul.f32 0.6931472, %v2539_v52  ;;  %2548 = vlog2.f32 %v1532_v38  ;;  %v1530_v12 = vpop.xlane.xlu0 %1529 }
 0x32c   :  { %v1748_v30 = vsub.f32 %v3396_v16, %v1648_v39  ;;  %2550 = vlog2.f32 %v1530_v12 }
 0x32d   :  { %v2541_v50 = vpop.eup %2540  ;;  %v1747_v3 = vsub.f32 %v3392_v48, %v1646_v43 }
 0x32e   :  { %v2543_v60 = vpop.eup %2542  ;;  %1813 = vst.msk [vmem:[%s3869_s5 + $0xd8] sm:$0xff] %vm1785_vm1, %v1748_v30  ;;  %v1652_v57 = vmul.f32 0.6931472, %v2541_v50  ;;  %v1536_v56 = vpop.xlane.xlu1 %1535 }
 0x32f   :  { %1812 = vst.msk [vmem:[%s3869_s5 + $0xd0] sm:$0xff] %vm1785_vm1, %v1747_v3  ;;  %v1650_v5 = vmul.f32 0.6931472, %v2543_v60  ;;  %2552 = vlog2.f32 %v1536_v56  ;;  %v1534_v16 = vpop.xlane.xlu0 %1533 }
 0x330   :  { %v1750_v41 = vsub.f32 %v3404_v20, %v1652_v57  ;;  %2554 = vlog2.f32 %v1534_v16 }
 0x331   :  { %v2545_v48 = vpop.eup %2544  ;;  %v1749_v25 = vsub.f32 %v3400_v58, %v1650_v5 }
 0x332   :  { %v2547_v59 = vpop.eup %2546  ;;  %1815 = vst.msk [vmem:[%s3869_s5 + $0xe8] sm:$0xff] %vm1785_vm1, %v1750_v41  ;;  %v1656_v61 = vmul.f32 0.6931472, %v2545_v48  ;;  %v1540_v0 = vpop.xlane.xlu1 %1539 }
 0x333   :  { %1814 = vst.msk [vmem:[%s3869_s5 + $0xe0] sm:$0xff] %vm1785_vm1, %v1749_v25  ;;  %v1654_v27 = vmul.f32 0.6931472, %v2547_v59  ;;  %2556 = vlog2.f32 %v1540_v0  ;;  %v1538_v20 = vpop.xlane.xlu0 %1537 }
 0x334   :  { %v1752_v17 = vsub.f32 %v3412_v24, %v1656_v61  ;;  %2558 = vlog2.f32 %v1538_v20 }
 0x335   :  { %v2549_v58 = vpop.eup %2548  ;;  %v1751_v44 = vsub.f32 %v3408_v62, %v1654_v27 }
 0x336   :  { %v2551_v54 = vpop.eup %2550  ;;  %1817 = vst.msk [vmem:[%s3869_s5 + $0xf8] sm:$0xff] %vm1785_vm1, %v1752_v17  ;;  %v1660_v34 = vmul.f32 0.6931472, %v2549_v58  ;;  %v1544_v35 = vpop.xlane.xlu1 %1543 }
 0x337   :  { %1816 = vst.msk [vmem:[%s3869_s5 + $0xf0] sm:$0xff] %vm1785_vm1, %v1751_v44  ;;  %v1658_v32 = vmul.f32 0.6931472, %v2551_v54  ;;  %2560 = vlog2.f32 %v1544_v35  ;;  %v1542_v24 = vpop.xlane.xlu0 %1541 }
 0x338   :  { %v1754_v4 = vsub.f32 %v3420_v28, %v1660_v34  ;;  %2562 = vlog2.f32 %v1542_v24 }
 0x339   :  { %v2553_v62 = vpop.eup %2552  ;;  %v1753_v49 = vsub.f32 %v3416_v2, %v1658_v32 }
 0x33a   :  { %v2555_v21 = vpop.eup %2554  ;;  %1819 = vst.msk [vmem:[%s3869_s5 + $0x108] sm:$0xff] %vm1785_vm1, %v1754_v4  ;;  %v1664_v53 = vmul.f32 0.6931472, %v2553_v62  ;;  %v1548_v51 = vpop.xlane.xlu1 %1547 }
 0x33b   :  { %1818 = vst.msk [vmem:[%s3869_s5 + $0x100] sm:$0xff] %vm1785_vm1, %v1753_v49  ;;  %v1662_v45 = vmul.f32 0.6931472, %v2555_v21  ;;  %2564 = vlog2.f32 %v1548_v51  ;;  %v1546_v28 = vpop.xlane.xlu0 %1545 }
 0x33c   :  { %v1756_v9 = vsub.f32 %v3428_v33, %v1664_v53  ;;  %2566 = vlog2.f32 %v1546_v28 }
 0x33d   :  { %v2557_v2 = vpop.eup %2556  ;;  %v1755_v42 = vsub.f32 %v3424_v6, %v1662_v45 }
 0x33e   :  { %v2559_v8 = vpop.eup %2558  ;;  %1821 = vst.msk [vmem:[%s3869_s5 + $0x118] sm:$0xff] %vm1785_vm1, %v1756_v9  ;;  %v1668_v46 = vmul.f32 0.6931472, %v2557_v2  ;;  %v1552_v29 = vpop.xlane.xlu1 %1551 }
 0x33f   :  { %1820 = vst.msk [vmem:[%s3869_s5 + $0x110] sm:$0xff] %vm1785_vm1, %v1755_v42  ;;  %v1666_v36 = vmul.f32 0.6931472, %v2559_v8  ;;  %2568 = vlog2.f32 %v1552_v29  ;;  %v1550_v33 = vpop.xlane.xlu0 %1549  ;;  %v3929_v29 = vld [vmem:[#allocation16_spill] sm:$0xff] }
 0x340   :  { %v1758_v52 = vsub.f32 %v3436_v40, %v1668_v46  ;;  %2570 = vlog2.f32 %v1550_v33  ;;  %v3930_v33 = vld [vmem:[#allocation15_spill] sm:$0xff] }
 0x341   :  { %v2561_v6 = vpop.eup %2560  ;;  %v1757_v39 = vsub.f32 %v3432_v10, %v1666_v36 }
 0x342   :  { %v2563_v38 = vpop.eup %2562  ;;  %1823 = vst.msk [vmem:[%s3869_s5 + $0x128] sm:$0xff] %vm1785_vm1, %v1758_v52  ;;  %v1672_v43 = vmul.f32 0.6931472, %v2561_v6  ;;  %v1556_v12 = vpop.xlane.xlu1 %1555 }
 0x343   :  { %1822 = vst.msk [vmem:[%s3869_s5 + $0x120] sm:$0xff] %vm1785_vm1, %v1757_v39  ;;  %v1670_v30 = vmul.f32 0.6931472, %v2563_v38  ;;  %2572 = vlog2.f32 %v1556_v12  ;;  %v1554_v40 = vpop.xlane.xlu0 %1553 }
 0x344   :  { %v1760_v50 = vsub.f32 %v3444_v47, %v1672_v43  ;;  %2574 = vlog2.f32 %v1554_v40 }
 0x345   :  { %v2565_v10 = vpop.eup %2564  ;;  %v1759_v3 = vsub.f32 %v3440_v14, %v1670_v30  ;;  %v3931_v30 = vld [vmem:[#allocation2_spill] sm:$0xff] }
 0x346   :  { %v2567_v60 = vpop.eup %2566  ;;  %1825 = vst.msk [vmem:[%s3869_s5 + $0x138] sm:$0xff] %vm1785_vm1, %v1760_v50  ;;  %v1676_v57 = vmul.f32 0.6931472, %v2565_v10  ;;  %v1560_v56 = vpop.xlane.xlu1 %1559  ;;  %v3932_v10 = vld [vmem:[#allocation17_spill] sm:$0xff] }
 0x347   :  { %1824 = vst.msk [vmem:[%s3869_s5 + $0x130] sm:$0xff] %vm1785_vm1, %v1759_v3  ;;  %v1674_v5 = vmul.f32 0.6931472, %v2567_v60  ;;  %2576 = vlog2.f32 %v1560_v56  ;;  %v1558_v47 = vpop.xlane.xlu0 %1557 }
 0x348   :  { %v1762_v16 = vsub.f32 %v3452_v55, %v1676_v57  ;;  %2578 = vlog2.f32 %v1558_v47 }
 0x349   :  { %v2569_v14 = vpop.eup %2568  ;;  %v1761_v41 = vsub.f32 %v3448_v18, %v1674_v5 }
 0x34a   :  { %v2571_v48 = vpop.eup %2570  ;;  %1827 = vst.msk [vmem:[%s3869_s5 + $0x148] sm:$0xff] %vm1785_vm1, %v1762_v16  ;;  %v1680_v25 = vmul.f32 0.6931472, %v2569_v14  ;;  %v1564_v59 = vpop.xlane.xlu1 %1563  ;;  %v3933_v16 = vld [vmem:[#allocation4_spill] sm:$0xff] }
 0x34b   :  { %1826 = vst.msk [vmem:[%s3869_s5 + $0x140] sm:$0xff] %vm1785_vm1, %v1761_v41  ;;  %v1678_v61 = vmul.f32 0.6931472, %v2571_v48  ;;  %2580 = vlog2.f32 %v1564_v59  ;;  %v1562_v55 = vpop.xlane.xlu0 %1561  ;;  %v3934_v48 = vld [vmem:[#allocation3_spill] sm:$0xff] }
 0x34c   :  { %v1764_v0 = vsub.f32 %v3460_v63, %v1680_v25  ;;  %2582 = vlog2.f32 %v1562_v55 }
 0x34d   :  { %v2573_v18 = vpop.eup %2572  ;;  %v1763_v27 = vsub.f32 %v3456_v22, %v1678_v61 }
 0x34e   :  { %v2575_v20 = vpop.eup %2574  ;;  %1829 = vst.msk [vmem:[%s3869_s5 + $0x158] sm:$0xff] %vm1785_vm1, %v1764_v0  ;;  %v1684_v17 = vmul.f32 0.6931472, %v2573_v18  ;;  %v1568_v58 = vpop.xlane.xlu1 %1567 }
 0x34f   :  { %1828 = vst.msk [vmem:[%s3869_s5 + $0x150] sm:$0xff] %vm1785_vm1, %v1763_v27  ;;  %v1682_v44 = vmul.f32 0.6931472, %v2575_v20  ;;  %2584 = vlog2.f32 %v1568_v58  ;;  %v1566_v63 = vpop.xlane.xlu0 %1565  ;;  %v3935_v27 = vld [vmem:[#allocation6_spill] sm:$0xff]  ;;  %v3936_v58 = vld [vmem:[#allocation5_spill] sm:$0xff] }
 0x350   :  { %v1766_v54 = vsub.f32 %v3468_v7, %v1684_v17  ;;  %2586 = vlog2.f32 %v1566_v63 }
 0x351   :  { %v2577_v22 = vpop.eup %2576  ;;  %v1765_v34 = vsub.f32 %v3464_v26, %v1682_v44 }
 0x352   :  { %v2579_v35 = vpop.eup %2578  ;;  %1831 = vst.msk [vmem:[%s3869_s5 + $0x168] sm:$0xff] %vm1785_vm1, %v1766_v54  ;;  %v1688_v32 = vmul.f32 0.6931472, %v2577_v22  ;;  %v1572_v24 = vpop.xlane.xlu1 %1571 }
 0x353   :  { %1830 = vst.msk [vmem:[%s3869_s5 + $0x160] sm:$0xff] %vm1785_vm1, %v1765_v34  ;;  %v1686_v4 = vmul.f32 0.6931472, %v2579_v35  ;;  %2588 = vlog2.f32 %v1572_v24  ;;  %v1570_v7 = vpop.xlane.xlu0 %1569 }
 0x354   :  { %v1768_v62 = vsub.f32 %v3476_v15, %v1688_v32  ;;  %2590 = vlog2.f32 %v1570_v7  ;;  %v3937_v32 = vld [vmem:[#allocation7_spill] sm:$0xff] }
 0x355   :  { %v2581_v26 = vpop.eup %2580  ;;  %v1767_v49 = vsub.f32 %v3472_v31, %v1686_v4 }
 0x356   :  { %v2583_v21 = vpop.eup %2582  ;;  %1833 = vst.msk [vmem:[%s3869_s5 + $0x178] sm:$0xff] %vm1785_vm1, %v1768_v62  ;;  %v1692_v53 = vmul.f32 0.6931472, %v2581_v26  ;;  %v1576_v51 = vpop.xlane.xlu1 %1575 }
 0x357   :  { %1832 = vst.msk [vmem:[%s3869_s5 + $0x170] sm:$0xff] %vm1785_vm1, %v1767_v49  ;;  %v1690_v45 = vmul.f32 0.6931472, %v2583_v21  ;;  %2592 = vlog2.f32 %v1576_v51  ;;  %v1574_v15 = vpop.xlane.xlu0 %1573 }
 0x358   :  { %v1770_v28 = vsub.f32 %v3484_v23, %v1692_v53  ;;  %2594 = vlog2.f32 %v1574_v15  ;;  %v3938_v15 = vld [vmem:[#allocation8_spill] sm:$0xff] }
 0x359   :  { %v2585_v31 = vpop.eup %2584  ;;  %v1769_v9 = vsub.f32 %v3480_v37, %v1690_v45 }
 0x35a   :  { %v2587_v2 = vpop.eup %2586  ;;  %1835 = vst.msk [vmem:[%s3869_s5 + $0x188] sm:$0xff] %vm1785_vm1, %v1770_v28  ;;  %v1696_v42 = vmul.f32 0.6931472, %v2585_v31  ;;  %v1580_v8 = vpop.xlane.xlu1 %1579 }
 0x35b   :  { %1834 = vst.msk [vmem:[%s3869_s5 + $0x180] sm:$0xff] %vm1785_vm1, %v1769_v9  ;;  %v1694_v46 = vmul.f32 0.6931472, %v2587_v2  ;;  %2596 = vlog2.f32 %v1580_v8  ;;  %v1578_v23 = vpop.xlane.xlu0 %1577 }
 0x35c   :  { %v1772_v36 = vsub.f32 %v3929_v29, %v1696_v42  ;;  %2598 = vlog2.f32 %v1578_v23 }
 0x35d   :  { %v2589_v37 = vpop.eup %2588  ;;  %v1771_v52 = vsub.f32 %v3930_v33, %v1694_v46 }
 0x35e   :  { %v2591_v6 = vpop.eup %2590  ;;  %1837 = vst.msk [vmem:[%s3869_s5 + $0x198] sm:$0xff] %vm1785_vm1, %v1772_v36  ;;  %v1700_v39 = vmul.f32 0.6931472, %v2589_v37  ;;  %v1584_v38 = vpop.xlane.xlu1 %1583 }
 0x35f   :  { %1836 = vst.msk [vmem:[%s3869_s5 + $0x190] sm:$0xff] %vm1785_vm1, %v1771_v52  ;;  %v1698_v43 = vmul.f32 0.6931472, %v2591_v6  ;;  %2600 = vlog2.f32 %v1584_v38  ;;  %v1582_v12 = vpop.xlane.xlu0 %1581 }
 0x360   :  { %v1774_v40 = vsub.f32 %v3931_v30, %v1700_v39  ;;  %2602 = vlog2.f32 %v1582_v12 }
 0x361   :  { %v2593_v50 = vpop.eup %2592  ;;  %v1773_v3 = vsub.f32 %v3932_v10, %v1698_v43 }
 0x362   :  { %v2595_v60 = vpop.eup %2594  ;;  %1839 = vst.msk [vmem:[%s3869_s5 + $0x1a8] sm:$0xff] %vm1785_vm1, %v1774_v40  ;;  %v1704_v57 = vmul.f32 0.6931472, %v2593_v50  ;;  %v1588_v56 = vpop.xlane.xlu1 %1587 }
 0x363   :  { %1838 = vst.msk [vmem:[%s3869_s5 + $0x1a0] sm:$0xff] %vm1785_vm1, %v1773_v3  ;;  %v1702_v5 = vmul.f32 0.6931472, %v2595_v60  ;;  %2604 = vlog2.f32 %v1588_v56  ;;  %v1586_v47 = vpop.xlane.xlu0 %1585 }
 0x364   :  { %v1776_v14 = vsub.f32 %v3933_v16, %v1704_v57  ;;  %2606 = vlog2.f32 %v1586_v47 }
 0x365   :  { %v2597_v41 = vpop.eup %2596  ;;  %v1775_v25 = vsub.f32 %v3934_v48, %v1702_v5 }
 0x366   :  { %v2599_v59 = vpop.eup %2598  ;;  %1841 = vst.msk [vmem:[%s3869_s5 + $0x1b8] sm:$0xff] %vm1785_vm1, %v1776_v14  ;;  %v1708_v61 = vmul.f32 0.6931472, %v2597_v41  ;;  %v1592_v55 = vpop.xlane.xlu1 %1591 }
 0x367   :  { %1840 = vst.msk [vmem:[%s3869_s5 + $0x1b0] sm:$0xff] %vm1785_vm1, %v1775_v25  ;;  %v1706_v0 = vmul.f32 0.6931472, %v2599_v59  ;;  %2608 = vlog2.f32 %v1592_v55  ;;  %v1590_v18 = vpop.xlane.xlu0 %1589 }
 0x368   :  { %v1778_v20 = vsub.f32 %v3935_v27, %v1708_v61  ;;  %2610 = vlog2.f32 %v1590_v18 }
 0x369   :  { %v2601_v17 = vpop.eup %2600  ;;  %v1777_v44 = vsub.f32 %v3936_v58, %v1706_v0 }
 0x36a   :  { %v2603_v63 = vpop.eup %2602  ;;  %1843 = vst.msk [vmem:[%s3869_s5 + $0x1c8] sm:$0xff] %vm1785_vm1, %v1778_v20  ;;  %v1712_v54 = vmul.f32 0.6931472, %v2601_v17 }
 0x36b   :  { %1842 = vst.msk [vmem:[%s3869_s5 + $0x1c0] sm:$0xff] %vm1785_vm1, %v1777_v44  ;;  %v1710_v22 = vmul.f32 0.6931472, %v2603_v63 }
 0x36c   :  { %v1780_v34 = vsub.f32 %v3524_v11, %v1712_v54 }
 0x36d   :  { %v2605_v35 = vpop.eup %2604  ;;  %v1779_v24 = vsub.f32 %v3937_v32, %v1710_v22 }
 0x36e   :  { %v2607_v4 = vpop.eup %2606  ;;  %1845 = vst.msk [vmem:[%s3869_s5 + $0x1d8] sm:$0xff] %vm1785_vm1, %v1780_v34  ;;  %v1716_v7 = vmul.f32 0.6931472, %v2605_v35 }
 0x36f   :  { %1844 = vst.msk [vmem:[%s3869_s5 + $0x1d0] sm:$0xff] %vm1785_vm1, %v1779_v24  ;;  %v1714_v62 = vmul.f32 0.6931472, %v2607_v4 }
 0x370   :  { %v1782_v26 = vsub.f32 %v3532_v19, %v1716_v7 }
 0x371   :  { %v2609_v49 = vpop.eup %2608  ;;  %v1781_v11 = vsub.f32 %v3528_v13, %v1714_v62 }
 0x372   :  { %v2611_v21 = vpop.eup %2610  ;;  %1847 = vst.msk [vmem:[%s3869_s5 + $0x1e8] sm:$0xff] %vm1785_vm1, %v1782_v26  ;;  %v1720_v53 = vmul.f32 0.6931472, %v2609_v49 }
 0x373   :  { %1846 = vst.msk [vmem:[%s3869_s5 + $0x1e0] sm:$0xff] %vm1785_vm1, %v1781_v11  ;;  %v1718_v51 = vmul.f32 0.6931472, %v2611_v21 }
 0x374   :  { %v1784_v45 = vsub.f32 %v3540_v1, %v1720_v53 }
 0x375   :  { %v1783_v19 = vsub.f32 %v3938_v15, %v1718_v51 }
 0x376   :  { %1849 = vst.msk [vmem:[%s3869_s5 + $0x1f8] sm:$0xff] %vm1785_vm1, %v1784_v45 }
 0x377   :  { %1848 = vst.msk [vmem:[%s3869_s5 + $0x1f0] sm:$0xff] %vm1785_vm1, %v1783_v19 }

// kernel: tpu_custom_call.1
= control target key start
LH: loop header
LB: loop body
LE: loop exit
PB: predicated region body
PF: predicated region fallthrough
CT: control target
= control target key end

     0   :  { %vm95_vm0 = vcmask 261120   ;;  %vm1785_vm1 = vcmask 64512   ;;  %s3864_s1 = inlined_call_operand.vmem [shape: f32[32,128], index: 1, kind: input, shape index: {}]   ;;  %s3865_s0 = inlined_call_operand.vmem [shape: f32[512,32], index: 0, kind: input, shape index: {}]   ;;  %s3866_s3 = inlined_call_operand.vmem [shape: f32[128,128], index: 3, kind: input, shape index: {}]   ;;  %s3867_s2 = inlined_call_operand.vmem [shape: f32[1,128], index: 2, kind: input, shape index: {}]   ;;  %s3868_s4 = inlined_call_operand.vmem [shape: f32[1,128], index: 4, kind: input, shape index: {}]   ;;  %s3869_s5 = inlined_call_operand.vmem [shape: f32[512,8], index: 5, kind: output, shape index: {}]  }
   0x1   :  { %v84_v0 = vld [vmem:[%s3864_s1] sm:$0xff]  ;;  %v85_v1 = vld [vmem:[%s3864_s1 + $0x8] sm:$0xff]  ;;  %v86_v2 = vld [vmem:[%s3864_s1 + $0x10] sm:$0xff] }
   0x2   :  { %v2300_v3 = vpack.c.bf16 %v85_v1, %v84_v0  ;;  %v87_v4 = vld [vmem:[%s3864_s1 + $0x18] sm:$0xff]  ;;  %v20_v5 = vld [vmem:[%s3865_s0] sm:$0xff]  ;;  %v21_v7 = vld [vmem:[%s3865_s0 + $0x8] sm:$0xff] }
   0x3   :  { %v2304_v6 = vpack.c.bf16 %v87_v4, %v86_v2  ;;  %2076 = vmatprep.mubr.msk.f32.mxu0 %vm95_vm0, %v20_v5  ;;  %v22_v8 = vld [vmem:[%s3865_s0 + $0x10] sm:$0xff]  ;;  %v23_v9 = vld [vmem:[%s3865_s0 + $0x18] sm:$0xff]  ;;  %v24_v10 = vld [vmem:[%s3865_s0 + $0x20] sm:$0xff] }
   0x4   :  { %2301 = vmatprep.subr.bf16.mxu0 %v2300_v3  ;;  %v25_v11 = vld [vmem:[%s3865_s0 + $0x28] sm:$0xff]  ;;  %v737_v12 = vld [vmem:[%s3866_s3] sm:$0xff]  ;;  %v26_v13 = vld [vmem:[%s3865_s0 + $0x30] sm:$0xff] }
   0x5   :  { %2303 = vmatpush3.bf16.msra.mxu0 %v2300_v3  ;;  %v738_v14 = vld [vmem:[%s3866_s3 + $0x8] sm:$0xff]  ;;  %v27_v16 = vld [vmem:[%s3865_s0 + $0x38] sm:$0xff]  ;;  %v739_v17 = vld [vmem:[%s3866_s3 + $0x10] sm:$0xff] }
   0x6   :  { %2305 = vmatprep.subr.bf16.mxu0 %v2304_v6  ;;  %v2308_v15 = vpack.c.bf16 %v738_v14, %v737_v12  ;;  %v740_v18 = vld [vmem:[%s3866_s3 + $0x18] sm:$0xff]  ;;  %v28_v19 = vld [vmem:[%s3865_s0 + $0x40] sm:$0xff]  ;;  %v742_v22 = vld [vmem:[%s3866_s3 + $0x28] sm:$0xff] }
   0x7   :  { %v2312_v20 = vpack.c.bf16 %v740_v18, %v739_v17  ;;  %v741_v21 = vld [vmem:[%s3866_s3 + $0x20] sm:$0xff]  ;;  %v29_v23 = vld [vmem:[%s3865_s0 + $0x48] sm:$0xff]  ;;  %v743_v25 = vld [vmem:[%s3866_s3 + $0x30] sm:$0xff] }
   0x8   :  { %2340 = vmatprep.subr.bf16.mxu1 %v2308_v15  ;;  %v2316_v24 = vpack.c.bf16 %v742_v22, %v741_v21  ;;  %v30_v26 = vld [vmem:[%s3865_s0 + $0x50] sm:$0xff]  ;;  %v744_v27 = vld [vmem:[%s3866_s3 + $0x38] sm:$0xff]  ;;  %v745_v29 = vld [vmem:[%s3866_s3 + $0x40] sm:$0xff] }
   0x9   :  { %2307 = vmatpush3.bf16.msra.mxu0 %v2304_v6  ;;  %2348 = vmatpush3.bf16.msra.mxu1 %v2308_v15  ;;  %v2320_v28 = vpack.c.bf16 %v744_v27, %v743_v25  ;;  %v746_v30 = vld [vmem:[%s3866_s3 + $0x48] sm:$0xff]  ;;  %v31_v31 = vld [vmem:[%s3865_s0 + $0x58] sm:$0xff]  ;;  %v32_v32 = vld [vmem:[%s3865_s0 + $0x60] sm:$0xff] }
   0xa   :  { %2309 = vmatprep.subr.bf16.mxu0 %v2308_v15  ;;  %2341 = vmatprep.subr.bf16.mxu1 %v2312_v20  ;;  %v2324_v33 = vpack.c.bf16 %v746_v30, %v745_v29  ;;  %v747_v34 = vld [vmem:[%s3866_s3 + $0x50] sm:$0xff]  ;;  %v748_v35 = vld [vmem:[%s3866_s3 + $0x58] sm:$0xff]  ;;  %v33_v36 = vld [vmem:[%s3865_s0 + $0x68] sm:$0xff] }
   0xb   :  { %v34_v37 = vld [vmem:[%s3865_s0 + $0x70] sm:$0xff]  ;;  %v2328_v38 = vpack.c.bf16 %v748_v35, %v747_v34  ;;  %v749_v39 = vld [vmem:[%s3866_s3 + $0x60] sm:$0xff]  ;;  %v750_v40 = vld [vmem:[%s3866_s3 + $0x68] sm:$0xff] }
   0xc   :  { %2077 = vmatmul.mubr.msk.f32.vlgmr.msra.gmra.mrb[0].mxu0 %vm95_vm0, %v21_v7  ;;  %v35_v41 = vld [vmem:[%s3865_s0 + $0x78] sm:$0xff]  ;;  %v36_v42 = vld [vmem:[%s3865_s0 + $0x80] sm:$0xff]  ;;  %v2332_v43 = vpack.c.bf16 %v750_v40, %v749_v39  ;;  %v751_v44 = vld [vmem:[%s3866_s3 + $0x70] sm:$0xff] }
   0xd   :  { %2079 = vmatprep.mubr.msk.f32.mxu0 %vm95_vm0, %v22_v8  ;;  %2311 = vmatpush3.bf16.msra.mxu0 %v2308_v15  ;;  %v752_v45 = vld [vmem:[%s3866_s3 + $0x78] sm:$0xff]  ;;  %v37_v46 = vld [vmem:[%s3865_s0 + $0x88] sm:$0xff]  ;;  %v38_v47 = vld [vmem:[%s3865_s0 + $0x90] sm:$0xff] }
   0xe   :  { %2313 = vmatprep.subr.bf16.mxu0 %v2312_v20  ;;  %2349 = vmatpush3.bf16.msra.mxu1 %v2312_v20  ;;  %v2336_v48 = vpack.c.bf16 %v752_v45, %v751_v44  ;;  %v39_v49 = vld [vmem:[%s3865_s0 + $0x98] sm:$0xff]  ;;  %v40_v50 = vld [vmem:[%s3865_s0 + $0xa0] sm:$0xff]  ;;  %v41_v51 = vld [vmem:[%s3865_s0 + $0xa8] sm:$0xff] }
   0xf   :  { %2342 = vmatprep.subr.bf16.mxu1 %v2316_v24  ;;  %v42_v52 = vld [vmem:[%s3865_s0 + $0xb0] sm:$0xff]  ;;  %v43_v53 = vld [vmem:[%s3865_s0 + $0xb8] sm:$0xff]  ;;  %v44_v54 = vld [vmem:[%s3865_s0 + $0xc0] sm:$0xff] }
  0x10   :  { %2080 = vmatmul.mubr.msk.f32.gmra.mrb[2].mxu0 %vm95_vm0, %v23_v9  ;;  %v45_v55 = vld [vmem:[%s3865_s0 + $0xc8] sm:$0xff]  ;;  %v46_v56 = vld [vmem:[%s3865_s0 + $0xd0] sm:$0xff]  ;;  %v47_v57 = vld [vmem:[%s3865_s0 + $0xd8] sm:$0xff] }
  0x11   :  { %2082 = vmatprep.mubr.msk.f32.mxu0 %vm95_vm0, %v24_v10  ;;  %2315 = vmatpush3.bf16.msra.mxu0 %v2312_v20  ;;  %v48_v58 = vld [vmem:[%s3865_s0 + $0xe0] sm:$0xff]  ;;  %v49_v59 = vld [vmem:[%s3865_s0 + $0xe8] sm:$0xff]  ;;  %v50_v60 = vld [vmem:[%s3865_s0 + $0xf0] sm:$0xff] }
  0x12   :  { %2317 = vmatprep.subr.bf16.mxu0 %v2316_v24  ;;  %2350 = vmatpush3.bf16.msra.mxu1 %v2316_v24  ;;  %v51_v61 = vld [vmem:[%s3865_s0 + $0xf8] sm:$0xff]  ;;  %v52_v62 = vld [vmem:[%s3865_s0 + $0x100] sm:$0xff]  ;;  %v53_v63 = vld [vmem:[%s3865_s0 + $0x108] sm:$0xff] }
  0x13   :  { %2343 = vmatprep.subr.bf16.mxu1 %v2320_v28  ;;  %v54_v0 = vld [vmem:[%s3865_s0 + $0x110] sm:$0xff]  ;;  %v55_v1 = vld [vmem:[%s3865_s0 + $0x118] sm:$0xff]  ;;  %v56_v2 = vld [vmem:[%s3865_s0 + $0x120] sm:$0xff] }
  0x14   :  { %2083 = vmatmul.mubr.msk.f32.gmra.mrb[4].mxu0 %vm95_vm0, %v25_v11  ;;  %v57_v3 = vld [vmem:[%s3865_s0 + $0x128] sm:$0xff]  ;;  %v58_v4 = vld [vmem:[%s3865_s0 + $0x130] sm:$0xff]  ;;  %v59_v5 = vld [vmem:[%s3865_s0 + $0x138] sm:$0xff] }
  0x15   :  { %2085 = vmatprep.mubr.msk.f32.mxu0 %vm95_vm0, %v26_v13  ;;  %2319 = vmatpush3.bf16.msra.mxu0 %v2316_v24  ;;  %v60_v6 = vld [vmem:[%s3865_s0 + $0x140] sm:$0xff]  ;;  %v61_v7 = vld [vmem:[%s3865_s0 + $0x148] sm:$0xff]  ;;  %v62_v8 = vld [vmem:[%s3865_s0 + $0x150] sm:$0xff] }
  0x16   :  { %2321 = vmatprep.subr.bf16.mxu0 %v2320_v28  ;;  %2351 = vmatpush3.bf16.msra.mxu1 %v2320_v28  ;;  %v63_v9 = vld [vmem:[%s3865_s0 + $0x158] sm:$0xff]  ;;  %v64_v10 = vld [vmem:[%s3865_s0 + $0x160] sm:$0xff]  ;;  %v65_v11 = vld [vmem:[%s3865_s0 + $0x168] sm:$0xff] }
  0x17   :  { %2344 = vmatprep.subr.bf16.mxu1 %v2324_v33  ;;  %v66_v12 = vld [vmem:[%s3865_s0 + $0x170] sm:$0xff]  ;;  %v67_v13 = vld [vmem:[%s3865_s0 + $0x178] sm:$0xff]  ;;  %v68_v14 = vld [vmem:[%s3865_s0 + $0x180] sm:$0xff] }
  0x18   :  { %2086 = vmatmul.mubr.msk.f32.gmra.mrb[6].mxu0 %vm95_vm0, %v27_v16  ;;  %v69_v15 = vld [vmem:[%s3865_s0 + $0x188] sm:$0xff]  ;;  %v70_v16 = vld [vmem:[%s3865_s0 + $0x190] sm:$0xff]  ;;  %v71_v17 = vld [vmem:[%s3865_s0 + $0x198] sm:$0xff] }
  0x19   :  { %2088 = vmatprep.mubr.msk.f32.mxu0 %vm95_vm0, %v28_v19  ;;  %2323 = vmatpush3.bf16.msra.mxu0 %v2320_v28  ;;  %v72_v18 = vld [vmem:[%s3865_s0 + $0x1a0] sm:$0xff]  ;;  %v73_v19 = vld [vmem:[%s3865_s0 + $0x1a8] sm:$0xff]  ;;  %v74_v20 = vld [vmem:[%s3865_s0 + $0x1b0] sm:$0xff] }
  0x1a   :  { %2325 = vmatprep.subr.bf16.mxu0 %v2324_v33  ;;  %2352 = vmatpush3.bf16.msra.mxu1 %v2324_v33  ;;  %v75_v21 = vld [vmem:[%s3865_s0 + $0x1b8] sm:$0xff]  ;;  %v76_v22 = vld [vmem:[%s3865_s0 + $0x1c0] sm:$0xff]  ;;  %v78_v24 = vld [vmem:[%s3865_s0 + $0x1d0] sm:$0xff] }
  0x1b   :  { %2345 = vmatprep.subr.bf16.mxu1 %v2328_v38  ;;  %v79_v25 = vld [vmem:[%s3865_s0 + $0x1d8] sm:$0xff]  ;;  %v81_v27 = vld [vmem:[%s3865_s0 + $0x1e8] sm:$0xff]  ;;  %v82_v28 = vld [vmem:[%s3865_s0 + $0x1f0] sm:$0xff] }
  0x1c   :  { %2089 = vmatmul.mubr.msk.f32.gmra.mrb[8].mxu0 %vm95_vm0, %v29_v23  ;;  %v77_v23 = vld [vmem:[%s3865_s0 + $0x1c8] sm:$0xff]  ;;  %v83_v29 = vld [vmem:[%s3865_s0 + $0x1f8] sm:$0xff]  ;;  %v2961_v30 = vld [vmem:[%s3867_s2] ss:$0 sm:$0xff] }
  0x1d   :  { %2091 = vmatprep.mubr.msk.f32.mxu0 %vm95_vm0, %v30_v26  ;;  %2327 = vmatpush3.bf16.msra.mxu0 %v2324_v33  ;;  %v80_v26 = vld [vmem:[%s3865_s0 + $0x1e0] sm:$0xff] }
  0x1e   :  { %2329 = vmatprep.subr.bf16.mxu0 %v2328_v38  ;;  %2353 = vmatpush3.bf16.msra.mxu1 %v2328_v38 }
  0x1f   :  { %2346 = vmatprep.subr.bf16.mxu1 %v2332_v43 }
  0x20   :  { %2092 = vmatmul.mubr.msk.f32.gmra.mrb[10].mxu0 %vm95_vm0, %v31_v31 }
  0x21   :  { %2094 = vmatprep.mubr.msk.f32.mxu0 %vm95_vm0, %v32_v32  ;;  %2331 = vmatpush3.bf16.msra.mxu0 %v2328_v38 }
  0x22   :  { %2333 = vmatprep.subr.bf16.mxu0 %v2332_v43  ;;  %2354 = vmatpush3.bf16.msra.mxu1 %v2332_v43 }
  0x23   :  { %2347 = vmatprep.subr.bf16.mxu1 %v2336_v48 }
  0x24   :  { %2095 = vmatmul.mubr.msk.f32.gmra.mrb[12].mxu0 %vm95_vm0, %v33_v36 }
  0x25   :  { %2097 = vmatprep.mubr.msk.f32.mxu0 %vm95_vm0, %v34_v37  ;;  %2335 = vmatpush3.bf16.msra.mxu0 %v2332_v43 }
  0x26   :  { %2337 = vmatprep.subr.bf16.mxu0 %v2336_v48  ;;  %2355 = vmatpush3.bf16.msra.mxu1 %v2336_v48 }
  0x28   :  { %2098 = vmatmul.mubr.msk.f32.gmra.mrb[14].mxu0 %vm95_vm0, %v35_v41 }
  0x29   :  { %2100 = vmatprep.mubr.msk.f32.mxu0 %vm95_vm0, %v36_v42  ;;  %2339 = vmatpush3.bf16.msra.mxu0 %v2336_v48 }
  0x2c   :  { %2101 = vmatmul.mubr.msk.f32.gmra.mrb[16].mxu0 %vm95_vm0, %v37_v46 }
  0x2d   :  { %2103 = vmatprep.mubr.msk.f32.mxu0 %vm95_vm0, %v38_v47 }
  0x30   :  { %2104 = vmatmul.mubr.msk.f32.gmra.mrb[18].mxu0 %vm95_vm0, %v39_v49 }
  0x31   :  { %2106 = vmatprep.mubr.msk.f32.mxu0 %vm95_vm0, %v40_v50 }
  0x34   :  { %2107 = vmatmul.mubr.msk.f32.gmra.mrb[20].mxu0 %vm95_vm0, %v41_v51 }
  0x35   :  { %2109 = vmatprep.mubr.msk.f32.mxu0 %vm95_vm0, %v42_v52 }
  0x38   :  { %2110 = vmatmul.mubr.msk.f32.gmra.mrb[22].mxu0 %vm95_vm0, %v43_v53 }
  0x39   :  { %2112 = vmatprep.mubr.msk.f32.mxu0 %vm95_vm0, %v44_v54 }
  0x3c   :  { %2113 = vmatmul.mubr.msk.f32.gmra.mrb[24].mxu0 %vm95_vm0, %v45_v55 }
  0x3d   :  { %2115 = vmatprep.mubr.msk.f32.mxu0 %vm95_vm0, %v46_v56 }
  0x40   :  { %2116 = vmatmul.mubr.msk.f32.gmra.mrb[26].mxu0 %vm95_vm0, %v47_v57 }
  0x41   :  { %2118 = vmatprep.mubr.msk.f32.mxu0 %vm95_vm0, %v48_v58 }
  0x44   :  { %2119 = vmatmul.mubr.msk.f32.gmra.mrb[28].mxu0 %vm95_vm0, %v49_v59 }
  0x45   :  { %2121 = vmatprep.mubr.msk.f32.mxu0 %vm95_vm0, %v50_v60 }
  0x48   :  { %2122 = vmatmul.mubr.msk.f32.gmra.mrb[30].mxu0 %vm95_vm0, %v51_v61 }
  0x49   :  { %2124 = vmatprep.mubr.msk.f32.mxu0 %vm95_vm0, %v52_v62 }
  0x4c   :  { %2125 = vmatmul.mubr.msk.f32.gmra.mrb[32].mxu0 %vm95_vm0, %v53_v63 }
  0x4d   :  { %2127 = vmatprep.mubr.msk.f32.mxu0 %vm95_vm0, %v54_v0 }
  0x50   :  { %2128 = vmatmul.mubr.msk.f32.gmra.mrb[34].mxu0 %vm95_vm0, %v55_v1 }
  0x51   :  { %2130 = vmatprep.mubr.msk.f32.mxu0 %vm95_vm0, %v56_v2 }
  0x54   :  { %2131 = vmatmul.mubr.msk.f32.gmra.mrb[36].mxu0 %vm95_vm0, %v57_v3 }
  0x55   :  { %2133 = vmatprep.mubr.msk.f32.mxu0 %vm95_vm0, %v58_v4 }
  0x58   :  { %2134 = vmatmul.mubr.msk.f32.gmra.mrb[38].mxu0 %vm95_vm0, %v59_v5 }
  0x59   :  { %2136 = vmatprep.mubr.msk.f32.mxu0 %vm95_vm0, %v60_v6 }
  0x5c   :  { %2137 = vmatmul.mubr.msk.f32.gmra.mrb[40].mxu0 %vm95_vm0, %v61_v7 }
  0x5d   :  { %2139 = vmatprep.mubr.msk.f32.mxu0 %vm95_vm0, %v62_v8 }
  0x60   :  { %2140 = vmatmul.mubr.msk.f32.gmra.mrb[42].mxu0 %vm95_vm0, %v63_v9 }
  0x61   :  { %2142 = vmatprep.mubr.msk.f32.mxu0 %vm95_vm0, %v64_v10 }
  0x64   :  { %2143 = vmatmul.mubr.msk.f32.gmra.mrb[44].mxu0 %vm95_vm0, %v65_v11 }
  0x65   :  { %2145 = vmatprep.mubr.msk.f32.mxu0 %vm95_vm0, %v66_v12 }
  0x68   :  { %2146 = vmatmul.mubr.msk.f32.gmra.mrb[46].mxu0 %vm95_vm0, %v67_v13 }
  0x69   :  { %2148 = vmatprep.mubr.msk.f32.mxu0 %vm95_vm0, %v68_v14 }
  0x6c   :  { %2149 = vmatmul.mubr.msk.f32.gmra.mrb[48].mxu0 %vm95_vm0, %v69_v15 }
  0x6d   :  { %2151 = vmatprep.mubr.msk.f32.mxu0 %vm95_vm0, %v70_v16 }
  0x70   :  { %2152 = vmatmul.mubr.msk.f32.gmra.mrb[50].mxu0 %vm95_vm0, %v71_v17 }
  0x71   :  { %2154 = vmatprep.mubr.msk.f32.mxu0 %vm95_vm0, %v72_v18 }
  0x74   :  { %2155 = vmatmul.mubr.msk.f32.gmra.mrb[52].mxu0 %vm95_vm0, %v73_v19 }
  0x75   :  { %2157 = vmatprep.mubr.msk.f32.mxu0 %vm95_vm0, %v74_v20 }
  0x78   :  { %2158 = vmatmul.mubr.msk.f32.gmra.mrb[54].mxu0 %vm95_vm0, %v75_v21 }
  0x79   :  { %2160 = vmatprep.mubr.msk.f32.mxu0 %vm95_vm0, %v76_v22 }
  0x7c   :  { %2161 = vmatmul.mubr.msk.f32.gmra.mrb[56].mxu0 %vm95_vm0, %v77_v23 }
  0x7d   :  { %2163 = vmatprep.mubr.msk.f32.mxu0 %vm95_vm0, %v78_v24 }
  0x80   :  { %2164 = vmatmul.mubr.msk.f32.gmra.mrb[58].mxu0 %vm95_vm0, %v79_v25 }
  0x81   :  { %2166 = vmatprep.mubr.msk.f32.mxu0 %vm95_vm0, %v80_v26 }
  0x84   :  { %2167 = vmatmul.mubr.msk.f32.gmra.mrb[60].mxu0 %vm95_vm0, %v81_v27 }
  0x85   :  { %2169 = vmatprep.mubr.msk.f32.mxu0 %vm95_vm0, %v82_v28 }
  0x88   :  { %2170 = vmatmul.mubr.msk.f32.gmra.mrb[62].mxu0 %vm95_vm0, %v83_v29 }
  0xdf   :  { %v2078_v31 = vpop.f32.mrb[0].mxu0 }
  0xe0   :  { %v360_v32 = vadd.f32 %v2078_v31, %v2961_v30  ;;  %v354_v33 = vpop.f32.mrb[1].mxu0 }
  0xe1   :  { %v355_v34 = vadd.f32 %v2961_v30, %v354_v33 }
  0xe2   :  { %v674_v37 = vmax.f32 %v360_v32, 0.0 }
  0xe3   :  { %v673_v35 = vmax.f32 %v355_v34, 0.0  ;;  %v2081_v36 = vpop.f32.mrb[2].mxu0 }
  0xe4   :  { %v370_v38 = vadd.f32 %v2081_v36, %v2961_v30  ;;  %v364_v39 = vpop.f32.mrb[3].mxu0 }
  0xe5   :  { %v365_v40 = vadd.f32 %v2961_v30, %v364_v39  ;;  %2204 = vmatprep.mubr.f32.mxu0 %v673_v35 }
  0xe6   :  { %2205 = vmatmul.mubr.f32.vlgmr.msra.gmra.mrb[64].mxu0 %v674_v37  ;;  %v676_v43 = vmax.f32 %v370_v38, 0.0 }
  0xe7   :  { %v675_v41 = vmax.f32 %v365_v40, 0.0  ;;  %v2084_v42 = vpop.f32.mrb[4].mxu0 }
  0xe8   :  { %v380_v44 = vadd.f32 %v2084_v42, %v2961_v30  ;;  %v374_v45 = vpop.f32.mrb[5].mxu0 }
  0xe9   :  { %v375_v46 = vadd.f32 %v2961_v30, %v374_v45  ;;  %2207 = vmatprep.mubr.f32.mxu0 %v675_v41 }
  0xea   :  { %v678_v47 = vmax.f32 %v380_v44, 0.0  ;;  %2208 = vmatmul.mubr.f32.gmra.mrb[66].mxu0 %v676_v43 }
  0xeb   :  { %v677_v48 = vmax.f32 %v375_v46, 0.0  ;;  %v2087_v49 = vpop.f32.mrb[6].mxu0 }
  0xec   :  { %v390_v50 = vadd.f32 %v2087_v49, %v2961_v30  ;;  %v384_v51 = vpop.f32.mrb[7].mxu0 }
  0xed   :  { %2210 = vmatprep.mubr.f32.mxu0 %v677_v48  ;;  %v385_v52 = vadd.f32 %v2961_v30, %v384_v51 }
  0xee   :  { %v680_v53 = vmax.f32 %v390_v50, 0.0  ;;  %2211 = vmatmul.mubr.f32.gmra.mrb[68].mxu0 %v678_v47 }
  0xef   :  { %v2090_v54 = vpop.f32.mrb[8].mxu0  ;;  %v679_v55 = vmax.f32 %v385_v52, 0.0 }
  0xf0   :  { %v400_v56 = vadd.f32 %v2090_v54, %v2961_v30  ;;  %v394_v57 = vpop.f32.mrb[9].mxu0 }
  0xf1   :  { %v395_v58 = vadd.f32 %v2961_v30, %v394_v57  ;;  %2213 = vmatprep.mubr.f32.mxu1 %v679_v55 }
  0xf2   :  { %v682_v59 = vmax.f32 %v400_v56, 0.0  ;;  %2214 = vmatmul.mubr.f32.vlgmr.msra.gmra.mrb[0].mxu1 %v680_v53 }
  0xf3   :  { %v681_v60 = vmax.f32 %v395_v58, 0.0  ;;  %v2093_v61 = vpop.f32.mrb[10].mxu0 }
  0xf4   :  { %v410_v62 = vadd.f32 %v2093_v61, %v2961_v30  ;;  %v404_v63 = vpop.f32.mrb[11].mxu0 }
  0xf5   :  { %v405_v0 = vadd.f32 %v2961_v30, %v404_v63  ;;  %2216 = vmatprep.mubr.f32.mxu1 %v681_v60 }
  0xf6   :  { %v684_v1 = vmax.f32 %v410_v62, 0.0  ;;  %2217 = vmatmul.mubr.f32.gmra.mrb[2].mxu1 %v682_v59 }
  0xf7   :  { %v683_v2 = vmax.f32 %v405_v0, 0.0  ;;  %v2096_v3 = vpop.f32.mrb[12].mxu0 }
  0xf8   :  { %v420_v4 = vadd.f32 %v2096_v3, %v2961_v30  ;;  %v414_v5 = vpop.f32.mrb[13].mxu0 }
  0xf9   :  { %v415_v6 = vadd.f32 %v2961_v30, %v414_v5  ;;  %2219 = vmatprep.mubr.f32.mxu1 %v683_v2 }
  0xfa   :  { %v686_v7 = vmax.f32 %v420_v4, 0.0  ;;  %2220 = vmatmul.mubr.f32.gmra.mrb[4].mxu1 %v684_v1 }
  0xfb   :  { %v685_v8 = vmax.f32 %v415_v6, 0.0  ;;  %v2099_v9 = vpop.f32.mrb[14].mxu0 }
  0xfc   :  { %v430_v10 = vadd.f32 %v2099_v9, %v2961_v30  ;;  %v424_v11 = vpop.f32.mrb[15].mxu0 }
  0xfd   :  { %v425_v12 = vadd.f32 %v2961_v30, %v424_v11  ;;  %2222 = vmatprep.mubr.f32.mxu1 %v685_v8 }
  0xfe   :  { %v688_v13 = vmax.f32 %v430_v10, 0.0  ;;  %2223 = vmatmul.mubr.f32.gmra.mrb[6].mxu1 %v686_v7 }
  0xff   :  { %v687_v14 = vmax.f32 %v425_v12, 0.0  ;;  %v2102_v15 = vpop.f32.mrb[16].mxu0 }
 0x100   :  { %v440_v16 = vadd.f32 %v2102_v15, %v2961_v30  ;;  %v434_v17 = vpop.f32.mrb[17].mxu0 }
 0x101   :  { %v435_v18 = vadd.f32 %v2961_v30, %v434_v17  ;;  %2225 = vmatprep.mubr.f32.mxu1 %v687_v14 }
 0x102   :  { %v690_v19 = vmax.f32 %v440_v16, 0.0  ;;  %2226 = vmatmul.mubr.f32.gmra.mrb[8].mxu1 %v688_v13 }
 0x103   :  { %v689_v20 = vmax.f32 %v435_v18, 0.0  ;;  %v2105_v21 = vpop.f32.mrb[18].mxu0 }
 0x104   :  { %v450_v22 = vadd.f32 %v2105_v21, %v2961_v30  ;;  %v444_v23 = vpop.f32.mrb[19].mxu0 }
 0x105   :  { %v445_v24 = vadd.f32 %v2961_v30, %v444_v23  ;;  %2228 = vmatprep.mubr.f32.mxu1 %v689_v20 }
 0x106   :  { %v692_v25 = vmax.f32 %v450_v22, 0.0  ;;  %2229 = vmatmul.mubr.f32.gmra.mrb[10].mxu1 %v690_v19 }
 0x107   :  { %v691_v26 = vmax.f32 %v445_v24, 0.0  ;;  %v2108_v27 = vpop.f32.mrb[20].mxu0 }
 0x108   :  { %v460_v28 = vadd.f32 %v2108_v27, %v2961_v30  ;;  %v454_v29 = vpop.f32.mrb[21].mxu0 }
 0x109   :  { %v455_v31 = vadd.f32 %v2961_v30, %v454_v29  ;;  %2231 = vmatprep.mubr.f32.mxu1 %v691_v26 }
 0x10a   :  { %v694_v32 = vmax.f32 %v460_v28, 0.0  ;;  %2232 = vmatmul.mubr.f32.gmra.mrb[12].mxu1 %v692_v25 }
 0x10b   :  { %v693_v33 = vmax.f32 %v455_v31, 0.0  ;;  %v2111_v34 = vpop.f32.mrb[22].mxu0 }
 0x10c   :  { %v470_v35 = vadd.f32 %v2111_v34, %v2961_v30  ;;  %v464_v36 = vpop.f32.mrb[23].mxu0 }
 0x10d   :  { %v465_v37 = vadd.f32 %v2961_v30, %v464_v36  ;;  %2234 = vmatprep.mubr.f32.mxu1 %v693_v33 }
 0x10e   :  { %v696_v38 = vmax.f32 %v470_v35, 0.0  ;;  %2235 = vmatmul.mubr.f32.gmra.mrb[14].mxu1 %v694_v32 }
 0x10f   :  { %v695_v39 = vmax.f32 %v465_v37, 0.0  ;;  %v2114_v40 = vpop.f32.mrb[24].mxu0 }
 0x110   :  { %v480_v41 = vadd.f32 %v2114_v40, %v2961_v30  ;;  %v474_v42 = vpop.f32.mrb[25].mxu0 }
 0x111   :  { %v475_v43 = vadd.f32 %v2961_v30, %v474_v42  ;;  %2237 = vmatprep.mubr.f32.mxu1 %v695_v39 }
 0x112   :  { %v698_v44 = vmax.f32 %v480_v41, 0.0  ;;  %2238 = vmatmul.mubr.f32.gmra.mrb[16].mxu1 %v696_v38 }
 0x113   :  { %v697_v45 = vmax.f32 %v475_v43, 0.0  ;;  %v2117_v46 = vpop.f32.mrb[26].mxu0 }
 0x114   :  { %v490_v47 = vadd.f32 %v2117_v46, %v2961_v30  ;;  %v484_v48 = vpop.f32.mrb[27].mxu0 }
 0x115   :  { %v485_v49 = vadd.f32 %v2961_v30, %v484_v48  ;;  %2240 = vmatprep.mubr.f32.mxu1 %v697_v45 }
 0x116   :  { %v700_v50 = vmax.f32 %v490_v47, 0.0  ;;  %2241 = vmatmul.mubr.f32.gmra.mrb[18].mxu1 %v698_v44 }
 0x117   :  { %v699_v51 = vmax.f32 %v485_v49, 0.0  ;;  %v2120_v52 = vpop.f32.mrb[28].mxu0 }
 0x118   :  { %v500_v53 = vadd.f32 %v2120_v52, %v2961_v30  ;;  %v494_v54 = vpop.f32.mrb[29].mxu0 }
 0x119   :  { %v495_v55 = vadd.f32 %v2961_v30, %v494_v54  ;;  %2243 = vmatprep.mubr.f32.mxu1 %v699_v51 }
 0x11a   :  { %v702_v56 = vmax.f32 %v500_v53, 0.0  ;;  %2244 = vmatmul.mubr.f32.gmra.mrb[20].mxu1 %v700_v50 }
 0x11b   :  { %v701_v57 = vmax.f32 %v495_v55, 0.0  ;;  %v2123_v58 = vpop.f32.mrb[30].mxu0 }
 0x11c   :  { %v510_v59 = vadd.f32 %v2123_v58, %v2961_v30  ;;  %v504_v60 = vpop.f32.mrb[31].mxu0 }
 0x11d   :  { %v505_v61 = vadd.f32 %v2961_v30, %v504_v60  ;;  %2246 = vmatprep.mubr.f32.mxu1 %v701_v57 }
 0x11e   :  { %v704_v62 = vmax.f32 %v510_v59, 0.0  ;;  %2247 = vmatmul.mubr.f32.gmra.mrb[22].mxu1 %v702_v56 }
 0x11f   :  { %v703_v63 = vmax.f32 %v505_v61, 0.0  ;;  %v2126_v0 = vpop.f32.mrb[32].mxu0 }
 0x120   :  { %v520_v1 = vadd.f32 %v2126_v0, %v2961_v30  ;;  %v514_v2 = vpop.f32.mrb[33].mxu0 }
 0x121   :  { %v515_v3 = vadd.f32 %v2961_v30, %v514_v2  ;;  %2249 = vmatprep.mubr.f32.mxu1 %v703_v63 }
 0x122   :  { %v706_v4 = vmax.f32 %v520_v1, 0.0  ;;  %2250 = vmatmul.mubr.f32.gmra.mrb[24].mxu1 %v704_v62 }
 0x123   :  { %v705_v5 = vmax.f32 %v515_v3, 0.0  ;;  %v2129_v6 = vpop.f32.mrb[34].mxu0 }
 0x124   :  { %v530_v7 = vadd.f32 %v2129_v6, %v2961_v30  ;;  %v524_v8 = vpop.f32.mrb[35].mxu0 }
 0x125   :  { %v525_v9 = vadd.f32 %v2961_v30, %v524_v8  ;;  %2252 = vmatprep.mubr.f32.mxu1 %v705_v5 }
 0x126   :  { %v708_v10 = vmax.f32 %v530_v7, 0.0  ;;  %2253 = vmatmul.mubr.f32.gmra.mrb[26].mxu1 %v706_v4 }
 0x127   :  { %v707_v11 = vmax.f32 %v525_v9, 0.0  ;;  %v2132_v12 = vpop.f32.mrb[36].mxu0 }
 0x128   :  { %v540_v13 = vadd.f32 %v2132_v12, %v2961_v30  ;;  %v534_v14 = vpop.f32.mrb[37].mxu0 }
 0x129   :  { %v535_v15 = vadd.f32 %v2961_v30, %v534_v14  ;;  %2255 = vmatprep.mubr.f32.mxu1 %v707_v11 }
 0x12a   :  { %v710_v16 = vmax.f32 %v540_v13, 0.0  ;;  %2256 = vmatmul.mubr.f32.gmra.mrb[28].mxu1 %v708_v10 }
 0x12b   :  { %v709_v17 = vmax.f32 %v535_v15, 0.0  ;;  %v2135_v18 = vpop.f32.mrb[38].mxu0 }
 0x12c   :  { %v550_v19 = vadd.f32 %v2135_v18, %v2961_v30  ;;  %v544_v20 = vpop.f32.mrb[39].mxu0 }
 0x12d   :  { %v545_v21 = vadd.f32 %v2961_v30, %v544_v20  ;;  %2258 = vmatprep.mubr.f32.mxu1 %v709_v17 }
 0x12e   :  { %v712_v22 = vmax.f32 %v550_v19, 0.0  ;;  %2259 = vmatmul.mubr.f32.gmra.mrb[30].mxu1 %v710_v16 }
 0x12f   :  { %v711_v23 = vmax.f32 %v545_v21, 0.0  ;;  %v2138_v24 = vpop.f32.mrb[40].mxu0 }
 0x130   :  { %v560_v25 = vadd.f32 %v2138_v24, %v2961_v30  ;;  %v554_v26 = vpop.f32.mrb[41].mxu0 }
 0x131   :  { %v555_v27 = vadd.f32 %v2961_v30, %v554_v26  ;;  %2261 = vmatprep.mubr.f32.mxu1 %v711_v23 }
 0x132   :  { %v714_v28 = vmax.f32 %v560_v25, 0.0  ;;  %2262 = vmatmul.mubr.f32.gmra.mrb[32].mxu1 %v712_v22 }
 0x133   :  { %v713_v29 = vmax.f32 %v555_v27, 0.0  ;;  %v2141_v31 = vpop.f32.mrb[42].mxu0 }
 0x134   :  { %v570_v32 = vadd.f32 %v2141_v31, %v2961_v30  ;;  %v564_v33 = vpop.f32.mrb[43].mxu0 }
 0x135   :  { %v565_v34 = vadd.f32 %v2961_v30, %v564_v33  ;;  %2264 = vmatprep.mubr.f32.mxu1 %v713_v29 }
 0x136   :  { %v716_v35 = vmax.f32 %v570_v32, 0.0  ;;  %2265 = vmatmul.mubr.f32.gmra.mrb[34].mxu1 %v714_v28 }
 0x137   :  { %v715_v36 = vmax.f32 %v565_v34, 0.0  ;;  %v2144_v37 = vpop.f32.mrb[44].mxu0  ;;  %v3030_v34 = vld [vmem:[%s3868_s4] ss:$0 sm:$0xff] }
 0x138   :  { %v580_v38 = vadd.f32 %v2144_v37, %v2961_v30  ;;  %v574_v39 = vpop.f32.mrb[45].mxu0 }
 0x139   :  { %v575_v40 = vadd.f32 %v2961_v30, %v574_v39  ;;  %2267 = vmatprep.mubr.f32.mxu1 %v715_v36 }
 0x13a   :  { %v718_v41 = vmax.f32 %v580_v38, 0.0  ;;  %2268 = vmatmul.mubr.f32.gmra.mrb[36].mxu1 %v716_v35 }
 0x13b   :  { %v717_v42 = vmax.f32 %v575_v40, 0.0  ;;  %v2147_v43 = vpop.f32.mrb[46].mxu0 }
 0x13c   :  { %v590_v44 = vadd.f32 %v2147_v43, %v2961_v30  ;;  %v584_v45 = vpop.f32.mrb[47].mxu0 }
 0x13d   :  { %v585_v46 = vadd.f32 %v2961_v30, %v584_v45  ;;  %2270 = vmatprep.mubr.f32.mxu1 %v717_v42 }
 0x13e   :  { %v720_v47 = vmax.f32 %v590_v44, 0.0  ;;  %2271 = vmatmul.mubr.f32.gmra.mrb[38].mxu1 %v718_v41 }
 0x13f   :  { %v719_v48 = vmax.f32 %v585_v46, 0.0  ;;  %v2150_v49 = vpop.f32.mrb[48].mxu0 }
 0x140   :  { %v600_v50 = vadd.f32 %v2150_v49, %v2961_v30  ;;  %v594_v51 = vpop.f32.mrb[49].mxu0 }
 0x141   :  { %v595_v52 = vadd.f32 %v2961_v30, %v594_v51  ;;  %2273 = vmatprep.mubr.f32.mxu1 %v719_v48 }
 0x142   :  { %v722_v53 = vmax.f32 %v600_v50, 0.0  ;;  %2274 = vmatmul.mubr.f32.gmra.mrb[40].mxu1 %v720_v47 }
 0x143   :  { %v721_v54 = vmax.f32 %v595_v52, 0.0  ;;  %v2153_v55 = vpop.f32.mrb[50].mxu0 }
 0x144   :  { %v610_v56 = vadd.f32 %v2153_v55, %v2961_v30  ;;  %v604_v57 = vpop.f32.mrb[51].mxu0 }
 0x145   :  { %v605_v58 = vadd.f32 %v2961_v30, %v604_v57  ;;  %2276 = vmatprep.mubr.f32.mxu1 %v721_v54 }
 0x146   :  { %v724_v59 = vmax.f32 %v610_v56, 0.0  ;;  %2277 = vmatmul.mubr.f32.gmra.mrb[42].mxu1 %v722_v53 }
 0x147   :  { %v723_v60 = vmax.f32 %v605_v58, 0.0  ;;  %v2156_v61 = vpop.f32.mrb[52].mxu0 }
 0x148   :  { %v620_v62 = vadd.f32 %v2156_v61, %v2961_v30  ;;  %v614_v63 = vpop.f32.mrb[53].mxu0 }
 0x149   :  { %v615_v0 = vadd.f32 %v2961_v30, %v614_v63  ;;  %2279 = vmatprep.mubr.f32.mxu1 %v723_v60 }
 0x14a   :  { %v726_v1 = vmax.f32 %v620_v62, 0.0  ;;  %2280 = vmatmul.mubr.f32.gmra.mrb[44].mxu1 %v724_v59 }
 0x14b   :  { %v725_v2 = vmax.f32 %v615_v0, 0.0  ;;  %v2159_v3 = vpop.f32.mrb[54].mxu0 }
 0x14c   :  { %v630_v4 = vadd.f32 %v2159_v3, %v2961_v30  ;;  %v624_v5 = vpop.f32.mrb[55].mxu0 }
 0x14d   :  { %v625_v6 = vadd.f32 %v2961_v30, %v624_v5  ;;  %2282 = vmatprep.mubr.f32.mxu1 %v725_v2 }
 0x14e   :  { %v728_v7 = vmax.f32 %v630_v4, 0.0  ;;  %2283 = vmatmul.mubr.f32.gmra.mrb[46].mxu1 %v726_v1 }
 0x14f   :  { %v727_v8 = vmax.f32 %v625_v6, 0.0  ;;  %v2162_v9 = vpop.f32.mrb[56].mxu0 }
 0x150   :  { %v640_v10 = vadd.f32 %v2162_v9, %v2961_v30  ;;  %v634_v11 = vpop.f32.mrb[57].mxu0 }
 0x151   :  { %v635_v12 = vadd.f32 %v2961_v30, %v634_v11  ;;  %2285 = vmatprep.mubr.f32.mxu1 %v727_v8 }
 0x152   :  { %v730_v13 = vmax.f32 %v640_v10, 0.0  ;;  %2286 = vmatmul.mubr.f32.gmra.mrb[48].mxu1 %v728_v7 }
 0x153   :  { %v729_v14 = vmax.f32 %v635_v12, 0.0  ;;  %v2165_v15 = vpop.f32.mrb[58].mxu0 }
 0x154   :  { %v650_v16 = vadd.f32 %v2165_v15, %v2961_v30  ;;  %v644_v17 = vpop.f32.mrb[59].mxu0 }
 0x155   :  { %v645_v18 = vadd.f32 %v2961_v30, %v644_v17  ;;  %2288 = vmatprep.mubr.f32.mxu1 %v729_v14 }
 0x156   :  { %v732_v19 = vmax.f32 %v650_v16, 0.0  ;;  %2289 = vmatmul.mubr.f32.gmra.mrb[50].mxu1 %v730_v13 }
 0x157   :  { %v731_v20 = vmax.f32 %v645_v18, 0.0  ;;  %v2168_v21 = vpop.f32.mrb[60].mxu0 }
 0x158   :  { %v660_v22 = vadd.f32 %v2168_v21, %v2961_v30  ;;  %v654_v23 = vpop.f32.mrb[61].mxu0 }
 0x159   :  { %v655_v24 = vadd.f32 %v2961_v30, %v654_v23  ;;  %2291 = vmatprep.mubr.f32.mxu1 %v731_v20 }
 0x15a   :  { %v734_v25 = vmax.f32 %v660_v22, 0.0  ;;  %2292 = vmatmul.mubr.f32.gmra.mrb[52].mxu1 %v732_v19 }
 0x15b   :  { %v733_v26 = vmax.f32 %v655_v24, 0.0  ;;  %v2171_v27 = vpop.f32.mrb[62].mxu0 }
 0x15c   :  { %v670_v28 = vadd.f32 %v2171_v27, %v2961_v30  ;;  %v664_v29 = vpop.f32.mrb[63].mxu0 }
 0x15d   :  { %v665_v31 = vadd.f32 %v2961_v30, %v664_v29  ;;  %2294 = vmatprep.mubr.f32.mxu1 %v733_v26 }
 0x15e   :  { %v736_v32 = vmax.f32 %v670_v28, 0.0  ;;  %2295 = vmatmul.mubr.f32.gmra.mrb[54].mxu1 %v734_v25 }
 0x15f   :  { %v735_v33 = vmax.f32 %v665_v31, 0.0 }
 0x161   :  { %2297 = vmatprep.mubr.f32.mxu1 %v735_v33 }
 0x162   :  { %2298 = vmatmul.mubr.f32.gmra.mrb[56].mxu1 %v736_v32 }
 0x1b9   :  { %v2206_v35 = vpop.f32.mrb[64].mxu0 }
 0x1ba   :  { %v3033_v36 = vadd.f32 %v2206_v35, %v3030_v34  ;;  %v826_v37 = vpop.f32.mrb[65].mxu0 }
 0x1bb   :  { %v3037_v30 = vadd.f32 %v3030_v34, %v826_v37 }
 0x1bc   :  { %1147 = vmax.xlane.f32.xlu0 %v3033_v36 }
 0x1bd   :  { %v2209_v38 = vpop.f32.mrb[66].mxu0 }
 0x1be   :  { %v3040_v39 = vadd.f32 %v2209_v38, %v3030_v34  ;;  %v836_v40 = vpop.f32.mrb[67].mxu0 }
 0x1bf   :  { %v3045_v42 = vadd.f32 %v3030_v34, %v836_v40 }
 0x1c0   :  { %1151 = vmax.xlane.f32.xlu1 %v3040_v39  ;;  %1145 = vmax.xlane.f32.xlu0 %v3037_v30 }
 0x1c1   :  { %v2212_v41 = vpop.f32.mrb[68].mxu0 }
 0x1c2   :  { %v846_v43 = vpop.f32.mrb[69].mxu0  ;;  %v3053_v46 = vadd.f32 %v2212_v41, %v3030_v34 }
 0x1c3   :  { %v3048_v44 = vadd.f32 %v3030_v34, %v846_v43 }
 0x1c4   :  { %1149 = vmax.xlane.f32.xlu1 %v3045_v42 }
 0x1c5   :  { %v2215_v45 = vpop.f32.mrb[0].mxu1  ;;  %1153 = vmax.xlane.f32.xlu0 %v3048_v44 }
 0x1c6   :  { %v856_v47 = vpop.f32.mrb[1].mxu1  ;;  %v3061_v50 = vadd.f32 %v2215_v45, %v3030_v34 }
 0x1c7   :  { %v3056_v48 = vadd.f32 %v3030_v34, %v856_v47 }
 0x1c8   :  { %1155 = vmax.xlane.f32.xlu1 %v3053_v46 }
 0x1c9   :  { %v2218_v49 = vpop.f32.mrb[2].mxu1  ;;  %1157 = vmax.xlane.f32.xlu0 %v3056_v48 }
 0x1ca   :  { %v866_v51 = vpop.f32.mrb[3].mxu1  ;;  %v3069_v54 = vadd.f32 %v2218_v49, %v3030_v34 }
 0x1cb   :  { %v3064_v52 = vadd.f32 %v3030_v34, %v866_v51 }
 0x1cc   :  { %1159 = vmax.xlane.f32.xlu1 %v3061_v50 }
 0x1cd   :  { %v2221_v53 = vpop.f32.mrb[4].mxu1  ;;  %1161 = vmax.xlane.f32.xlu0 %v3064_v52 }
 0x1ce   :  { %v876_v55 = vpop.f32.mrb[5].mxu1  ;;  %v3077_v58 = vadd.f32 %v2221_v53, %v3030_v34 }
 0x1cf   :  { %v3072_v56 = vadd.f32 %v3030_v34, %v876_v55 }
 0x1d0   :  { %1163 = vmax.xlane.f32.xlu1 %v3069_v54 }
 0x1d1   :  { %v2224_v57 = vpop.f32.mrb[6].mxu1  ;;  %1165 = vmax.xlane.f32.xlu0 %v3072_v56 }
 0x1d2   :  { %v886_v59 = vpop.f32.mrb[7].mxu1  ;;  %v3085_v62 = vadd.f32 %v2224_v57, %v3030_v34 }
 0x1d3   :  { %v3080_v60 = vadd.f32 %v3030_v34, %v886_v59 }
 0x1d4   :  { %1167 = vmax.xlane.f32.xlu1 %v3077_v58 }
 0x1d5   :  { %v2227_v61 = vpop.f32.mrb[8].mxu1  ;;  %1169 = vmax.xlane.f32.xlu0 %v3080_v60 }
 0x1d6   :  { %v896_v63 = vpop.f32.mrb[9].mxu1  ;;  %v3093_v2 = vadd.f32 %v2227_v61, %v3030_v34 }
 0x1d7   :  { %v3088_v0 = vadd.f32 %v3030_v34, %v896_v63 }
 0x1d8   :  { %1171 = vmax.xlane.f32.xlu1 %v3085_v62 }
 0x1d9   :  { %v2230_v1 = vpop.f32.mrb[10].mxu1  ;;  %1173 = vmax.xlane.f32.xlu0 %v3088_v0 }
 0x1da   :  { %v906_v3 = vpop.f32.mrb[11].mxu1  ;;  %v3101_v6 = vadd.f32 %v2230_v1, %v3030_v34 }
 0x1db   :  { %v3096_v4 = vadd.f32 %v3030_v34, %v906_v3 }
 0x1dc   :  { %1175 = vmax.xlane.f32.xlu1 %v3093_v2 }
 0x1dd   :  { %v2233_v5 = vpop.f32.mrb[12].mxu1  ;;  %1177 = vmax.xlane.f32.xlu0 %v3096_v4 }
 0x1de   :  { %v916_v7 = vpop.f32.mrb[13].mxu1  ;;  %v3109_v10 = vadd.f32 %v2233_v5, %v3030_v34 }
 0x1df   :  { %v3104_v8 = vadd.f32 %v3030_v34, %v916_v7 }
 0x1e0   :  { %1179 = vmax.xlane.f32.xlu1 %v3101_v6 }
 0x1e1   :  { %v2236_v9 = vpop.f32.mrb[14].mxu1  ;;  %1181 = vmax.xlane.f32.xlu0 %v3104_v8 }
 0x1e2   :  { %v926_v11 = vpop.f32.mrb[15].mxu1  ;;  %v3117_v14 = vadd.f32 %v2236_v9, %v3030_v34 }
 0x1e3   :  { %v3112_v12 = vadd.f32 %v3030_v34, %v926_v11 }
 0x1e4   :  { %1183 = vmax.xlane.f32.xlu1 %v3109_v10 }
 0x1e5   :  { %v2239_v13 = vpop.f32.mrb[16].mxu1  ;;  %1185 = vmax.xlane.f32.xlu0 %v3112_v12 }
 0x1e6   :  { %v936_v15 = vpop.f32.mrb[17].mxu1  ;;  %v3125_v18 = vadd.f32 %v2239_v13, %v3030_v34 }
 0x1e7   :  { %v3120_v16 = vadd.f32 %v3030_v34, %v936_v15 }
 0x1e8   :  { %1187 = vmax.xlane.f32.xlu1 %v3117_v14 }
 0x1e9   :  { %v2242_v17 = vpop.f32.mrb[18].mxu1  ;;  %1189 = vmax.xlane.f32.xlu0 %v3120_v16 }
 0x1ea   :  { %v946_v19 = vpop.f32.mrb[19].mxu1  ;;  %v3133_v22 = vadd.f32 %v2242_v17, %v3030_v34 }
 0x1eb   :  { %v3128_v20 = vadd.f32 %v3030_v34, %v946_v19 }
 0x1ec   :  { %1191 = vmax.xlane.f32.xlu1 %v3125_v18 }
 0x1ed   :  { %v2245_v21 = vpop.f32.mrb[20].mxu1  ;;  %1193 = vmax.xlane.f32.xlu0 %v3128_v20 }
 0x1ee   :  { %v956_v23 = vpop.f32.mrb[21].mxu1  ;;  %v3141_v26 = vadd.f32 %v2245_v21, %v3030_v34 }
 0x1ef   :  { %v3136_v24 = vadd.f32 %v3030_v34, %v956_v23 }
 0x1f0   :  { %1195 = vmax.xlane.f32.xlu1 %v3133_v22 }
 0x1f1   :  { %v2248_v25 = vpop.f32.mrb[22].mxu1  ;;  %1197 = vmax.xlane.f32.xlu0 %v3136_v24 }
 0x1f2   :  { %v966_v27 = vpop.f32.mrb[23].mxu1  ;;  %v3149_v31 = vadd.f32 %v2248_v25, %v3030_v34 }
 0x1f3   :  { %v3144_v28 = vadd.f32 %v3030_v34, %v966_v27 }
 0x1f4   :  { %1199 = vmax.xlane.f32.xlu1 %v3141_v26 }
 0x1f5   :  { %v2251_v29 = vpop.f32.mrb[24].mxu1  ;;  %1201 = vmax.xlane.f32.xlu0 %v3144_v28 }
 0x1f6   :  { %v976_v32 = vpop.f32.mrb[25].mxu1  ;;  %v3157_v37 = vadd.f32 %v2251_v29, %v3030_v34 }
 0x1f7   :  { %v3152_v33 = vadd.f32 %v3030_v34, %v976_v32 }
 0x1f8   :  { %1203 = vmax.xlane.f32.xlu1 %v3149_v31 }
 0x1f9   :  { %v2254_v35 = vpop.f32.mrb[26].mxu1  ;;  %1205 = vmax.xlane.f32.xlu0 %v3152_v33 }
 0x1fa   :  { %v986_v38 = vpop.f32.mrb[27].mxu1  ;;  %v3165_v43 = vadd.f32 %v2254_v35, %v3030_v34 }
 0x1fb   :  { %v3160_v40 = vadd.f32 %v3030_v34, %v986_v38 }
 0x1fc   :  { %1207 = vmax.xlane.f32.xlu1 %v3157_v37 }
 0x1fd   :  { %v2257_v41 = vpop.f32.mrb[28].mxu1  ;;  %1209 = vmax.xlane.f32.xlu0 %v3160_v40 }
 0x1fe   :  { %v996_v45 = vpop.f32.mrb[29].mxu1  ;;  %v3173_v51 = vadd.f32 %v2257_v41, %v3030_v34 }
 0x1ff   :  { %v3168_v47 = vadd.f32 %v3030_v34, %v996_v45 }
 0x200   :  { %1211 = vmax.xlane.f32.xlu1 %v3165_v43 }
 0x201   :  { %v2260_v49 = vpop.f32.mrb[30].mxu1  ;;  %1213 = vmax.xlane.f32.xlu0 %v3168_v47 }
 0x202   :  { %v1006_v53 = vpop.f32.mrb[31].mxu1  ;;  %v3181_v59 = vadd.f32 %v2260_v49, %v3030_v34 }
 0x203   :  { %v3176_v55 = vadd.f32 %v3030_v34, %v1006_v53 }
 0x204   :  { %1215 = vmax.xlane.f32.xlu1 %v3173_v51 }
 0x205   :  { %v2263_v57 = vpop.f32.mrb[32].mxu1  ;;  %1217 = vmax.xlane.f32.xlu0 %v3176_v55 }
 0x206   :  { %v1016_v61 = vpop.f32.mrb[33].mxu1  ;;  %v3189_v3 = vadd.f32 %v2263_v57, %v3030_v34 }
 0x207   :  { %v3184_v63 = vadd.f32 %v3030_v34, %v1016_v61 }
 0x208   :  { %1219 = vmax.xlane.f32.xlu1 %v3181_v59 }
 0x209   :  { %v2266_v1 = vpop.f32.mrb[34].mxu1  ;;  %1221 = vmax.xlane.f32.xlu0 %v3184_v63 }
 0x20a   :  { %v1026_v5 = vpop.f32.mrb[35].mxu1  ;;  %v3197_v11 = vadd.f32 %v2266_v1, %v3030_v34 }
 0x20b   :  { %v3192_v7 = vadd.f32 %v3030_v34, %v1026_v5 }
 0x20c   :  { %1223 = vmax.xlane.f32.xlu1 %v3189_v3 }
 0x20d   :  { %v2269_v9 = vpop.f32.mrb[36].mxu1  ;;  %1225 = vmax.xlane.f32.xlu0 %v3192_v7 }
 0x20e   :  { %v1036_v13 = vpop.f32.mrb[37].mxu1  ;;  %v3205_v19 = vadd.f32 %v2269_v9, %v3030_v34 }
 0x20f   :  { %v3200_v15 = vadd.f32 %v3030_v34, %v1036_v13 }
 0x210   :  { %1227 = vmax.xlane.f32.xlu1 %v3197_v11 }
 0x211   :  { %v2272_v17 = vpop.f32.mrb[38].mxu1  ;;  %1229 = vmax.xlane.f32.xlu0 %v3200_v15 }
 0x212   :  { %v1046_v21 = vpop.f32.mrb[39].mxu1  ;;  %v3213_v27 = vadd.f32 %v2272_v17, %v3030_v34 }
 0x213   :  { %v3208_v23 = vadd.f32 %v3030_v34, %v1046_v21 }
 0x214   :  { %1231 = vmax.xlane.f32.xlu1 %v3205_v19 }
 0x215   :  { %v2275_v25 = vpop.f32.mrb[40].mxu1  ;;  %1233 = vmax.xlane.f32.xlu0 %v3208_v23 }
 0x216   :  { %v1056_v29 = vpop.f32.mrb[41].mxu1  ;;  %v3221_v38 = vadd.f32 %v2275_v25, %v3030_v34 }
 0x217   :  { %v3216_v32 = vadd.f32 %v3030_v34, %v1056_v29 }
 0x218   :  { %1235 = vmax.xlane.f32.xlu1 %v3213_v27 }
 0x219   :  { %v2278_v35 = vpop.f32.mrb[42].mxu1  ;;  %1237 = vmax.xlane.f32.xlu0 %v3216_v32 }
 0x21a   :  { %v1066_v41 = vpop.f32.mrb[43].mxu1  ;;  %v3229_v53 = vadd.f32 %v2278_v35, %v3030_v34 }
 0x21b   :  { %v3224_v45 = vadd.f32 %v3030_v34, %v1066_v41 }
 0x21c   :  { %1239 = vmax.xlane.f32.xlu1 %v3221_v38 }
 0x21d   :  { %v2281_v49 = vpop.f32.mrb[44].mxu1  ;;  %1241 = vmax.xlane.f32.xlu0 %v3224_v45 }
 0x21e   :  { %v1076_v57 = vpop.f32.mrb[45].mxu1  ;;  %v3237_v5 = vadd.f32 %v2281_v49, %v3030_v34 }
 0x21f   :  { %v3232_v61 = vadd.f32 %v3030_v34, %v1076_v57 }
 0x220   :  { %1243 = vmax.xlane.f32.xlu1 %v3229_v53 }
 0x221   :  { %v2284_v1 = vpop.f32.mrb[46].mxu1  ;;  %1245 = vmax.xlane.f32.xlu0 %v3232_v61 }
 0x222   :  { %v1086_v9 = vpop.f32.mrb[47].mxu1  ;;  %v3245_v21 = vadd.f32 %v2284_v1, %v3030_v34 }
 0x223   :  { %v3240_v13 = vadd.f32 %v3030_v34, %v1086_v9 }
 0x224   :  { %1247 = vmax.xlane.f32.xlu1 %v3237_v5  ;;  %3893 = vst [vmem:[#allocation2_spill] sm:$0xff] %v3245_v21 }
 0x225   :  { %v2287_v17 = vpop.f32.mrb[48].mxu1  ;;  %1249 = vmax.xlane.f32.xlu0 %v3240_v13 }
 0x226   :  { %v1096_v25 = vpop.f32.mrb[49].mxu1  ;;  %v3253_v41 = vadd.f32 %v2287_v17, %v3030_v34 }
 0x227   :  { %v3248_v29 = vadd.f32 %v3030_v34, %v1096_v25 }
 0x228   :  { %1251 = vmax.xlane.f32.xlu1 %v3245_v21  ;;  %3895 = vst [vmem:[#allocation4_spill] sm:$0xff] %v3253_v41 }
 0x229   :  { %3894 = vst [vmem:[#allocation3_spill] sm:$0xff] %v3248_v29  ;;  %v2290_v35 = vpop.f32.mrb[50].mxu1  ;;  %1253 = vmax.xlane.f32.xlu0 %v3248_v29 }
 0x22a   :  { %v1106_v49 = vpop.f32.mrb[51].mxu1  ;;  %v3261_v9 = vadd.f32 %v2290_v35, %v3030_v34 }
 0x22b   :  { %v3256_v57 = vadd.f32 %v3030_v34, %v1106_v49 }
 0x22c   :  { %1255 = vmax.xlane.f32.xlu1 %v3253_v41  ;;  %3897 = vst [vmem:[#allocation6_spill] sm:$0xff] %v3261_v9 }
 0x22d   :  { %3896 = vst [vmem:[#allocation5_spill] sm:$0xff] %v3256_v57  ;;  %v2293_v1 = vpop.f32.mrb[52].mxu1  ;;  %1257 = vmax.xlane.f32.xlu0 %v3256_v57 }
 0x22e   :  { %v1116_v25 = vpop.f32.mrb[53].mxu1  ;;  %v3269_v49 = vadd.f32 %v2293_v1, %v3030_v34 }
 0x22f   :  { %v3264_v21 = vadd.f32 %v3030_v34, %v1116_v25 }
 0x230   :  { %1259 = vmax.xlane.f32.xlu1 %v3261_v9  ;;  %3899 = vst [vmem:[#allocation8_spill] sm:$0xff] %v3269_v49 }
 0x231   :  { %3898 = vst [vmem:[#allocation7_spill] sm:$0xff] %v3264_v21  ;;  %v2296_v17 = vpop.f32.mrb[54].mxu1  ;;  %1261 = vmax.xlane.f32.xlu0 %v3264_v21 }
 0x232   :  { %v1126_v29 = vpop.f32.mrb[55].mxu1  ;;  %v3277_v25 = vadd.f32 %v2296_v17, %v3030_v34 }
 0x233   :  { %v3272_v41 = vadd.f32 %v3030_v34, %v1126_v29 }
 0x234   :  { %1263 = vmax.xlane.f32.xlu1 %v3269_v49  ;;  %3901 = vst [vmem:[#allocation10_spill] sm:$0xff] %v3277_v25 }
 0x235   :  { %3900 = vst [vmem:[#allocation9_spill] sm:$0xff] %v3272_v41  ;;  %v2299_v35 = vpop.f32.mrb[56].mxu1  ;;  %1265 = vmax.xlane.f32.xlu0 %v3272_v41 }
 0x236   :  { %v1136_v57 = vpop.f32.mrb[57].mxu1  ;;  %v3285_v1 = vadd.f32 %v2299_v35, %v3030_v34 }
 0x237   :  { %v3280_v9 = vadd.f32 %v3030_v34, %v1136_v57 }
 0x238   :  { %1267 = vmax.xlane.f32.xlu1 %v3277_v25  ;;  %3902 = vst [vmem:[#allocation11_spill] sm:$0xff] %v3285_v1 }
 0x239   :  { %1269 = vmax.xlane.f32.xlu0 %v3280_v9 }
 0x23c   :  { %1271 = vmax.xlane.f32.xlu1 %v3285_v1 }
 0x249   :  { %v1148_v29 = vpop.xlane.xlu0 %1147 }
 0x24a   :  { %v3289_v49 = vsub.f32 %v3033_v36, %v1148_v29 }
 0x24c   :  { %3903 = vst [vmem:[#allocation12_spill] sm:$0xff] %v3289_v49  ;;  %v1339_v17 = vmul.f32 1.442695, %v3289_v49 }
 0x24d   :  { %v1152_v41 = vpop.xlane.xlu1 %1151  ;;  %v1146_v21 = vpop.xlane.xlu0 %1145 }
 0x24e   :  { %2356 = vpow2.f32 %v1339_v17  ;;  %v3293_v57 = vsub.f32 %v3040_v39, %v1152_v41  ;;  %v3296_v25 = vsub.f32 %v3037_v30, %v1146_v21 }
 0x250   :  { %v1343_v34 = vmul.f32 1.442695, %v3293_v57  ;;  %v1337_v35 = vmul.f32 1.442695, %v3296_v25 }
 0x251   :  { %v1150_v1 = vpop.xlane.xlu1 %1149 }
 0x252   :  { %2358 = vpow2.f32 %v1343_v34  ;;  %v3301_v36 = vsub.f32 %v3045_v42, %v1150_v1  ;;  %v1154_v29 = vpop.xlane.xlu0 %1153 }
 0x253   :  { %2360 = vpow2.f32 %v1337_v35  ;;  %v3304_v49 = vsub.f32 %v3048_v44, %v1154_v29 }
 0x254   :  { %v1341_v39 = vmul.f32 1.442695, %v3301_v36 }
 0x255   :  { %3904 = vst [vmem:[#allocation13_spill] sm:$0xff] %v3304_v49  ;;  %v1156_v41 = vpop.xlane.xlu1 %1155  ;;  %v1345_v17 = vmul.f32 1.442695, %v3304_v49 }
 0x256   :  { %2362 = vpow2.f32 %v1341_v39  ;;  %v3308_v30 = vsub.f32 %v3053_v46, %v1156_v41  ;;  %v1158_v21 = vpop.xlane.xlu0 %1157 }
 0x257   :  { %v3312_v34 = vsub.f32 %v3056_v48, %v1158_v21 }
 0x258   :  { %v2357_v42 = vpop.eup %2356  ;;  %v1347_v1 = vmul.f32 1.442695, %v3308_v30 }
 0x259   :  { %1467 = vadd.xlane.f32.xlu1 %v2357_v42  ;;  %v1160_v35 = vpop.xlane.xlu1 %1159  ;;  %v1349_v46 = vmul.f32 1.442695, %v3312_v34 }
 0x25a   :  { %2364 = vpow2.f32 %v1347_v1  ;;  %v3316_v44 = vsub.f32 %v3061_v50, %v1160_v35  ;;  %v1162_v29 = vpop.xlane.xlu0 %1161 }
 0x25b   :  { %2366 = vpow2.f32 %v1345_v17  ;;  %v3320_v39 = vsub.f32 %v3064_v52, %v1162_v29 }
 0x25c   :  { %v2359_v41 = vpop.eup %2358  ;;  %v1351_v48 = vmul.f32 1.442695, %v3316_v44 }
 0x25d   :  { %v2361_v21 = vpop.eup %2360  ;;  %1471 = vadd.xlane.f32.xlu1 %v2359_v41  ;;  %v1164_v49 = vpop.xlane.xlu1 %1163  ;;  %v1353_v17 = vmul.f32 1.442695, %v3320_v39 }
 0x25e   :  { %2368 = vpow2.f32 %v1351_v48  ;;  %v3324_v42 = vsub.f32 %v3069_v54, %v1164_v49  ;;  %1465 = vadd.xlane.f32.xlu0 %v2361_v21  ;;  %v1166_v50 = vpop.xlane.xlu0 %1165 }
 0x25f   :  { %2370 = vpow2.f32 %v1349_v46  ;;  %v3328_v1 = vsub.f32 %v3072_v56, %v1166_v50 }
 0x260   :  { %v2363_v52 = vpop.eup %2362  ;;  %v1355_v35 = vmul.f32 1.442695, %v3324_v42 }
 0x261   :  { %3905 = vst [vmem:[#allocation14_spill] sm:$0xff] %v3328_v1  ;;  %v1168_v29 = vpop.xlane.xlu1 %1167  ;;  %v1357_v54 = vmul.f32 1.442695, %v3328_v1 }
 0x262   :  { %2372 = vpow2.f32 %v1355_v35  ;;  %v3332_v41 = vsub.f32 %v3077_v58, %v1168_v29  ;;  %1469 = vadd.xlane.f32.xlu0 %v2363_v52  ;;  %v1170_v48 = vpop.xlane.xlu0 %1169 }
 0x263   :  { %2374 = vpow2.f32 %v1353_v17  ;;  %v3336_v49 = vsub.f32 %v3080_v60, %v1170_v48 }
 0x264   :  { %v2365_v46 = vpop.eup %2364  ;;  %v1359_v56 = vmul.f32 1.442695, %v3332_v41 }
 0x265   :  { %v2367_v21 = vpop.eup %2366  ;;  %1475 = vadd.xlane.f32.xlu1 %v2365_v46  ;;  %v1172_v50 = vpop.xlane.xlu1 %1171  ;;  %v1361_v17 = vmul.f32 1.442695, %v3336_v49 }
 0x266   :  { %2376 = vpow2.f32 %v1359_v56  ;;  %v3340_v35 = vsub.f32 %v3085_v62, %v1172_v50  ;;  %1473 = vadd.xlane.f32.xlu0 %v2367_v21  ;;  %v1174_v58 = vpop.xlane.xlu0 %1173 }
 0x267   :  { %2378 = vpow2.f32 %v1357_v54  ;;  %v3344_v52 = vsub.f32 %v3088_v0, %v1174_v58 }
 0x268   :  { %v2369_v60 = vpop.eup %2368  ;;  %v1363_v29 = vmul.f32 1.442695, %v3340_v35 }
 0x269   :  { %v2371_v48 = vpop.eup %2370  ;;  %1479 = vadd.xlane.f32.xlu1 %v2369_v60  ;;  %v1176_v1 = vpop.xlane.xlu1 %1175  ;;  %v1365_v54 = vmul.f32 1.442695, %v3344_v52 }
 0x26a   :  { %2380 = vpow2.f32 %v1363_v29  ;;  %v3348_v46 = vsub.f32 %v3093_v2, %v1176_v1  ;;  %1477 = vadd.xlane.f32.xlu0 %v2371_v48  ;;  %v1178_v62 = vpop.xlane.xlu0 %1177 }
 0x26b   :  { %2382 = vpow2.f32 %v1361_v17  ;;  %v3352_v56 = vsub.f32 %v3096_v4, %v1178_v62 }
 0x26c   :  { %v2373_v0 = vpop.eup %2372  ;;  %v1367_v21 = vmul.f32 1.442695, %v3348_v46 }
 0x26d   :  { %v2375_v50 = vpop.eup %2374  ;;  %1483 = vadd.xlane.f32.xlu1 %v2373_v0  ;;  %v1180_v58 = vpop.xlane.xlu1 %1179  ;;  %v1369_v1 = vmul.f32 1.442695, %v3352_v56 }
 0x26e   :  { %2384 = vpow2.f32 %v1367_v21  ;;  %v3356_v60 = vsub.f32 %v3101_v6, %v1180_v58  ;;  %1481 = vadd.xlane.f32.xlu0 %v2375_v50  ;;  %v1182_v2 = vpop.xlane.xlu0 %1181 }
 0x26f   :  { %2386 = vpow2.f32 %v1365_v54  ;;  %v3360_v17 = vsub.f32 %v3104_v8, %v1182_v2 }
 0x270   :  { %v2377_v4 = vpop.eup %2376  ;;  %v1371_v29 = vmul.f32 1.442695, %v3356_v60 }
 0x271   :  { %v2379_v48 = vpop.eup %2378  ;;  %1487 = vadd.xlane.f32.xlu1 %v2377_v4  ;;  %v1184_v62 = vpop.xlane.xlu1 %1183  ;;  %v1373_v54 = vmul.f32 1.442695, %v3360_v17 }
 0x272   :  { %2388 = vpow2.f32 %v1371_v29  ;;  %v3364_v0 = vsub.f32 %v3109_v10, %v1184_v62  ;;  %1485 = vadd.xlane.f32.xlu0 %v2379_v48  ;;  %v1186_v6 = vpop.xlane.xlu0 %1185 }
 0x273   :  { %2390 = vpow2.f32 %v1369_v1  ;;  %v3368_v21 = vsub.f32 %v3112_v12, %v1186_v6 }
 0x274   :  { %v2381_v8 = vpop.eup %2380  ;;  %v1375_v50 = vmul.f32 1.442695, %v3364_v0 }
 0x275   :  { %v2383_v58 = vpop.eup %2382  ;;  %1491 = vadd.xlane.f32.xlu1 %v2381_v8  ;;  %v1188_v2 = vpop.xlane.xlu1 %1187  ;;  %v1377_v1 = vmul.f32 1.442695, %v3368_v21 }
 0x276   :  { %2392 = vpow2.f32 %v1375_v50  ;;  %v3372_v4 = vsub.f32 %v3117_v14, %v1188_v2  ;;  %1489 = vadd.xlane.f32.xlu0 %v2383_v58  ;;  %v1190_v10 = vpop.xlane.xlu0 %1189 }
 0x277   :  { %2394 = vpow2.f32 %v1373_v54  ;;  %v3376_v29 = vsub.f32 %v3120_v16, %v1190_v10 }
 0x278   :  { %v2385_v12 = vpop.eup %2384  ;;  %v1379_v48 = vmul.f32 1.442695, %v3372_v4 }
 0x279   :  { %v2387_v62 = vpop.eup %2386  ;;  %1495 = vadd.xlane.f32.xlu1 %v2385_v12  ;;  %v1192_v6 = vpop.xlane.xlu1 %1191  ;;  %v1381_v54 = vmul.f32 1.442695, %v3376_v29 }
 0x27a   :  { %2396 = vpow2.f32 %v1379_v48  ;;  %v3380_v8 = vsub.f32 %v3125_v18, %v1192_v6  ;;  %1493 = vadd.xlane.f32.xlu0 %v2387_v62  ;;  %v1194_v14 = vpop.xlane.xlu0 %1193 }
 0x27b   :  { %2398 = vpow2.f32 %v1377_v1  ;;  %v3384_v50 = vsub.f32 %v3128_v20, %v1194_v14 }
 0x27c   :  { %v2389_v16 = vpop.eup %2388  ;;  %v1383_v58 = vmul.f32 1.442695, %v3380_v8 }
 0x27d   :  { %v2391_v2 = vpop.eup %2390  ;;  %1499 = vadd.xlane.f32.xlu1 %v2389_v16  ;;  %v1196_v10 = vpop.xlane.xlu1 %1195  ;;  %v1385_v1 = vmul.f32 1.442695, %v3384_v50 }
 0x27e   :  { %2400 = vpow2.f32 %v1383_v58  ;;  %v3388_v12 = vsub.f32 %v3133_v22, %v1196_v10  ;;  %1497 = vadd.xlane.f32.xlu0 %v2391_v2  ;;  %v1198_v18 = vpop.xlane.xlu0 %1197 }
 0x27f   :  { %2402 = vpow2.f32 %v1381_v54  ;;  %v3392_v48 = vsub.f32 %v3136_v24, %v1198_v18 }
 0x280   :  { %v2393_v20 = vpop.eup %2392  ;;  %v1387_v62 = vmul.f32 1.442695, %v3388_v12 }
 0x281   :  { %v2395_v6 = vpop.eup %2394  ;;  %1503 = vadd.xlane.f32.xlu1 %v2393_v20  ;;  %v1200_v14 = vpop.xlane.xlu1 %1199  ;;  %v1389_v54 = vmul.f32 1.442695, %v3392_v48 }
 0x282   :  { %2404 = vpow2.f32 %v1387_v62  ;;  %v3396_v16 = vsub.f32 %v3141_v26, %v1200_v14  ;;  %1501 = vadd.xlane.f32.xlu0 %v2395_v6  ;;  %v1202_v22 = vpop.xlane.xlu0 %1201 }
 0x283   :  { %2406 = vpow2.f32 %v1385_v1  ;;  %v3400_v58 = vsub.f32 %v3144_v28, %v1202_v22 }
 0x284   :  { %v2397_v24 = vpop.eup %2396  ;;  %v1391_v2 = vmul.f32 1.442695, %v3396_v16 }
 0x285   :  { %v2399_v10 = vpop.eup %2398  ;;  %1507 = vadd.xlane.f32.xlu1 %v2397_v24  ;;  %v1204_v18 = vpop.xlane.xlu1 %1203  ;;  %v1393_v1 = vmul.f32 1.442695, %v3400_v58 }
 0x286   :  { %2408 = vpow2.f32 %v1391_v2  ;;  %v3404_v20 = vsub.f32 %v3149_v31, %v1204_v18  ;;  %1505 = vadd.xlane.f32.xlu0 %v2399_v10  ;;  %v1206_v26 = vpop.xlane.xlu0 %1205 }
 0x287   :  { %2410 = vpow2.f32 %v1389_v54  ;;  %v3408_v62 = vsub.f32 %v3152_v33, %v1206_v26 }
 0x288   :  { %v2401_v28 = vpop.eup %2400  ;;  %v1395_v6 = vmul.f32 1.442695, %v3404_v20 }
 0x289   :  { %v2403_v14 = vpop.eup %2402  ;;  %1511 = vadd.xlane.f32.xlu1 %v2401_v28  ;;  %v1208_v22 = vpop.xlane.xlu1 %1207  ;;  %v1397_v54 = vmul.f32 1.442695, %v3408_v62 }
 0x28a   :  { %2412 = vpow2.f32 %v1395_v6  ;;  %v3412_v24 = vsub.f32 %v3157_v37, %v1208_v22  ;;  %1509 = vadd.xlane.f32.xlu0 %v2403_v14  ;;  %v1210_v31 = vpop.xlane.xlu0 %1209 }
 0x28b   :  { %2414 = vpow2.f32 %v1393_v1  ;;  %v3416_v2 = vsub.f32 %v3160_v40, %v1210_v31 }
 0x28c   :  { %v2405_v33 = vpop.eup %2404  ;;  %v1399_v10 = vmul.f32 1.442695, %v3412_v24 }
 0x28d   :  { %v2407_v18 = vpop.eup %2406  ;;  %1515 = vadd.xlane.f32.xlu1 %v2405_v33  ;;  %v1212_v26 = vpop.xlane.xlu1 %1211  ;;  %v1401_v1 = vmul.f32 1.442695, %v3416_v2 }
 0x28e   :  { %2416 = vpow2.f32 %v1399_v10  ;;  %v3420_v28 = vsub.f32 %v3165_v43, %v1212_v26  ;;  %1513 = vadd.xlane.f32.xlu0 %v2407_v18  ;;  %v1214_v37 = vpop.xlane.xlu0 %1213 }
 0x28f   :  { %2418 = vpow2.f32 %v1397_v54  ;;  %v3424_v6 = vsub.f32 %v3168_v47, %v1214_v37 }
 0x290   :  { %v2409_v40 = vpop.eup %2408  ;;  %v1403_v14 = vmul.f32 1.442695, %v3420_v28 }
 0x291   :  { %v2411_v22 = vpop.eup %2410  ;;  %1519 = vadd.xlane.f32.xlu1 %v2409_v40  ;;  %v1216_v31 = vpop.xlane.xlu1 %1215  ;;  %v1405_v54 = vmul.f32 1.442695, %v3424_v6 }
 0x292   :  { %2420 = vpow2.f32 %v1403_v14  ;;  %v3428_v33 = vsub.f32 %v3173_v51, %v1216_v31  ;;  %1517 = vadd.xlane.f32.xlu0 %v2411_v22  ;;  %v1218_v43 = vpop.xlane.xlu0 %1217 }
 0x293   :  { %2422 = vpow2.f32 %v1401_v1  ;;  %v3432_v10 = vsub.f32 %v3176_v55, %v1218_v43 }
 0x294   :  { %v2413_v47 = vpop.eup %2412  ;;  %v1407_v18 = vmul.f32 1.442695, %v3428_v33 }
 0x295   :  { %v2415_v26 = vpop.eup %2414  ;;  %1523 = vadd.xlane.f32.xlu1 %v2413_v47  ;;  %v1220_v37 = vpop.xlane.xlu1 %1219  ;;  %v1409_v1 = vmul.f32 1.442695, %v3432_v10 }
 0x296   :  { %2424 = vpow2.f32 %v1407_v18  ;;  %v3436_v40 = vsub.f32 %v3181_v59, %v1220_v37  ;;  %1521 = vadd.xlane.f32.xlu0 %v2415_v26  ;;  %v1222_v51 = vpop.xlane.xlu0 %1221 }
 0x297   :  { %2426 = vpow2.f32 %v1405_v54  ;;  %v3440_v14 = vsub.f32 %v3184_v63, %v1222_v51 }
 0x298   :  { %v2417_v55 = vpop.eup %2416  ;;  %v1411_v22 = vmul.f32 1.442695, %v3436_v40 }
 0x299   :  { %v2419_v31 = vpop.eup %2418  ;;  %1527 = vadd.xlane.f32.xlu1 %v2417_v55  ;;  %v1224_v43 = vpop.xlane.xlu1 %1223  ;;  %v1413_v54 = vmul.f32 1.442695, %v3440_v14 }
 0x29a   :  { %2428 = vpow2.f32 %v1411_v22  ;;  %v3444_v47 = vsub.f32 %v3189_v3, %v1224_v43  ;;  %1525 = vadd.xlane.f32.xlu0 %v2419_v31  ;;  %v1226_v59 = vpop.xlane.xlu0 %1225 }
 0x29b   :  { %2430 = vpow2.f32 %v1409_v1  ;;  %v3448_v18 = vsub.f32 %v3192_v7, %v1226_v59 }
 0x29c   :  { %v2421_v63 = vpop.eup %2420  ;;  %v1415_v26 = vmul.f32 1.442695, %v3444_v47 }
 0x29d   :  { %v2423_v37 = vpop.eup %2422  ;;  %1531 = vadd.xlane.f32.xlu1 %v2421_v63  ;;  %v1228_v51 = vpop.xlane.xlu1 %1227  ;;  %v1417_v1 = vmul.f32 1.442695, %v3448_v18 }
 0x29e   :  { %2432 = vpow2.f32 %v1415_v26  ;;  %v3452_v55 = vsub.f32 %v3197_v11, %v1228_v51  ;;  %1529 = vadd.xlane.f32.xlu0 %v2423_v37  ;;  %v1230_v3 = vpop.xlane.xlu0 %1229 }
 0x29f   :  { %2434 = vpow2.f32 %v1413_v54  ;;  %v3456_v22 = vsub.f32 %v3200_v15, %v1230_v3 }
 0x2a0   :  { %v2425_v7 = vpop.eup %2424  ;;  %v1419_v31 = vmul.f32 1.442695, %v3452_v55 }
 0x2a1   :  { %v2427_v43 = vpop.eup %2426  ;;  %1535 = vadd.xlane.f32.xlu1 %v2425_v7  ;;  %v1232_v59 = vpop.xlane.xlu1 %1231  ;;  %v1421_v54 = vmul.f32 1.442695, %v3456_v22 }
 0x2a2   :  { %2436 = vpow2.f32 %v1419_v31  ;;  %v3460_v63 = vsub.f32 %v3205_v19, %v1232_v59  ;;  %1533 = vadd.xlane.f32.xlu0 %v2427_v43  ;;  %v1234_v11 = vpop.xlane.xlu0 %1233 }
 0x2a3   :  { %2438 = vpow2.f32 %v1417_v1  ;;  %v3464_v26 = vsub.f32 %v3208_v23, %v1234_v11 }
 0x2a4   :  { %v2429_v15 = vpop.eup %2428  ;;  %v1423_v37 = vmul.f32 1.442695, %v3460_v63 }
 0x2a5   :  { %v2431_v51 = vpop.eup %2430  ;;  %1539 = vadd.xlane.f32.xlu1 %v2429_v15  ;;  %v1236_v3 = vpop.xlane.xlu1 %1235  ;;  %v1425_v1 = vmul.f32 1.442695, %v3464_v26 }
 0x2a6   :  { %2440 = vpow2.f32 %v1423_v37  ;;  %v3468_v7 = vsub.f32 %v3213_v27, %v1236_v3  ;;  %1537 = vadd.xlane.f32.xlu0 %v2431_v51  ;;  %v1238_v19 = vpop.xlane.xlu0 %1237 }
 0x2a7   :  { %2442 = vpow2.f32 %v1421_v54  ;;  %v3472_v31 = vsub.f32 %v3216_v32, %v1238_v19 }
 0x2a8   :  { %v2433_v23 = vpop.eup %2432  ;;  %v1427_v43 = vmul.f32 1.442695, %v3468_v7 }
 0x2a9   :  { %v2435_v59 = vpop.eup %2434  ;;  %1543 = vadd.xlane.f32.xlu1 %v2433_v23  ;;  %v1240_v11 = vpop.xlane.xlu1 %1239  ;;  %v1429_v54 = vmul.f32 1.442695, %v3472_v31 }
 0x2aa   :  { %2444 = vpow2.f32 %v1427_v43  ;;  %v3476_v15 = vsub.f32 %v3221_v38, %v1240_v11  ;;  %1541 = vadd.xlane.f32.xlu0 %v2435_v59  ;;  %v1242_v27 = vpop.xlane.xlu0 %1241 }
 0x2ab   :  { %2446 = vpow2.f32 %v1425_v1  ;;  %v3480_v37 = vsub.f32 %v3224_v45, %v1242_v27 }
 0x2ac   :  { %v2437_v32 = vpop.eup %2436  ;;  %v1431_v51 = vmul.f32 1.442695, %v3476_v15 }
 0x2ad   :  { %v2439_v3 = vpop.eup %2438  ;;  %1547 = vadd.xlane.f32.xlu1 %v2437_v32  ;;  %v1244_v19 = vpop.xlane.xlu1 %1243  ;;  %v1433_v1 = vmul.f32 1.442695, %v3480_v37 }
 0x2ae   :  { %2448 = vpow2.f32 %v1431_v51  ;;  %v3484_v23 = vsub.f32 %v3229_v53, %v1244_v19  ;;  %1545 = vadd.xlane.f32.xlu0 %v2439_v3  ;;  %v1246_v38 = vpop.xlane.xlu0 %1245 }
 0x2af   :  { %2450 = vpow2.f32 %v1429_v54  ;;  %v3488_v43 = vsub.f32 %v3232_v61, %v1246_v38 }
 0x2b0   :  { %v2441_v45 = vpop.eup %2440  ;;  %v1435_v59 = vmul.f32 1.442695, %v3484_v23 }
 0x2b1   :  { %3906 = vst [vmem:[#allocation15_spill] sm:$0xff] %v3488_v43  ;;  %v2443_v11 = vpop.eup %2442  ;;  %1551 = vadd.xlane.f32.xlu1 %v2441_v45  ;;  %v1248_v27 = vpop.xlane.xlu1 %1247  ;;  %v1437_v54 = vmul.f32 1.442695, %v3488_v43  ;;  %v3909_v45 = vld [vmem:[#allocation2_spill] sm:$0xff] }
 0x2b2   :  { %2452 = vpow2.f32 %v1435_v59  ;;  %v3492_v32 = vsub.f32 %v3237_v5, %v1248_v27  ;;  %1549 = vadd.xlane.f32.xlu0 %v2443_v11  ;;  %v1250_v53 = vpop.xlane.xlu0 %1249  ;;  %v3911_v11 = vld [vmem:[#allocation3_spill] sm:$0xff] }
 0x2b3   :  { %2454 = vpow2.f32 %v1433_v1  ;;  %v3496_v51 = vsub.f32 %v3240_v13, %v1250_v53 }
 0x2b4   :  { %3907 = vst [vmem:[#allocation16_spill] sm:$0xff] %v3492_v32  ;;  %v2445_v61 = vpop.eup %2444  ;;  %v1439_v3 = vmul.f32 1.442695, %v3492_v32 }
 0x2b5   :  { %3908 = vst [vmem:[#allocation17_spill] sm:$0xff] %v3496_v51  ;;  %v2447_v19 = vpop.eup %2446  ;;  %1555 = vadd.xlane.f32.xlu1 %v2445_v61  ;;  %v1252_v38 = vpop.xlane.xlu1 %1251  ;;  %v1441_v1 = vmul.f32 1.442695, %v3496_v51  ;;  %v3913_v61 = vld [vmem:[#allocation4_spill] sm:$0xff] }
 0x2b6   :  { %2456 = vpow2.f32 %v1439_v3  ;;  %v3500_v59 = vsub.f32 %v3909_v45, %v1252_v38  ;;  %1553 = vadd.xlane.f32.xlu0 %v2447_v19  ;;  %v1254_v5 = vpop.xlane.xlu0 %1253  ;;  %v3915_v19 = vld [vmem:[#allocation5_spill] sm:$0xff] }
 0x2b7   :  { %2458 = vpow2.f32 %v1437_v54  ;;  %v3504_v27 = vsub.f32 %v3911_v11, %v1254_v5 }
 0x2b8   :  { %3910 = vst [vmem:[#allocation2_spill] sm:$0xff] %v3500_v59  ;;  %v2449_v13 = vpop.eup %2448  ;;  %v1443_v53 = vmul.f32 1.442695, %v3500_v59 }
 0x2b9   :  { %3912 = vst [vmem:[#allocation3_spill] sm:$0xff] %v3504_v27  ;;  %v2451_v43 = vpop.eup %2450  ;;  %1559 = vadd.xlane.f32.xlu1 %v2449_v13  ;;  %v1256_v32 = vpop.xlane.xlu1 %1255  ;;  %v1445_v54 = vmul.f32 1.442695, %v3504_v27  ;;  %v3917_v13 = vld [vmem:[#allocation6_spill] sm:$0xff] }
 0x2ba   :  { %2460 = vpow2.f32 %v1443_v53  ;;  %v3508_v3 = vsub.f32 %v3913_v61, %v1256_v32  ;;  %1557 = vadd.xlane.f32.xlu0 %v2451_v43  ;;  %v1258_v38 = vpop.xlane.xlu0 %1257 }
 0x2bb   :  { %2462 = vpow2.f32 %v1441_v1  ;;  %v3512_v45 = vsub.f32 %v3915_v19, %v1258_v38  ;;  %v3919_v1 = vld [vmem:[#allocation7_spill] sm:$0xff] }
 0x2bc   :  { %3914 = vst [vmem:[#allocation4_spill] sm:$0xff] %v3508_v3  ;;  %v2453_v5 = vpop.eup %2452  ;;  %v1447_v11 = vmul.f32 1.442695, %v3508_v3 }
 0x2bd   :  { %3916 = vst [vmem:[#allocation5_spill] sm:$0xff] %v3512_v45  ;;  %v2455_v51 = vpop.eup %2454  ;;  %1563 = vadd.xlane.f32.xlu1 %v2453_v5  ;;  %v1260_v59 = vpop.xlane.xlu1 %1259  ;;  %v1449_v43 = vmul.f32 1.442695, %v3512_v45  ;;  %v3921_v5 = vld [vmem:[#allocation8_spill] sm:$0xff] }
 0x2be   :  { %2464 = vpow2.f32 %v1447_v11  ;;  %v3516_v53 = vsub.f32 %v3917_v13, %v1260_v59  ;;  %1561 = vadd.xlane.f32.xlu0 %v2455_v51  ;;  %v1262_v32 = vpop.xlane.xlu0 %1261 }
 0x2bf   :  { %2466 = vpow2.f32 %v1445_v54  ;;  %v3520_v61 = vsub.f32 %v3919_v1, %v1262_v32  ;;  %v3922_v54 = vld [vmem:[#allocation9_spill] sm:$0xff] }
 0x2c0   :  { %3918 = vst [vmem:[#allocation6_spill] sm:$0xff] %v3516_v53  ;;  %v2457_v38 = vpop.eup %2456  ;;  %v1451_v19 = vmul.f32 1.442695, %v3516_v53 }
 0x2c1   :  { %3920 = vst [vmem:[#allocation7_spill] sm:$0xff] %v3520_v61  ;;  %v2459_v27 = vpop.eup %2458  ;;  %1567 = vadd.xlane.f32.xlu1 %v2457_v38  ;;  %v1264_v3 = vpop.xlane.xlu1 %1263  ;;  %v1453_v51 = vmul.f32 1.442695, %v3520_v61  ;;  %v3923_v38 = vld [vmem:[#allocation10_spill] sm:$0xff] }
 0x2c2   :  { %2468 = vpow2.f32 %v1451_v19  ;;  %v3524_v11 = vsub.f32 %v3921_v5, %v1264_v3  ;;  %1565 = vadd.xlane.f32.xlu0 %v2459_v27  ;;  %v1266_v59 = vpop.xlane.xlu0 %1265 }
 0x2c3   :  { %2470 = vpow2.f32 %v1449_v43  ;;  %v3528_v13 = vsub.f32 %v3922_v54, %v1266_v59 }
 0x2c4   :  { %v2461_v32 = vpop.eup %2460  ;;  %v1455_v1 = vmul.f32 1.442695, %v3524_v11 }
 0x2c5   :  { %v2463_v45 = vpop.eup %2462  ;;  %1571 = vadd.xlane.f32.xlu1 %v2461_v32  ;;  %v1268_v53 = vpop.xlane.xlu1 %1267  ;;  %v1457_v27 = vmul.f32 1.442695, %v3528_v13  ;;  %v3925_v32 = vld [vmem:[#allocation11_spill] sm:$0xff] }
 0x2c6   :  { %2472 = vpow2.f32 %v1455_v1  ;;  %v3532_v19 = vsub.f32 %v3923_v38, %v1268_v53  ;;  %1569 = vadd.xlane.f32.xlu0 %v2463_v45  ;;  %v1270_v3 = vpop.xlane.xlu0 %1269 }
 0x2c7   :  { %2474 = vpow2.f32 %v1453_v51  ;;  %v3536_v43 = vsub.f32 %v3280_v9, %v1270_v3 }
 0x2c8   :  { %v2465_v5 = vpop.eup %2464  ;;  %v1459_v59 = vmul.f32 1.442695, %v3532_v19 }
 0x2c9   :  { %3924 = vst [vmem:[#allocation8_spill] sm:$0xff] %v3536_v43  ;;  %v2467_v54 = vpop.eup %2466  ;;  %1575 = vadd.xlane.f32.xlu1 %v2465_v5  ;;  %v1272_v61 = vpop.xlane.xlu1 %1271  ;;  %v1461_v45 = vmul.f32 1.442695, %v3536_v43 }
 0x2ca   :  { %2476 = vpow2.f32 %v1459_v59  ;;  %v3540_v1 = vsub.f32 %v3925_v32, %v1272_v61  ;;  %1573 = vadd.xlane.f32.xlu0 %v2467_v54 }
 0x2cb   :  { %2478 = vpow2.f32 %v1457_v27 }
 0x2cc   :  { %v2469_v53 = vpop.eup %2468  ;;  %v1463_v51 = vmul.f32 1.442695, %v3540_v1 }
 0x2cd   :  { %v2471_v38 = vpop.eup %2470  ;;  %1579 = vadd.xlane.f32.xlu1 %v2469_v53 }
 0x2ce   :  { %2480 = vpow2.f32 %v1463_v51  ;;  %1577 = vadd.xlane.f32.xlu0 %v2471_v38 }
 0x2cf   :  { %2482 = vpow2.f32 %v1461_v45 }
 0x2d0   :  { %v2473_v9 = vpop.eup %2472 }
 0x2d1   :  { %v2475_v3 = vpop.eup %2474  ;;  %1583 = vadd.xlane.f32.xlu1 %v2473_v9 }
 0x2d2   :  { %1581 = vadd.xlane.f32.xlu0 %v2475_v3 }
 0x2d4   :  { %v2477_v5 = vpop.eup %2476 }
 0x2d5   :  { %v2479_v59 = vpop.eup %2478  ;;  %1587 = vadd.xlane.f32.xlu1 %v2477_v5  ;;  %v3926_v5 = vld [vmem:[#allocation12_spill] sm:$0xff] }
 0x2d6   :  { %1585 = vadd.xlane.f32.xlu0 %v2479_v59 }
 0x2d8   :  { %v2481_v61 = vpop.eup %2480 }
 0x2d9   :  { %v2483_v27 = vpop.eup %2482  ;;  %1591 = vadd.xlane.f32.xlu1 %v2481_v61 }
 0x2da   :  { %1589 = vadd.xlane.f32.xlu0 %v2483_v27 }
 0x2e6   :  { %v1468_v54 = vpop.xlane.xlu1 %1467 }
 0x2e7   :  { %2484 = vlog2.f32 %v1468_v54 }
 0x2ea   :  { %v1472_v32 = vpop.xlane.xlu1 %1471 }
 0x2eb   :  { %2486 = vlog2.f32 %v1472_v32  ;;  %v1466_v53 = vpop.xlane.xlu0 %1465 }
 0x2ec   :  { %2488 = vlog2.f32 %v1466_v53 }
 0x2ef   :  { %v1470_v51 = vpop.xlane.xlu0 %1469 }
 0x2f0   :  { %2490 = vlog2.f32 %v1470_v51 }
 0x2f1   :  { %v2485_v45 = vpop.eup %2484 }
 0x2f2   :  { %v1596_v38 = vmul.f32 0.6931472, %v2485_v45  ;;  %v1476_v9 = vpop.xlane.xlu1 %1475 }
 0x2f3   :  { %2492 = vlog2.f32 %v1476_v9  ;;  %v1474_v3 = vpop.xlane.xlu0 %1473 }
 0x2f4   :  { %v1722_v59 = vsub.f32 %v3926_v5, %v1596_v38  ;;  %2494 = vlog2.f32 %v1474_v3 }
 0x2f5   :  { %v2487_v43 = vpop.eup %2486 }
 0x2f6   :  { %v2489_v61 = vpop.eup %2488  ;;  %1787 = vst.msk [vmem:[%s3869_s5 + $0x8] sm:$0xff] %vm1785_vm1, %v1722_v59  ;;  %v1600_v27 = vmul.f32 0.6931472, %v2487_v43  ;;  %v1480_v54 = vpop.xlane.xlu1 %1479 }
 0x2f7   :  { %v1594_v32 = vmul.f32 0.6931472, %v2489_v61  ;;  %2496 = vlog2.f32 %v1480_v54  ;;  %v1478_v53 = vpop.xlane.xlu0 %1477 }
 0x2f8   :  { %v1724_v51 = vsub.f32 %v3293_v57, %v1600_v27  ;;  %2498 = vlog2.f32 %v1478_v53 }
 0x2f9   :  { %v1721_v45 = vsub.f32 %v3296_v25, %v1594_v32 }
 0x2fa   :  { %v2491_v9 = vpop.eup %2490  ;;  %1789 = vst.msk [vmem:[%s3869_s5 + $0x18] sm:$0xff] %vm1785_vm1, %v1724_v51  ;;  %v1484_v38 = vpop.xlane.xlu1 %1483  ;;  %v3927_v51 = vld [vmem:[#allocation13_spill] sm:$0xff] }
 0x2fb   :  { %1786 = vst.msk [vmem:[%s3869_s5] sm:$0xff] %vm1785_vm1, %v1721_v45  ;;  %v1598_v43 = vmul.f32 0.6931472, %v2491_v9  ;;  %2500 = vlog2.f32 %v1484_v38  ;;  %v1482_v3 = vpop.xlane.xlu0 %1481 }
 0x2fc   :  { %2502 = vlog2.f32 %v1482_v3 }
 0x2fd   :  { %v2493_v57 = vpop.eup %2492  ;;  %v1723_v5 = vsub.f32 %v3301_v36, %v1598_v43 }
 0x2fe   :  { %v2495_v25 = vpop.eup %2494  ;;  %v1604_v59 = vmul.f32 0.6931472, %v2493_v57  ;;  %v1488_v61 = vpop.xlane.xlu1 %1487 }
 0x2ff   :  { %1788 = vst.msk [vmem:[%s3869_s5 + $0x10] sm:$0xff] %vm1785_vm1, %v1723_v5  ;;  %v1602_v27 = vmul.f32 0.6931472, %v2495_v25  ;;  %2504 = vlog2.f32 %v1488_v61  ;;  %v1486_v54 = vpop.xlane.xlu0 %1485 }
 0x300   :  { %v1726_v32 = vsub.f32 %v3308_v30, %v1604_v59  ;;  %2506 = vlog2.f32 %v1486_v54 }
 0x301   :  { %v2497_v53 = vpop.eup %2496  ;;  %v1725_v45 = vsub.f32 %v3927_v51, %v1602_v27 }
 0x302   :  { %v2499_v9 = vpop.eup %2498  ;;  %1791 = vst.msk [vmem:[%s3869_s5 + $0x28] sm:$0xff] %vm1785_vm1, %v1726_v32  ;;  %v1608_v36 = vmul.f32 0.6931472, %v2497_v53  ;;  %v1492_v38 = vpop.xlane.xlu1 %1491 }
 0x303   :  { %1790 = vst.msk [vmem:[%s3869_s5 + $0x20] sm:$0xff] %vm1785_vm1, %v1725_v45  ;;  %v1606_v43 = vmul.f32 0.6931472, %v2499_v9  ;;  %2508 = vlog2.f32 %v1492_v38  ;;  %v1490_v30 = vpop.xlane.xlu0 %1489  ;;  %v3928_v38 = vld [vmem:[#allocation14_spill] sm:$0xff] }
 0x304   :  { %v1728_v3 = vsub.f32 %v3316_v44, %v1608_v36  ;;  %2510 = vlog2.f32 %v1490_v30 }
 0x305   :  { %v2501_v57 = vpop.eup %2500  ;;  %v1727_v5 = vsub.f32 %v3312_v34, %v1606_v43 }
 0x306   :  { %v2503_v25 = vpop.eup %2502  ;;  %1793 = vst.msk [vmem:[%s3869_s5 + $0x38] sm:$0xff] %vm1785_vm1, %v1728_v3  ;;  %v1612_v59 = vmul.f32 0.6931472, %v2501_v57  ;;  %v1496_v61 = vpop.xlane.xlu1 %1495 }
 0x307   :  { %1792 = vst.msk [vmem:[%s3869_s5 + $0x30] sm:$0xff] %vm1785_vm1, %v1727_v5  ;;  %v1610_v27 = vmul.f32 0.6931472, %v2503_v25  ;;  %2512 = vlog2.f32 %v1496_v61  ;;  %v1494_v44 = vpop.xlane.xlu0 %1493 }
 0x308   :  { %v1730_v54 = vsub.f32 %v3324_v42, %v1612_v59  ;;  %2514 = vlog2.f32 %v1494_v44 }
 0x309   :  { %v2505_v34 = vpop.eup %2504  ;;  %v1729_v32 = vsub.f32 %v3320_v39, %v1610_v27 }
 0x30a   :  { %v2507_v53 = vpop.eup %2506  ;;  %1795 = vst.msk [vmem:[%s3869_s5 + $0x48] sm:$0xff] %vm1785_vm1, %v1730_v54  ;;  %v1616_v51 = vmul.f32 0.6931472, %v2505_v34  ;;  %v1500_v45 = vpop.xlane.xlu1 %1499 }
 0x30b   :  { %1794 = vst.msk [vmem:[%s3869_s5 + $0x40] sm:$0xff] %vm1785_vm1, %v1729_v32  ;;  %v1614_v9 = vmul.f32 0.6931472, %v2507_v53  ;;  %2516 = vlog2.f32 %v1500_v45  ;;  %v1498_v42 = vpop.xlane.xlu0 %1497 }
 0x30c   :  { %v1732_v36 = vsub.f32 %v3332_v41, %v1616_v51  ;;  %2518 = vlog2.f32 %v1498_v42 }
 0x30d   :  { %v2509_v39 = vpop.eup %2508  ;;  %v1731_v43 = vsub.f32 %v3928_v38, %v1614_v9 }
 0x30e   :  { %v2511_v30 = vpop.eup %2510  ;;  %1797 = vst.msk [vmem:[%s3869_s5 + $0x58] sm:$0xff] %vm1785_vm1, %v1732_v36  ;;  %v1620_v3 = vmul.f32 0.6931472, %v2509_v39  ;;  %v1504_v57 = vpop.xlane.xlu1 %1503 }
 0x30f   :  { %1796 = vst.msk [vmem:[%s3869_s5 + $0x50] sm:$0xff] %vm1785_vm1, %v1731_v43  ;;  %v1618_v5 = vmul.f32 0.6931472, %v2511_v30  ;;  %2520 = vlog2.f32 %v1504_v57  ;;  %v1502_v41 = vpop.xlane.xlu0 %1501 }
 0x310   :  { %v1734_v25 = vsub.f32 %v3340_v35, %v1620_v3  ;;  %2522 = vlog2.f32 %v1502_v41 }
 0x311   :  { %v2513_v59 = vpop.eup %2512  ;;  %v1733_v61 = vsub.f32 %v3336_v49, %v1618_v5 }
 0x312   :  { %v2515_v27 = vpop.eup %2514  ;;  %1799 = vst.msk [vmem:[%s3869_s5 + $0x68] sm:$0xff] %vm1785_vm1, %v1734_v25  ;;  %v1624_v44 = vmul.f32 0.6931472, %v2513_v59  ;;  %v1508_v54 = vpop.xlane.xlu1 %1507 }
 0x313   :  { %1798 = vst.msk [vmem:[%s3869_s5 + $0x60] sm:$0xff] %vm1785_vm1, %v1733_v61  ;;  %v1622_v34 = vmul.f32 0.6931472, %v2515_v27  ;;  %2524 = vlog2.f32 %v1508_v54  ;;  %v1506_v35 = vpop.xlane.xlu0 %1505 }
 0x314   :  { %v1736_v32 = vsub.f32 %v3348_v46, %v1624_v44  ;;  %2526 = vlog2.f32 %v1506_v35 }
 0x315   :  { %v2517_v49 = vpop.eup %2516  ;;  %v1735_v53 = vsub.f32 %v3344_v52, %v1622_v34 }
 0x316   :  { %v2519_v51 = vpop.eup %2518  ;;  %1801 = vst.msk [vmem:[%s3869_s5 + $0x78] sm:$0xff] %vm1785_vm1, %v1736_v32  ;;  %v1628_v45 = vmul.f32 0.6931472, %v2517_v49  ;;  %v1512_v9 = vpop.xlane.xlu1 %1511 }
 0x317   :  { %1800 = vst.msk [vmem:[%s3869_s5 + $0x70] sm:$0xff] %vm1785_vm1, %v1735_v53  ;;  %v1626_v42 = vmul.f32 0.6931472, %v2519_v51  ;;  %2528 = vlog2.f32 %v1512_v9  ;;  %v1510_v46 = vpop.xlane.xlu0 %1509 }
 0x318   :  { %v1738_v36 = vsub.f32 %v3356_v60, %v1628_v45  ;;  %2530 = vlog2.f32 %v1510_v46 }
 0x319   :  { %v2521_v52 = vpop.eup %2520  ;;  %v1737_v39 = vsub.f32 %v3352_v56, %v1626_v42 }
 0x31a   :  { %v2523_v38 = vpop.eup %2522  ;;  %1803 = vst.msk [vmem:[%s3869_s5 + $0x88] sm:$0xff] %vm1785_vm1, %v1738_v36  ;;  %v1632_v43 = vmul.f32 0.6931472, %v2521_v52  ;;  %v1516_v30 = vpop.xlane.xlu1 %1515 }
 0x31b   :  { %1802 = vst.msk [vmem:[%s3869_s5 + $0x80] sm:$0xff] %vm1785_vm1, %v1737_v39  ;;  %v1630_v3 = vmul.f32 0.6931472, %v2523_v38  ;;  %2532 = vlog2.f32 %v1516_v30  ;;  %v1514_v60 = vpop.xlane.xlu0 %1513 }
 0x31c   :  { %v1740_v57 = vsub.f32 %v3364_v0, %v1632_v43  ;;  %2534 = vlog2.f32 %v1514_v60 }
 0x31d   :  { %v2525_v56 = vpop.eup %2524  ;;  %v1739_v5 = vsub.f32 %v3360_v17, %v1630_v3 }
 0x31e   :  { %v2527_v41 = vpop.eup %2526  ;;  %1805 = vst.msk [vmem:[%s3869_s5 + $0x98] sm:$0xff] %vm1785_vm1, %v1740_v57  ;;  %v1636_v25 = vmul.f32 0.6931472, %v2525_v56  ;;  %v1520_v59 = vpop.xlane.xlu1 %1519 }
 0x31f   :  { %1804 = vst.msk [vmem:[%s3869_s5 + $0x90] sm:$0xff] %vm1785_vm1, %v1739_v5  ;;  %v1634_v61 = vmul.f32 0.6931472, %v2527_v41  ;;  %2536 = vlog2.f32 %v1520_v59  ;;  %v1518_v0 = vpop.xlane.xlu0 %1517 }
 0x320   :  { %v1742_v27 = vsub.f32 %v3372_v4, %v1636_v25  ;;  %2538 = vlog2.f32 %v1518_v0 }
 0x321   :  { %v2529_v17 = vpop.eup %2528  ;;  %v1741_v44 = vsub.f32 %v3368_v21, %v1634_v61 }
 0x322   :  { %v2531_v54 = vpop.eup %2530  ;;  %1807 = vst.msk [vmem:[%s3869_s5 + $0xa8] sm:$0xff] %vm1785_vm1, %v1742_v27  ;;  %v1640_v34 = vmul.f32 0.6931472, %v2529_v17  ;;  %v1524_v35 = vpop.xlane.xlu1 %1523 }
 0x323   :  { %1806 = vst.msk [vmem:[%s3869_s5 + $0xa0] sm:$0xff] %vm1785_vm1, %v1741_v44  ;;  %v1638_v32 = vmul.f32 0.6931472, %v2531_v54  ;;  %2540 = vlog2.f32 %v1524_v35  ;;  %v1522_v4 = vpop.xlane.xlu0 %1521 }
 0x324   :  { %v1744_v49 = vsub.f32 %v3380_v8, %v1640_v34  ;;  %2542 = vlog2.f32 %v1522_v4 }
 0x325   :  { %v2533_v21 = vpop.eup %2532  ;;  %v1743_v53 = vsub.f32 %v3376_v29, %v1638_v32 }
 0x326   :  { %v2535_v51 = vpop.eup %2534  ;;  %1809 = vst.msk [vmem:[%s3869_s5 + $0xb8] sm:$0xff] %vm1785_vm1, %v1744_v49  ;;  %v1644_v45 = vmul.f32 0.6931472, %v2533_v21  ;;  %v1528_v9 = vpop.xlane.xlu1 %1527 }
 0x327   :  { %1808 = vst.msk [vmem:[%s3869_s5 + $0xb0] sm:$0xff] %vm1785_vm1, %v1743_v53  ;;  %v1642_v42 = vmul.f32 0.6931472, %v2535_v51  ;;  %2544 = vlog2.f32 %v1528_v9  ;;  %v1526_v8 = vpop.xlane.xlu0 %1525 }
 0x328   :  { %v1746_v46 = vsub.f32 %v3388_v12, %v1644_v45  ;;  %2546 = vlog2.f32 %v1526_v8 }
 0x329   :  { %v2537_v29 = vpop.eup %2536  ;;  %v1745_v36 = vsub.f32 %v3384_v50, %v1642_v42 }
 0x32a   :  { %v2539_v52 = vpop.eup %2538  ;;  %1811 = vst.msk [vmem:[%s3869_s5 + $0xc8] sm:$0xff] %vm1785_vm1, %v1746_v46  ;;  %v1648_v39 = vmul.f32 0.6931472, %v2537_v29  ;;  %v1532_v38 = vpop.xlane.xlu1 %1531 }
 0x32b   :  { %1810 = vst.msk [vmem:[%s3869_s5 + $0xc0] sm:$0xff] %vm1785_vm1, %v1745_v36  ;;  %v1646_v43 = vmul.f32 0.6931472, %v2539_v52  ;;  %2548 = vlog2.f32 %v1532_v38  ;;  %v1530_v12 = vpop.xlane.xlu0 %1529 }
 0x32c   :  { %v1748_v30 = vsub.f32 %v3396_v16, %v1648_v39  ;;  %2550 = vlog2.f32 %v1530_v12 }
 0x32d   :  { %v2541_v50 = vpop.eup %2540  ;;  %v1747_v3 = vsub.f32 %v3392_v48, %v1646_v43 }
 0x32e   :  { %v2543_v60 = vpop.eup %2542  ;;  %1813 = vst.msk [vmem:[%s3869_s5 + $0xd8] sm:$0xff] %vm1785_vm1, %v1748_v30  ;;  %v1652_v57 = vmul.f32 0.6931472, %v2541_v50  ;;  %v1536_v56 = vpop.xlane.xlu1 %1535 }
 0x32f   :  { %1812 = vst.msk [vmem:[%s3869_s5 + $0xd0] sm:$0xff] %vm1785_vm1, %v1747_v3  ;;  %v1650_v5 = vmul.f32 0.6931472, %v2543_v60  ;;  %2552 = vlog2.f32 %v1536_v56  ;;  %v1534_v16 = vpop.xlane.xlu0 %1533 }
 0x330   :  { %v1750_v41 = vsub.f32 %v3404_v20, %v1652_v57  ;;  %2554 = vlog2.f32 %v1534_v16 }
 0x331   :  { %v2545_v48 = vpop.eup %2544  ;;  %v1749_v25 = vsub.f32 %v3400_v58, %v1650_v5 }
 0x332   :  { %v2547_v59 = vpop.eup %2546  ;;  %1815 = vst.msk [vmem:[%s3869_s5 + $0xe8] sm:$0xff] %vm1785_vm1, %v1750_v41  ;;  %v1656_v61 = vmul.f32 0.6931472, %v2545_v48  ;;  %v1540_v0 = vpop.xlane.xlu1 %1539 }
 0x333   :  { %1814 = vst.msk [vmem:[%s3869_s5 + $0xe0] sm:$0xff] %vm1785_vm1, %v1749_v25  ;;  %v1654_v27 = vmul.f32 0.6931472, %v2547_v59  ;;  %2556 = vlog2.f32 %v1540_v0  ;;  %v1538_v20 = vpop.xlane.xlu0 %1537 }
 0x334   :  { %v1752_v17 = vsub.f32 %v3412_v24, %v1656_v61  ;;  %2558 = vlog2.f32 %v1538_v20 }
 0x335   :  { %v2549_v58 = vpop.eup %2548  ;;  %v1751_v44 = vsub.f32 %v3408_v62, %v1654_v27 }
 0x336   :  { %v2551_v54 = vpop.eup %2550  ;;  %1817 = vst.msk [vmem:[%s3869_s5 + $0xf8] sm:$0xff] %vm1785_vm1, %v1752_v17  ;;  %v1660_v34 = vmul.f32 0.6931472, %v2549_v58  ;;  %v1544_v35 = vpop.xlane.xlu1 %1543 }
 0x337   :  { %1816 = vst.msk [vmem:[%s3869_s5 + $0xf0] sm:$0xff] %vm1785_vm1, %v1751_v44  ;;  %v1658_v32 = vmul.f32 0.6931472, %v2551_v54  ;;  %2560 = vlog2.f32 %v1544_v35  ;;  %v1542_v24 = vpop.xlane.xlu0 %1541 }
 0x338   :  { %v1754_v4 = vsub.f32 %v3420_v28, %v1660_v34  ;;  %2562 = vlog2.f32 %v1542_v24 }
 0x339   :  { %v2553_v62 = vpop.eup %2552  ;;  %v1753_v49 = vsub.f32 %v3416_v2, %v1658_v32 }
 0x33a   :  { %v2555_v21 = vpop.eup %2554  ;;  %1819 = vst.msk [vmem:[%s3869_s5 + $0x108] sm:$0xff] %vm1785_vm1, %v1754_v4  ;;  %v1664_v53 = vmul.f32 0.6931472, %v2553_v62  ;;  %v1548_v51 = vpop.xlane.xlu1 %1547 }
 0x33b   :  { %1818 = vst.msk [vmem:[%s3869_s5 + $0x100] sm:$0xff] %vm1785_vm1, %v1753_v49  ;;  %v1662_v45 = vmul.f32 0.6931472, %v2555_v21  ;;  %2564 = vlog2.f32 %v1548_v51  ;;  %v1546_v28 = vpop.xlane.xlu0 %1545 }
 0x33c   :  { %v1756_v9 = vsub.f32 %v3428_v33, %v1664_v53  ;;  %2566 = vlog2.f32 %v1546_v28 }
 0x33d   :  { %v2557_v2 = vpop.eup %2556  ;;  %v1755_v42 = vsub.f32 %v3424_v6, %v1662_v45 }
 0x33e   :  { %v2559_v8 = vpop.eup %2558  ;;  %1821 = vst.msk [vmem:[%s3869_s5 + $0x118] sm:$0xff] %vm1785_vm1, %v1756_v9  ;;  %v1668_v46 = vmul.f32 0.6931472, %v2557_v2  ;;  %v1552_v29 = vpop.xlane.xlu1 %1551 }
 0x33f   :  { %1820 = vst.msk [vmem:[%s3869_s5 + $0x110] sm:$0xff] %vm1785_vm1, %v1755_v42  ;;  %v1666_v36 = vmul.f32 0.6931472, %v2559_v8  ;;  %2568 = vlog2.f32 %v1552_v29  ;;  %v1550_v33 = vpop.xlane.xlu0 %1549  ;;  %v3929_v29 = vld [vmem:[#allocation16_spill] sm:$0xff] }
 0x340   :  { %v1758_v52 = vsub.f32 %v3436_v40, %v1668_v46  ;;  %2570 = vlog2.f32 %v1550_v33  ;;  %v3930_v33 = vld [vmem:[#allocation15_spill] sm:$0xff] }
 0x341   :  { %v2561_v6 = vpop.eup %2560  ;;  %v1757_v39 = vsub.f32 %v3432_v10, %v1666_v36 }
 0x342   :  { %v2563_v38 = vpop.eup %2562  ;;  %1823 = vst.msk [vmem:[%s3869_s5 + $0x128] sm:$0xff] %vm1785_vm1, %v1758_v52  ;;  %v1672_v43 = vmul.f32 0.6931472, %v2561_v6  ;;  %v1556_v12 = vpop.xlane.xlu1 %1555 }
 0x343   :  { %1822 = vst.msk [vmem:[%s3869_s5 + $0x120] sm:$0xff] %vm1785_vm1, %v1757_v39  ;;  %v1670_v30 = vmul.f32 0.6931472, %v2563_v38  ;;  %2572 = vlog2.f32 %v1556_v12  ;;  %v1554_v40 = vpop.xlane.xlu0 %1553 }
 0x344   :  { %v1760_v50 = vsub.f32 %v3444_v47, %v1672_v43  ;;  %2574 = vlog2.f32 %v1554_v40 }
 0x345   :  { %v2565_v10 = vpop.eup %2564  ;;  %v1759_v3 = vsub.f32 %v3440_v14, %v1670_v30  ;;  %v3931_v30 = vld [vmem:[#allocation2_spill] sm:$0xff] }
 0x346   :  { %v2567_v60 = vpop.eup %2566  ;;  %1825 = vst.msk [vmem:[%s3869_s5 + $0x138] sm:$0xff] %vm1785_vm1, %v1760_v50  ;;  %v1676_v57 = vmul.f32 0.6931472, %v2565_v10  ;;  %v1560_v56 = vpop.xlane.xlu1 %1559  ;;  %v3932_v10 = vld [vmem:[#allocation17_spill] sm:$0xff] }
 0x347   :  { %1824 = vst.msk [vmem:[%s3869_s5 + $0x130] sm:$0xff] %vm1785_vm1, %v1759_v3  ;;  %v1674_v5 = vmul.f32 0.6931472, %v2567_v60  ;;  %2576 = vlog2.f32 %v1560_v56  ;;  %v1558_v47 = vpop.xlane.xlu0 %1557 }
 0x348   :  { %v1762_v16 = vsub.f32 %v3452_v55, %v1676_v57  ;;  %2578 = vlog2.f32 %v1558_v47 }
 0x349   :  { %v2569_v14 = vpop.eup %2568  ;;  %v1761_v41 = vsub.f32 %v3448_v18, %v1674_v5 }
 0x34a   :  { %v2571_v48 = vpop.eup %2570  ;;  %1827 = vst.msk [vmem:[%s3869_s5 + $0x148] sm:$0xff] %vm1785_vm1, %v1762_v16  ;;  %v1680_v25 = vmul.f32 0.6931472, %v2569_v14  ;;  %v1564_v59 = vpop.xlane.xlu1 %1563  ;;  %v3933_v16 = vld [vmem:[#allocation4_spill] sm:$0xff] }
 0x34b   :  { %1826 = vst.msk [vmem:[%s3869_s5 + $0x140] sm:$0xff] %vm1785_vm1, %v1761_v41  ;;  %v1678_v61 = vmul.f32 0.6931472, %v2571_v48  ;;  %2580 = vlog2.f32 %v1564_v59  ;;  %v1562_v55 = vpop.xlane.xlu0 %1561  ;;  %v3934_v48 = vld [vmem:[#allocation3_spill] sm:$0xff] }
 0x34c   :  { %v1764_v0 = vsub.f32 %v3460_v63, %v1680_v25  ;;  %2582 = vlog2.f32 %v1562_v55 }
 0x34d   :  { %v2573_v18 = vpop.eup %2572  ;;  %v1763_v27 = vsub.f32 %v3456_v22, %v1678_v61 }
 0x34e   :  { %v2575_v20 = vpop.eup %2574  ;;  %1829 = vst.msk [vmem:[%s3869_s5 + $0x158] sm:$0xff] %vm1785_vm1, %v1764_v0  ;;  %v1684_v17 = vmul.f32 0.6931472, %v2573_v18  ;;  %v1568_v58 = vpop.xlane.xlu1 %1567 }
 0x34f   :  { %1828 = vst.msk [vmem:[%s3869_s5 + $0x150] sm:$0xff] %vm1785_vm1, %v1763_v27  ;;  %v1682_v44 = vmul.f32 0.6931472, %v2575_v20  ;;  %2584 = vlog2.f32 %v1568_v58  ;;  %v1566_v63 = vpop.xlane.xlu0 %1565  ;;  %v3935_v27 = vld [vmem:[#allocation6_spill] sm:$0xff]  ;;  %v3936_v58 = vld [vmem:[#allocation5_spill] sm:$0xff] }
 0x350   :  { %v1766_v54 = vsub.f32 %v3468_v7, %v1684_v17  ;;  %2586 = vlog2.f32 %v1566_v63 }
 0x351   :  { %v2577_v22 = vpop.eup %2576  ;;  %v1765_v34 = vsub.f32 %v3464_v26, %v1682_v44 }
 0x352   :  { %v2579_v35 = vpop.eup %2578  ;;  %1831 = vst.msk [vmem:[%s3869_s5 + $0x168] sm:$0xff] %vm1785_vm1, %v1766_v54  ;;  %v1688_v32 = vmul.f32 0.6931472, %v2577_v22  ;;  %v1572_v24 = vpop.xlane.xlu1 %1571 }
 0x353   :  { %1830 = vst.msk [vmem:[%s3869_s5 + $0x160] sm:$0xff] %vm1785_vm1, %v1765_v34  ;;  %v1686_v4 = vmul.f32 0.6931472, %v2579_v35  ;;  %2588 = vlog2.f32 %v1572_v24  ;;  %v1570_v7 = vpop.xlane.xlu0 %1569 }
 0x354   :  { %v1768_v62 = vsub.f32 %v3476_v15, %v1688_v32  ;;  %2590 = vlog2.f32 %v1570_v7  ;;  %v3937_v32 = vld [vmem:[#allocation7_spill] sm:$0xff] }
 0x355   :  { %v2581_v26 = vpop.eup %2580  ;;  %v1767_v49 = vsub.f32 %v3472_v31, %v1686_v4 }
 0x356   :  { %v2583_v21 = vpop.eup %2582  ;;  %1833 = vst.msk [vmem:[%s3869_s5 + $0x178] sm:$0xff] %vm1785_vm1, %v1768_v62  ;;  %v1692_v53 = vmul.f32 0.6931472, %v2581_v26  ;;  %v1576_v51 = vpop.xlane.xlu1 %1575 }
 0x357   :  { %1832 = vst.msk [vmem:[%s3869_s5 + $0x170] sm:$0xff] %vm1785_vm1, %v1767_v49  ;;  %v1690_v45 = vmul.f32 0.6931472, %v2583_v21  ;;  %2592 = vlog2.f32 %v1576_v51  ;;  %v1574_v15 = vpop.xlane.xlu0 %1573 }
 0x358   :  { %v1770_v28 = vsub.f32 %v3484_v23, %v1692_v53  ;;  %2594 = vlog2.f32 %v1574_v15  ;;  %v3938_v15 = vld [vmem:[#allocation8_spill] sm:$0xff] }
 0x359   :  { %v2585_v31 = vpop.eup %2584  ;;  %v1769_v9 = vsub.f32 %v3480_v37, %v1690_v45 }
 0x35a   :  { %v2587_v2 = vpop.eup %2586  ;;  %1835 = vst.msk [vmem:[%s3869_s5 + $0x188] sm:$0xff] %vm1785_vm1, %v1770_v28  ;;  %v1696_v42 = vmul.f32 0.6931472, %v2585_v31  ;;  %v1580_v8 = vpop.xlane.xlu1 %1579 }
 0x35b   :  { %1834 = vst.msk [vmem:[%s3869_s5 + $0x180] sm:$0xff] %vm1785_vm1, %v1769_v9  ;;  %v1694_v46 = vmul.f32 0.6931472, %v2587_v2  ;;  %2596 = vlog2.f32 %v1580_v8  ;;  %v1578_v23 = vpop.xlane.xlu0 %1577 }
 0x35c   :  { %v1772_v36 = vsub.f32 %v3929_v29, %v1696_v42  ;;  %2598 = vlog2.f32 %v1578_v23 }
 0x35d   :  { %v2589_v37 = vpop.eup %2588  ;;  %v1771_v52 = vsub.f32 %v3930_v33, %v1694_v46 }
 0x35e   :  { %v2591_v6 = vpop.eup %2590  ;;  %1837 = vst.msk [vmem:[%s3869_s5 + $0x198] sm:$0xff] %vm1785_vm1, %v1772_v36  ;;  %v1700_v39 = vmul.f32 0.6931472, %v2589_v37  ;;  %v1584_v38 = vpop.xlane.xlu1 %1583 }
 0x35f   :  { %1836 = vst.msk [vmem:[%s3869_s5 + $0x190] sm:$0xff] %vm1785_vm1, %v1771_v52  ;;  %v1698_v43 = vmul.f32 0.6931472, %v2591_v6  ;;  %2600 = vlog2.f32 %v1584_v38  ;;  %v1582_v12 = vpop.xlane.xlu0 %1581 }
 0x360   :  { %v1774_v40 = vsub.f32 %v3931_v30, %v1700_v39  ;;  %2602 = vlog2.f32 %v1582_v12 }
 0x361   :  { %v2593_v50 = vpop.eup %2592  ;;  %v1773_v3 = vsub.f32 %v3932_v10, %v1698_v43 }
 0x362   :  { %v2595_v60 = vpop.eup %2594  ;;  %1839 = vst.msk [vmem:[%s3869_s5 + $0x1a8] sm:$0xff] %vm1785_vm1, %v1774_v40  ;;  %v1704_v57 = vmul.f32 0.6931472, %v2593_v50  ;;  %v1588_v56 = vpop.xlane.xlu1 %1587 }
 0x363   :  { %1838 = vst.msk [vmem:[%s3869_s5 + $0x1a0] sm:$0xff] %vm1785_vm1, %v1773_v3  ;;  %v1702_v5 = vmul.f32 0.6931472, %v2595_v60  ;;  %2604 = vlog2.f32 %v1588_v56  ;;  %v1586_v47 = vpop.xlane.xlu0 %1585 }
 0x364   :  { %v1776_v14 = vsub.f32 %v3933_v16, %v1704_v57  ;;  %2606 = vlog2.f32 %v1586_v47 }
 0x365   :  { %v2597_v41 = vpop.eup %2596  ;;  %v1775_v25 = vsub.f32 %v3934_v48, %v1702_v5 }
 0x366   :  { %v2599_v59 = vpop.eup %2598  ;;  %1841 = vst.msk [vmem:[%s3869_s5 + $0x1b8] sm:$0xff] %vm1785_vm1, %v1776_v14  ;;  %v1708_v61 = vmul.f32 0.6931472, %v2597_v41  ;;  %v1592_v55 = vpop.xlane.xlu1 %1591 }
 0x367   :  { %1840 = vst.msk [vmem:[%s3869_s5 + $0x1b0] sm:$0xff] %vm1785_vm1, %v1775_v25  ;;  %v1706_v0 = vmul.f32 0.6931472, %v2599_v59  ;;  %2608 = vlog2.f32 %v1592_v55  ;;  %v1590_v18 = vpop.xlane.xlu0 %1589 }
 0x368   :  { %v1778_v20 = vsub.f32 %v3935_v27, %v1708_v61  ;;  %2610 = vlog2.f32 %v1590_v18 }
 0x369   :  { %v2601_v17 = vpop.eup %2600  ;;  %v1777_v44 = vsub.f32 %v3936_v58, %v1706_v0 }
 0x36a   :  { %v2603_v63 = vpop.eup %2602  ;;  %1843 = vst.msk [vmem:[%s3869_s5 + $0x1c8] sm:$0xff] %vm1785_vm1, %v1778_v20  ;;  %v1712_v54 = vmul.f32 0.6931472, %v2601_v17 }
 0x36b   :  { %1842 = vst.msk [vmem:[%s3869_s5 + $0x1c0] sm:$0xff] %vm1785_vm1, %v1777_v44  ;;  %v1710_v22 = vmul.f32 0.6931472, %v2603_v63 }
 0x36c   :  { %v1780_v34 = vsub.f32 %v3524_v11, %v1712_v54 }
 0x36d   :  { %v2605_v35 = vpop.eup %2604  ;;  %v1779_v24 = vsub.f32 %v3937_v32, %v1710_v22 }
 0x36e   :  { %v2607_v4 = vpop.eup %2606  ;;  %1845 = vst.msk [vmem:[%s3869_s5 + $0x1d8] sm:$0xff] %vm1785_vm1, %v1780_v34  ;;  %v1716_v7 = vmul.f32 0.6931472, %v2605_v35 }
 0x36f   :  { %1844 = vst.msk [vmem:[%s3869_s5 + $0x1d0] sm:$0xff] %vm1785_vm1, %v1779_v24  ;;  %v1714_v62 = vmul.f32 0.6931472, %v2607_v4 }
 0x370   :  { %v1782_v26 = vsub.f32 %v3532_v19, %v1716_v7 }
 0x371   :  { %v2609_v49 = vpop.eup %2608  ;;  %v1781_v11 = vsub.f32 %v3528_v13, %v1714_v62 }
 0x372   :  { %v2611_v21 = vpop.eup %2610  ;;  %1847 = vst.msk [vmem:[%s3869_s5 + $0x1e8] sm:$0xff] %vm1785_vm1, %v1782_v26  ;;  %v1720_v53 = vmul.f32 0.6931472, %v2609_v49 }
 0x373   :  { %1846 = vst.msk [vmem:[%s3869_s5 + $0x1e0] sm:$0xff] %vm1785_vm1, %v1781_v11  ;;  %v1718_v51 = vmul.f32 0.6931472, %v2611_v21 }
 0x374   :  { %v1784_v45 = vsub.f32 %v3540_v1, %v1720_v53 }
 0x375   :  { %v1783_v19 = vsub.f32 %v3938_v15, %v1718_v51 }
 0x376   :  { %1849 = vst.msk [vmem:[%s3869_s5 + $0x1f8] sm:$0xff] %vm1785_vm1, %v1784_v45 }
 0x377   :  { %1848 = vst.msk [vmem:[%s3869_s5 + $0x1f0] sm:$0xff] %vm1785_vm1, %v1783_v19 }

</bundles_post_ra>
